<compile_context>
chip_gen: v5e
topology: v5e:2x2
jax: 0.10.0
libtpu: 0.0.40
codegen_flags: <defaults>
</compile_context>

<pallas_src>
import functools

import jax
import jax.numpy as jnp
from jax import lax
from jax.experimental import pallas as pl
from jax.experimental.pallas import tpu as pltpu


# ---------------------------------------------------------------------------
# Kernel
# ---------------------------------------------------------------------------
def _dualnet_kernel(mask_ref, x_ref, h_ref,
                    w1_ref, b1_ref, a1_ref,
                    w2_ref, b2_ref, a2_ref,
                    w3_ref, b3_ref,
                    out_ref, stack_ref, *, img_h, img_w):
    """Fused: conv3x3 -> PReLU -> conv3x3 -> PReLU -> conv3x3 -> residual add.

    Processes one image per grid step.  Activations are (C, H*W) f32 slabs;
    each conv is a single bf16 MXU matmul against an im2row scratch slab.
    """
    hw = img_h * img_w
    taps = [(sy, sx) for sy in (-1, 0, 1) for sx in (-1, 0, 1)]

    def conv3x3(x_f32, w_ref_, b_ref_):
        """3x3 zero-padded conv as one fused-K matmul via the im2row scratch."""
        c_in = x_f32.shape[0]
        for t, (sy, sx) in enumerate(taps):
            s = sy * img_w + sx
            if s == 0:
                shifted = x_f32                     # center tap: mask is all-ones
            else:
                # shifted[:, p] = x[:, p + s]; out-of-image taps are zeroed by
                # the precomputed boundary mask (zero-padding semantics).
                shifted = pltpu.roll(x_f32, shift=(-s) % hw, axis=1) * mask_ref[t]
            # bf16 only at the MXU input; rolls/masks stay f32 (v5e-safe).
            stack_ref[pl.ds(t * c_in, c_in), :] = shifted.astype(jnp.bfloat16)
        stacked = stack_ref[pl.ds(0, 9 * c_in), :]          # (9*c_in, hw) bf16
        y = jnp.dot(w_ref_[...], stacked,                   # bf16 x bf16 -> f32
                    preferred_element_type=jnp.float32)
        return y + b_ref_[...]                              # (c_out, 1) bias bcast

    def prelu(y, a_ref_):
        a = a_ref_[0]                                       # shared slope (SMEM)
        return jnp.where(y >= 0.0, y, a * y)

    x = x_ref[...]                                          # (C_IN_PAD, hw) f32
    y = prelu(conv3x3(x, w1_ref, b1_ref), a1_ref)           # (32, hw) f32
    y = prelu(conv3x3(y, w2_ref, b2_ref), a2_ref)           # (32, hw) f32
    y = conv3x3(y, w3_ref, b3_ref)                          # (C_OUT_PAD, hw) f32
    out_ref[...] = h_ref[...] + y                           # residual (aliased)


# ---------------------------------------------------------------------------
# Wrapper
# ---------------------------------------------------------------------------
def _round_up(v, m):
    return (v + m - 1) // m * m


def _fuse_conv_weight(wt, c_in_pad, c_out_pad):
    """(C_out, C_in, 3, 3) -> (c_out_pad, 9*c_in_pad) bf16, tap-major columns."""
    c_out, c_in = wt.shape[0], wt.shape[1]
    w = jnp.transpose(wt, (0, 2, 3, 1)).reshape(c_out, 9, c_in)  # [o, ky*3+kx, i]
    w = jnp.pad(w, ((0, c_out_pad - c_out), (0, 0), (0, c_in_pad - c_in)))
    return w.reshape(c_out_pad, 9 * c_in_pad).astype(jnp.bfloat16)


def _pad_bias(b, c_pad):
    return jnp.pad(b.astype(jnp.float32), (0, c_pad - b.shape[0])).reshape(c_pad, 1)


def _boundary_masks(img_h, img_w):
    """(9, 1, H*W) f32 validity masks for the 9 taps (zero-padding semantics)."""
    idx = jnp.arange(img_h * img_w, dtype=jnp.int32)
    row, col = idx // img_w, idx % img_w
    masks = []
    for sy in (-1, 0, 1):
        for sx in (-1, 0, 1):
            m = ((row + sy >= 0) & (row + sy < img_h) &
                 (col + sx >= 0) & (col + sx < img_w))
            masks.append(m)
    return jnp.stack(masks, axis=0).astype(jnp.float32)[:, None, :]


def _resident_spec(shape):
    """Full-array block with a constant index_map: stays resident across steps."""
    nd = len(shape)

    def index_map(i):
        return (0,) * nd

    return pl.BlockSpec(shape, index_map)


@jax.jit
def dualnet_forward(hx, op_f, g, params):
    """hx: (N, n_dual, H, W), op_f/g: (N, 1, H, W) -- PyTorch NCHW convention."""
    n, n_dual, img_h, img_w = hx.shape
    hw = img_h * img_w
    c_in = n_dual + 2
    c_mid = params['w1'].shape[0]                     # 32
    c_in_pad = _round_up(c_in, 16)                    # bf16 packs 16 rows / vreg
    c_mid_pad = _round_up(c_mid, 16)
    c_out_pad = _round_up(n_dual, 8)                  # f32 sublane multiple

    # NCHW -> (N, C, H*W) is a pure reshape (no transpose); concat + channel
    # zero-pad are the only wrapper glue.
    x = jnp.concatenate([hx, op_f, g], axis=1).reshape(n, c_in, hw)
    x = jnp.pad(x, ((0, 0), (0, c_in_pad - c_in), (0, 0))).astype(jnp.float32)
    h = jnp.pad(hx.reshape(n, n_dual, hw),
                ((0, 0), (0, c_out_pad - n_dual), (0, 0))).astype(jnp.float32)

    mask = _boundary_masks(img_h, img_w)

    w1 = _fuse_conv_weight(params['w1'], c_in_pad, c_mid_pad)     # (32, 144)
    w2 = _fuse_conv_weight(params['w2'], c_mid_pad, c_mid_pad)    # (32, 288)
    w3 = _fuse_conv_weight(params['w3'], c_mid_pad, c_out_pad)    # ( 8, 288)
    b1 = _pad_bias(params['b1'], c_mid_pad)
    b2 = _pad_bias(params['b2'], c_mid_pad)
    b3 = _pad_bias(params['b3'], c_out_pad)
    a1 = params['a1'].astype(jnp.float32)             # (1,) shared PReLU slope
    a2 = params['a2'].astype(jnp.float32)

    kernel = functools.partial(_dualnet_kernel, img_h=img_h, img_w=img_w)

    in_specs = [
        _resident_spec(mask.shape),                                   # tap masks
        pl.BlockSpec((None, c_in_pad, hw), lambda i: (i, 0, 0)),      # x (per image)
        pl.BlockSpec((None, c_out_pad, hw), lambda i: (i, 0, 0)),     # h (aliased)
        _resident_spec(w1.shape), _resident_spec(b1.shape),
        pl.BlockSpec(memory_space=pltpu.MemorySpace.SMEM),            # a1
        _resident_spec(w2.shape), _resident_spec(b2.shape),
        pl.BlockSpec(memory_space=pltpu.MemorySpace.SMEM),            # a2
        _resident_spec(w3.shape), _resident_spec(b3.shape),
    ]

    out_pad = pl.pallas_call(
        kernel,
        out_shape=jax.ShapeDtypeStruct((n, c_out_pad, hw), jnp.float32),
        grid_spec=pltpu.PrefetchScalarGridSpec(
            num_scalar_prefetch=0,
            grid=(n,),
            in_specs=in_specs,
            out_specs=pl.BlockSpec((None, c_out_pad, hw), lambda i: (i, 0, 0)),
            scratch_shapes=[
                pltpu.VMEM((9 * max(c_in_pad, c_mid_pad), hw), jnp.bfloat16),
            ],
        ),
        input_output_aliases={2: 0},   # reuse the h buffer as the output
        compiler_params=pltpu.CompilerParams(
            dimension_semantics=("parallel",),        # v7x: 2 TCs over the batch
            vmem_limit_bytes=48 * 1024 * 1024,        # explicit (> default scoped)
        ),
    )(mask, x, h, w1, b1, a1, w2, b2, a2, w3, b3)

    return out_pad[:, :n_dual, :].reshape(n, n_dual, img_h, img_w)


# ---------------------------------------------------------------------------
# Pure-JAX reference (mirrors the PyTorch module) for verification
# ---------------------------------------------------------------------------
def dualnet_reference(hx, op_f, g, params, *, quantize_matmul_inputs=False):
    """If quantize_matmul_inputs, conv operands are rounded to bf16 (then f32
    math), matching the kernel's bf16-MXU / f32-accumulate numerics."""
    def q(t):
        return t.astype(jnp.bfloat16).astype(jnp.float32) if quantize_matmul_inputs else t

    x = jnp.concatenate([hx, op_f, g], axis=1)

    def conv(z, wt, bt):
        y = lax.conv_general_dilated(
            q(z), q(wt), (1, 1), 'SAME',
            dimension_numbers=('NCHW', 'OIHW', 'NCHW'))
        return y + bt.reshape(1, -1, 1, 1)

    def prelu(z, a):
        return jnp.where(z >= 0, z, a * z)

    y = prelu(conv(x, params['w1'], params['b1']), params['a1'][0])
    y = prelu(conv(y, params['w2'], params['b2']), params['a2'][0])
    y = conv(y, params['w3'], params['b3'])
    return hx + y


def init_params(key, n_dual):
    n_ch = n_dual + 2
    k = jax.random.split(key, 6)
    s = 0.1
    return {
        'w1': s * jax.random.normal(k[0], (32, n_ch, 3, 3), jnp.float32),
        'b1': s * jax.random.normal(k[1], (32,), jnp.float32),
        'a1': jnp.full((1,), 0.25, jnp.float32),   # nn.PReLU default init
        'w2': s * jax.random.normal(k[2], (32, 32, 3, 3), jnp.float32),
        'b2': s * jax.random.normal(k[3], (32,), jnp.float32),
        'a2': jnp.full((1,), 0.25, jnp.float32),
        'w3': s * jax.random.normal(k[4], (n_dual, 32, 3, 3), jnp.float32),
        'b3': s * jax.random.normal(k[5], (n_dual,), jnp.float32),
    }


if __name__ == "__main__":
    key = jax.random.PRNGKey(0)
    n_dual = 4
    N, H, W = 2, 16, 16

    kp, kh, ko, kg = jax.random.split(key, 4)
    params = init_params(kp, n_dual)
    hx = jax.random.normal(kh, (N, n_dual, H, W), jnp.float32)
    op_f = jax.random.normal(ko, (N, 1, H, W), jnp.float32)
    g = jax.random.normal(kg, (N, 1, H, W), jnp.float32)

    out = jax.block_until_ready(dualnet_forward(hx, op_f, g, params))
    assert out.shape == hx.shape, (out.shape, hx.shape)

    # 1) Precision-matched reference: same bf16 rounding of MXU operands with
    #    f32 accumulation -> only summation-order noise should remain.
    ref_q = dualnet_reference(hx, op_f, g, params, quantize_matmul_inputs=True)
    err_q = float(jnp.max(jnp.abs(out - ref_q)))
    assert jnp.allclose(out, ref_q, atol=3e-3, rtol=0), err_q

    # 2) Exact f32 module reference: difference is bounded by the bf16
    #    MXU-input quantization (~1e-2 at these weight/activation scales).
    ref = dualnet_reference(hx, op_f, g, params)
    err = float(jnp.max(jnp.abs(out - ref)))
    assert err < 5e-2, err

    print("KERNEL_OK")
</pallas_src>

<mosaic_0001>
module attributes {stable_mosaic.version = 11 : i64} {
  func.func @_dualnet_kernel(%arg0: i32, %arg1: memref<9x1x256xf32, #tpu.memory_space<vmem>>, %arg2: memref<1x16x256xf32, #tpu.memory_space<vmem>>, %arg3: memref<1x8x256xf32, #tpu.memory_space<vmem>>, %arg4: memref<32x144xbf16, #tpu.memory_space<vmem>>, %arg5: memref<32x1xf32, #tpu.memory_space<vmem>>, %arg6: memref<1xf32, #tpu.memory_space<smem>>, %arg7: memref<32x288xbf16, #tpu.memory_space<vmem>>, %arg8: memref<32x1xf32, #tpu.memory_space<vmem>>, %arg9: memref<1xf32, #tpu.memory_space<smem>>, %arg10: memref<8x288xbf16, #tpu.memory_space<vmem>>, %arg11: memref<8x1xf32, #tpu.memory_space<vmem>>, %arg12: memref<1x8x256xf32, #tpu.memory_space<vmem>>, %arg13: memref<288x256xbf16, #tpu.memory_space<vmem>>) attributes {dimension_semantics = [#tpu.dimension_semantics<parallel>], iteration_bounds = array<i64: 2>, scalar_prefetch = 0 : i64, scratch_operands = 1 : i64, tpu.core_type = #tpu.core_type<tc>, window_params = [{pipeline_mode = #tpu.pipeline_mode<synchronous>, transform_indices = @transform_0, window_bounds = array<i64: 9, 1, 256>}, {transform_indices = @transform_1, window_bounds = array<i64: 1, 16, 256>}, {transform_indices = @transform_2, window_bounds = array<i64: 1, 8, 256>}, {pipeline_mode = #tpu.pipeline_mode<synchronous>, transform_indices = @transform_3, window_bounds = array<i64: 32, 144>}, {pipeline_mode = #tpu.pipeline_mode<synchronous>, transform_indices = @transform_4, window_bounds = array<i64: 32, 1>}, {transform_indices = @transform_5, window_bounds = array<i64: 1>}, {pipeline_mode = #tpu.pipeline_mode<synchronous>, transform_indices = @transform_6, window_bounds = array<i64: 32, 288>}, {pipeline_mode = #tpu.pipeline_mode<synchronous>, transform_indices = @transform_7, window_bounds = array<i64: 32, 1>}, {transform_indices = @transform_8, window_bounds = array<i64: 1>}, {pipeline_mode = #tpu.pipeline_mode<synchronous>, transform_indices = @transform_9, window_bounds = array<i64: 8, 288>}, {pipeline_mode = #tpu.pipeline_mode<synchronous>, transform_indices = @transform_10, window_bounds = array<i64: 8, 1>}, {transform_indices = @transform_11, window_bounds = array<i64: 1, 8, 256>}]} {
    %c0 = arith.constant 0 : index
    %c0_0 = arith.constant 0 : index
    %c0_1 = arith.constant 0 : index
    %0 = vector.load %arg2[%c0, %c0_0, %c0_1] : memref<1x16x256xf32, #tpu.memory_space<vmem>>, vector<1x16x256xf32>
    %1 = vector.shape_cast %0 : vector<1x16x256xf32> to vector<16x256xf32>
    %c17_i32 = arith.constant 17 : i32
    %2 = tpu.dynamic_rotate %1 by %c17_i32 dim 1 : vector<16x256xf32>, i32 -> vector<16x256xf32>
    %c0_2 = arith.constant 0 : index
    %c0_3 = arith.constant 0 : index
    %c0_4 = arith.constant 0 : index
    %3 = vector.load %arg1[%c0_2, %c0_3, %c0_4] : memref<9x1x256xf32, #tpu.memory_space<vmem>>, vector<1x1x256xf32>
    %4 = vector.shape_cast %3 : vector<1x1x256xf32> to vector<1x256xf32>
    %5 = vector.broadcast %4 : vector<1x256xf32> to vector<16x256xf32>
    %6 = arith.mulf %2, %5 : vector<16x256xf32>
    %7 = arith.truncf %6 : vector<16x256xf32> to vector<16x256xbf16>
    %c0_5 = arith.constant 0 : index
    %c0_6 = arith.constant 0 : index
    %8 = vector.load %arg13[%c0_5, %c0_6] : memref<288x256xbf16, #tpu.memory_space<vmem>>, vector<16x256xbf16>
    tpu.vector_store %arg13[%c0_5, %c0_6], %7 {strides = array<i32>} : memref<288x256xbf16, #tpu.memory_space<vmem>>, vector<16x256xbf16>,
    %c16_i32 = arith.constant 16 : i32
    %9 = tpu.dynamic_rotate %1 by %c16_i32 dim 1 : vector<16x256xf32>, i32 -> vector<16x256xf32>
    %c1 = arith.constant 1 : index
    %c0_7 = arith.constant 0 : index
    %c0_8 = arith.constant 0 : index
    %10 = vector.load %arg1[%c1, %c0_7, %c0_8] : memref<9x1x256xf32, #tpu.memory_space<vmem>>, vector<1x1x256xf32>
    %11 = vector.shape_cast %10 : vector<1x1x256xf32> to vector<1x256xf32>
    %12 = vector.broadcast %11 : vector<1x256xf32> to vector<16x256xf32>
    %13 = arith.mulf %9, %12 : vector<16x256xf32>
    %14 = arith.truncf %13 : vector<16x256xf32> to vector<16x256xbf16>
    %c16 = arith.constant 16 : index
    %c0_9 = arith.constant 0 : index
    %15 = vector.load %arg13[%c16, %c0_9] : memref<288x256xbf16, #tpu.memory_space<vmem>>, vector<16x256xbf16>
    tpu.vector_store %arg13[%c16, %c0_9], %14 {strides = array<i32>} : memref<288x256xbf16, #tpu.memory_space<vmem>>, vector<16x256xbf16>,
    %c15_i32 = arith.constant 15 : i32
    %16 = tpu.dynamic_rotate %1 by %c15_i32 dim 1 : vector<16x256xf32>, i32 -> vector<16x256xf32>
    %c2 = arith.constant 2 : index
    %c0_10 = arith.constant 0 : index
    %c0_11 = arith.constant 0 : index
    %17 = vector.load %arg1[%c2, %c0_10, %c0_11] : memref<9x1x256xf32, #tpu.memory_space<vmem>>, vector<1x1x256xf32>
    %18 = vector.shape_cast %17 : vector<1x1x256xf32> to vector<1x256xf32>
    %19 = vector.broadcast %18 : vector<1x256xf32> to vector<16x256xf32>
    %20 = arith.mulf %16, %19 : vector<16x256xf32>
    %21 = arith.truncf %20 : vector<16x256xf32> to vector<16x256xbf16>
    %c32 = arith.constant 32 : index
    %c0_12 = arith.constant 0 : index
    %22 = vector.load %arg13[%c32, %c0_12] : memref<288x256xbf16, #tpu.memory_space<vmem>>, vector<16x256xbf16>
    tpu.vector_store %arg13[%c32, %c0_12], %21 {strides = array<i32>} : memref<288x256xbf16, #tpu.memory_space<vmem>>, vector<16x256xbf16>,
    %c1_i32 = arith.constant 1 : i32
    %23 = tpu.dynamic_rotate %1 by %c1_i32 dim 1 : vector<16x256xf32>, i32 -> vector<16x256xf32>
    %c3 = arith.constant 3 : index
    %c0_13 = arith.constant 0 : index
    %c0_14 = arith.constant 0 : index
    %24 = vector.load %arg1[%c3, %c0_13, %c0_14] : memref<9x1x256xf32, #tpu.memory_space<vmem>>, vector<1x1x256xf32>
    %25 = vector.shape_cast %24 : vector<1x1x256xf32> to vector<1x256xf32>
    %26 = vector.broadcast %25 : vector<1x256xf32> to vector<16x256xf32>
    %27 = arith.mulf %23, %26 : vector<16x256xf32>
    %28 = arith.truncf %27 : vector<16x256xf32> to vector<16x256xbf16>
    %c48 = arith.constant 48 : index
    %c0_15 = arith.constant 0 : index
    %29 = vector.load %arg13[%c48, %c0_15] : memref<288x256xbf16, #tpu.memory_space<vmem>>, vector<16x256xbf16>
    tpu.vector_store %arg13[%c48, %c0_15], %28 {strides = array<i32>} : memref<288x256xbf16, #tpu.memory_space<vmem>>, vector<16x256xbf16>,
    %30 = arith.truncf %1 : vector<16x256xf32> to vector<16x256xbf16>
    %c64 = arith.constant 64 : index
    %c0_16 = arith.constant 0 : index
    %31 = vector.load %arg13[%c64, %c0_16] : memref<288x256xbf16, #tpu.memory_space<vmem>>, vector<16x256xbf16>
    tpu.vector_store %arg13[%c64, %c0_16], %30 {strides = array<i32>} : memref<288x256xbf16, #tpu.memory_space<vmem>>, vector<16x256xbf16>,
    %c255_i32 = arith.constant 255 : i32
    %32 = tpu.dynamic_rotate %1 by %c255_i32 dim 1 : vector<16x256xf32>, i32 -> vector<16x256xf32>
    %c5 = arith.constant 5 : index
    %c0_17 = arith.constant 0 : index
    %c0_18 = arith.constant 0 : index
    %33 = vector.load %arg1[%c5, %c0_17, %c0_18] : memref<9x1x256xf32, #tpu.memory_space<vmem>>, vector<1x1x256xf32>
    %34 = vector.shape_cast %33 : vector<1x1x256xf32> to vector<1x256xf32>
    %35 = vector.broadcast %34 : vector<1x256xf32> to vector<16x256xf32>
    %36 = arith.mulf %32, %35 : vector<16x256xf32>
    %37 = arith.truncf %36 : vector<16x256xf32> to vector<16x256xbf16>
    %c80 = arith.constant 80 : index
    %c0_19 = arith.constant 0 : index
    %38 = vector.load %arg13[%c80, %c0_19] : memref<288x256xbf16, #tpu.memory_space<vmem>>, vector<16x256xbf16>
    tpu.vector_store %arg13[%c80, %c0_19], %37 {strides = array<i32>} : memref<288x256xbf16, #tpu.memory_space<vmem>>, vector<16x256xbf16>,
    %c241_i32 = arith.constant 241 : i32
    %39 = tpu.dynamic_rotate %1 by %c241_i32 dim 1 : vector<16x256xf32>, i32 -> vector<16x256xf32>
    %c6 = arith.constant 6 : index
    %c0_20 = arith.constant 0 : index
    %c0_21 = arith.constant 0 : index
    %40 = vector.load %arg1[%c6, %c0_20, %c0_21] : memref<9x1x256xf32, #tpu.memory_space<vmem>>, vector<1x1x256xf32>
    %41 = vector.shape_cast %40 : vector<1x1x256xf32> to vector<1x256xf32>
    %42 = vector.broadcast %41 : vector<1x256xf32> to vector<16x256xf32>
    %43 = arith.mulf %39, %42 : vector<16x256xf32>
    %44 = arith.truncf %43 : vector<16x256xf32> to vector<16x256xbf16>
    %c96 = arith.constant 96 : index
    %c0_22 = arith.constant 0 : index
    %45 = vector.load %arg13[%c96, %c0_22] : memref<288x256xbf16, #tpu.memory_space<vmem>>, vector<16x256xbf16>
    tpu.vector_store %arg13[%c96, %c0_22], %44 {strides = array<i32>} : memref<288x256xbf16, #tpu.memory_space<vmem>>, vector<16x256xbf16>,
    %c240_i32 = arith.constant 240 : i32
    %46 = tpu.dynamic_rotate %1 by %c240_i32 dim 1 : vector<16x256xf32>, i32 -> vector<16x256xf32>
    %c7 = arith.constant 7 : index
    %c0_23 = arith.constant 0 : index
    %c0_24 = arith.constant 0 : index
    %47 = vector.load %arg1[%c7, %c0_23, %c0_24] : memref<9x1x256xf32, #tpu.memory_space<vmem>>, vector<1x1x256xf32>
    %48 = vector.shape_cast %47 : vector<1x1x256xf32> to vector<1x256xf32>
    %49 = vector.broadcast %48 : vector<1x256xf32> to vector<16x256xf32>
    %50 = arith.mulf %46, %49 : vector<16x256xf32>
    %51 = arith.truncf %50 : vector<16x256xf32> to vector<16x256xbf16>
    %c112 = arith.constant 112 : index
    %c0_25 = arith.constant 0 : index
    %52 = vector.load %arg13[%c112, %c0_25] : memref<288x256xbf16, #tpu.memory_space<vmem>>, vector<16x256xbf16>
    tpu.vector_store %arg13[%c112, %c0_25], %51 {strides = array<i32>} : memref<288x256xbf16, #tpu.memory_space<vmem>>, vector<16x256xbf16>,
    %c239_i32 = arith.constant 239 : i32
    %53 = tpu.dynamic_rotate %1 by %c239_i32 dim 1 : vector<16x256xf32>, i32 -> vector<16x256xf32>
    %c8 = arith.constant 8 : index
    %c0_26 = arith.constant 0 : index
    %c0_27 = arith.constant 0 : index
    %54 = vector.load %arg1[%c8, %c0_26, %c0_27] : memref<9x1x256xf32, #tpu.memory_space<vmem>>, vector<1x1x256xf32>
    %55 = vector.shape_cast %54 : vector<1x1x256xf32> to vector<1x256xf32>
    %56 = vector.broadcast %55 : vector<1x256xf32> to vector<16x256xf32>
    %57 = arith.mulf %53, %56 : vector<16x256xf32>
    %58 = arith.truncf %57 : vector<16x256xf32> to vector<16x256xbf16>
    %c128 = arith.constant 128 : index
    %c0_28 = arith.constant 0 : index
    %59 = vector.load %arg13[%c128, %c0_28] : memref<288x256xbf16, #tpu.memory_space<vmem>>, vector<16x256xbf16>
    tpu.vector_store %arg13[%c128, %c0_28], %58 {strides = array<i32>} : memref<288x256xbf16, #tpu.memory_space<vmem>>, vector<16x256xbf16>,
    %c0_29 = arith.constant 0 : index
    %c0_30 = arith.constant 0 : index
    %60 = vector.load %arg13[%c0_29, %c0_30] : memref<288x256xbf16, #tpu.memory_space<vmem>>, vector<144x256xbf16>
    %c0_31 = arith.constant 0 : index
    %c0_32 = arith.constant 0 : index
    %61 = vector.load %arg4[%c0_31, %c0_32] : memref<32x144xbf16, #tpu.memory_space<vmem>>, vector<32x144xbf16>
    %cst = arith.constant dense<0.000000e+00> : vector<32x256xf32>
    %62 = tpu.matmul %61, %60, %cst {dimension_numbers = #tpu.dot_dimension_numbers<[1], [0], [0], [1], [0, 0, 1, 1], [], []>} : vector<32x144xbf16>, vector<144x256xbf16>, vector<32x256xf32> -> vector<32x256xf32>
    %c0_33 = arith.constant 0 : index
    %c0_34 = arith.constant 0 : index
    %63 = vector.load %arg5[%c0_33, %c0_34] : memref<32x1xf32, #tpu.memory_space<vmem>>, vector<32x1xf32>
    %64 = vector.broadcast %63 : vector<32x1xf32> to vector<32x256xf32>
    %65 = arith.addf %62, %64 : vector<32x256xf32>
    %c0_35 = arith.constant 0 : index
    %66 = memref.load %arg6[%c0_35] : memref<1xf32, #tpu.memory_space<smem>>
    %cst_36 = arith.constant 0.000000e+00 : f32
    %67 = vector.broadcast %cst_36 : f32 to vector<32x256xf32>
    %68 = arith.cmpf oge, %65, %67 : vector<32x256xf32>
    %69 = vector.broadcast %66 : f32 to vector<32x256xf32>
    %70 = arith.mulf %69, %65 : vector<32x256xf32>
    %71 = arith.select %68, %65, %70 : vector<32x256xi1>, vector<32x256xf32>
    %c17_i32_37 = arith.constant 17 : i32
    %72 = tpu.dynamic_rotate %71 by %c17_i32_37 dim 1 : vector<32x256xf32>, i32 -> vector<32x256xf32>
    %c0_38 = arith.constant 0 : index
    %c0_39 = arith.constant 0 : index
    %c0_40 = arith.constant 0 : index
    %73 = vector.load %arg1[%c0_38, %c0_39, %c0_40] : memref<9x1x256xf32, #tpu.memory_space<vmem>>, vector<1x1x256xf32>
    %74 = vector.shape_cast %73 : vector<1x1x256xf32> to vector<1x256xf32>
    %75 = vector.broadcast %74 : vector<1x256xf32> to vector<32x256xf32>
    %76 = arith.mulf %72, %75 : vector<32x256xf32>
    %77 = arith.truncf %76 : vector<32x256xf32> to vector<32x256xbf16>
    %c0_41 = arith.constant 0 : index
    %c0_42 = arith.constant 0 : index
    %78 = vector.load %arg13[%c0_41, %c0_42] : memref<288x256xbf16, #tpu.memory_space<vmem>>, vector<32x256xbf16>
    tpu.vector_store %arg13[%c0_41, %c0_42], %77 {strides = array<i32>} : memref<288x256xbf16, #tpu.memory_space<vmem>>, vector<32x256xbf16>,
    %c16_i32_43 = arith.constant 16 : i32
    %79 = tpu.dynamic_rotate %71 by %c16_i32_43 dim 1 : vector<32x256xf32>, i32 -> vector<32x256xf32>
    %c1_44 = arith.constant 1 : index
    %c0_45 = arith.constant 0 : index
    %c0_46 = arith.constant 0 : index
    %80 = vector.load %arg1[%c1_44, %c0_45, %c0_46] : memref<9x1x256xf32, #tpu.memory_space<vmem>>, vector<1x1x256xf32>
    %81 = vector.shape_cast %80 : vector<1x1x256xf32> to vector<1x256xf32>
    %82 = vector.broadcast %81 : vector<1x256xf32> to vector<32x256xf32>
    %83 = arith.mulf %79, %82 : vector<32x256xf32>
    %84 = arith.truncf %83 : vector<32x256xf32> to vector<32x256xbf16>
    %c32_47 = arith.constant 32 : index
    %c0_48 = arith.constant 0 : index
    %85 = vector.load %arg13[%c32_47, %c0_48] : memref<288x256xbf16, #tpu.memory_space<vmem>>, vector<32x256xbf16>
    tpu.vector_store %arg13[%c32_47, %c0_48], %84 {strides = array<i32>} : memref<288x256xbf16, #tpu.memory_space<vmem>>, vector<32x256xbf16>,
    %c15_i32_49 = arith.constant 15 : i32
    %86 = tpu.dynamic_rotate %71 by %c15_i32_49 dim 1 : vector<32x256xf32>, i32 -> vector<32x256xf32>
    %c2_50 = arith.constant 2 : index
    %c0_51 = arith.constant 0 : index
    %c0_52 = arith.constant 0 : index
    %87 = vector.load %arg1[%c2_50, %c0_51, %c0_52] : memref<9x1x256xf32, #tpu.memory_space<vmem>>, vector<1x1x256xf32>
    %88 = vector.shape_cast %87 : vector<1x1x256xf32> to vector<1x256xf32>
    %89 = vector.broadcast %88 : vector<1x256xf32> to vector<32x256xf32>
    %90 = arith.mulf %86, %89 : vector<32x256xf32>
    %91 = arith.truncf %90 : vector<32x256xf32> to vector<32x256xbf16>
    %c64_53 = arith.constant 64 : index
    %c0_54 = arith.constant 0 : index
    %92 = vector.load %arg13[%c64_53, %c0_54] : memref<288x256xbf16, #tpu.memory_space<vmem>>, vector<32x256xbf16>
    tpu.vector_store %arg13[%c64_53, %c0_54], %91 {strides = array<i32>} : memref<288x256xbf16, #tpu.memory_space<vmem>>, vector<32x256xbf16>,
    %c1_i32_55 = arith.constant 1 : i32
    %93 = tpu.dynamic_rotate %71 by %c1_i32_55 dim 1 : vector<32x256xf32>, i32 -> vector<32x256xf32>
    %c3_56 = arith.constant 3 : index
    %c0_57 = arith.constant 0 : index
    %c0_58 = arith.constant 0 : index
    %94 = vector.load %arg1[%c3_56, %c0_57, %c0_58] : memref<9x1x256xf32, #tpu.memory_space<vmem>>, vector<1x1x256xf32>
    %95 = vector.shape_cast %94 : vector<1x1x256xf32> to vector<1x256xf32>
    %96 = vector.broadcast %95 : vector<1x256xf32> to vector<32x256xf32>
    %97 = arith.mulf %93, %96 : vector<32x256xf32>
    %98 = arith.truncf %97 : vector<32x256xf32> to vector<32x256xbf16>
    %c96_59 = arith.constant 96 : index
    %c0_60 = arith.constant 0 : index
    %99 = vector.load %arg13[%c96_59, %c0_60] : memref<288x256xbf16, #tpu.memory_space<vmem>>, vector<32x256xbf16>
    tpu.vector_store %arg13[%c96_59, %c0_60], %98 {strides = array<i32>} : memref<288x256xbf16, #tpu.memory_space<vmem>>, vector<32x256xbf16>,
    %100 = arith.truncf %71 : vector<32x256xf32> to vector<32x256xbf16>
    %c128_61 = arith.constant 128 : index
    %c0_62 = arith.constant 0 : index
    %101 = vector.load %arg13[%c128_61, %c0_62] : memref<288x256xbf16, #tpu.memory_space<vmem>>, vector<32x256xbf16>
    tpu.vector_store %arg13[%c128_61, %c0_62], %100 {strides = array<i32>} : memref<288x256xbf16, #tpu.memory_space<vmem>>, vector<32x256xbf16>,
    %c255_i32_63 = arith.constant 255 : i32
    %102 = tpu.dynamic_rotate %71 by %c255_i32_63 dim 1 : vector<32x256xf32>, i32 -> vector<32x256xf32>
    %c5_64 = arith.constant 5 : index
    %c0_65 = arith.constant 0 : index
    %c0_66 = arith.constant 0 : index
    %103 = vector.load %arg1[%c5_64, %c0_65, %c0_66] : memref<9x1x256xf32, #tpu.memory_space<vmem>>, vector<1x1x256xf32>
    %104 = vector.shape_cast %103 : vector<1x1x256xf32> to vector<1x256xf32>
    %105 = vector.broadcast %104 : vector<1x256xf32> to vector<32x256xf32>
    %106 = arith.mulf %102, %105 : vector<32x256xf32>
    %107 = arith.truncf %106 : vector<32x256xf32> to vector<32x256xbf16>
    %c160 = arith.constant 160 : index
    %c0_67 = arith.constant 0 : index
    %108 = vector.load %arg13[%c160, %c0_67] : memref<288x256xbf16, #tpu.memory_space<vmem>>, vector<32x256xbf16>
    tpu.vector_store %arg13[%c160, %c0_67], %107 {strides = array<i32>} : memref<288x256xbf16, #tpu.memory_space<vmem>>, vector<32x256xbf16>,
    %c241_i32_68 = arith.constant 241 : i32
    %109 = tpu.dynamic_rotate %71 by %c241_i32_68 dim 1 : vector<32x256xf32>, i32 -> vector<32x256xf32>
    %c6_69 = arith.constant 6 : index
    %c0_70 = arith.constant 0 : index
    %c0_71 = arith.constant 0 : index
    %110 = vector.load %arg1[%c6_69, %c0_70, %c0_71] : memref<9x1x256xf32, #tpu.memory_space<vmem>>, vector<1x1x256xf32>
    %111 = vector.shape_cast %110 : vector<1x1x256xf32> to vector<1x256xf32>
    %112 = vector.broadcast %111 : vector<1x256xf32> to vector<32x256xf32>
    %113 = arith.mulf %109, %112 : vector<32x256xf32>
    %114 = arith.truncf %113 : vector<32x256xf32> to vector<32x256xbf16>
    %c192 = arith.constant 192 : index
    %c0_72 = arith.constant 0 : index
    %115 = vector.load %arg13[%c192, %c0_72] : memref<288x256xbf16, #tpu.memory_space<vmem>>, vector<32x256xbf16>
    tpu.vector_store %arg13[%c192, %c0_72], %114 {strides = array<i32>} : memref<288x256xbf16, #tpu.memory_space<vmem>>, vector<32x256xbf16>,
    %c240_i32_73 = arith.constant 240 : i32
    %116 = tpu.dynamic_rotate %71 by %c240_i32_73 dim 1 : vector<32x256xf32>, i32 -> vector<32x256xf32>
    %c7_74 = arith.constant 7 : index
    %c0_75 = arith.constant 0 : index
    %c0_76 = arith.constant 0 : index
    %117 = vector.load %arg1[%c7_74, %c0_75, %c0_76] : memref<9x1x256xf32, #tpu.memory_space<vmem>>, vector<1x1x256xf32>
    %118 = vector.shape_cast %117 : vector<1x1x256xf32> to vector<1x256xf32>
    %119 = vector.broadcast %118 : vector<1x256xf32> to vector<32x256xf32>
    %120 = arith.mulf %116, %119 : vector<32x256xf32>
    %121 = arith.truncf %120 : vector<32x256xf32> to vector<32x256xbf16>
    %c224 = arith.constant 224 : index
    %c0_77 = arith.constant 0 : index
    %122 = vector.load %arg13[%c224, %c0_77] : memref<288x256xbf16, #tpu.memory_space<vmem>>, vector<32x256xbf16>
    tpu.vector_store %arg13[%c224, %c0_77], %121 {strides = array<i32>} : memref<288x256xbf16, #tpu.memory_space<vmem>>, vector<32x256xbf16>,
    %c239_i32_78 = arith.constant 239 : i32
    %123 = tpu.dynamic_rotate %71 by %c239_i32_78 dim 1 : vector<32x256xf32>, i32 -> vector<32x256xf32>
    %c8_79 = arith.constant 8 : index
    %c0_80 = arith.constant 0 : index
    %c0_81 = arith.constant 0 : index
    %124 = vector.load %arg1[%c8_79, %c0_80, %c0_81] : memref<9x1x256xf32, #tpu.memory_space<vmem>>, vector<1x1x256xf32>
    %125 = vector.shape_cast %124 : vector<1x1x256xf32> to vector<1x256xf32>
    %126 = vector.broadcast %125 : vector<1x256xf32> to vector<32x256xf32>
    %127 = arith.mulf %123, %126 : vector<32x256xf32>
    %128 = arith.truncf %127 : vector<32x256xf32> to vector<32x256xbf16>
    %c256 = arith.constant 256 : index
    %c0_82 = arith.constant 0 : index
    %129 = vector.load %arg13[%c256, %c0_82] : memref<288x256xbf16, #tpu.memory_space<vmem>>, vector<32x256xbf16>
    tpu.vector_store %arg13[%c256, %c0_82], %128 {strides = array<i32>} : memref<288x256xbf16, #tpu.memory_space<vmem>>, vector<32x256xbf16>,
    %c0_83 = arith.constant 0 : index
    %c0_84 = arith.constant 0 : index
    %130 = vector.load %arg13[%c0_83, %c0_84] : memref<288x256xbf16, #tpu.memory_space<vmem>>, vector<288x256xbf16>
    %c0_85 = arith.constant 0 : index
    %c0_86 = arith.constant 0 : index
    %131 = vector.load %arg7[%c0_85, %c0_86] : memref<32x288xbf16, #tpu.memory_space<vmem>>, vector<32x288xbf16>
    %cst_87 = arith.constant dense<0.000000e+00> : vector<32x256xf32>
    %132 = tpu.matmul %131, %130, %cst_87 {dimension_numbers = #tpu.dot_dimension_numbers<[1], [0], [0], [1], [0, 0, 1, 1], [], []>} : vector<32x288xbf16>, vector<288x256xbf16>, vector<32x256xf32> -> vector<32x256xf32>
    %c0_88 = arith.constant 0 : index
    %c0_89 = arith.constant 0 : index
    %133 = vector.load %arg8[%c0_88, %c0_89] : memref<32x1xf32, #tpu.memory_space<vmem>>, vector<32x1xf32>
    %134 = vector.broadcast %133 : vector<32x1xf32> to vector<32x256xf32>
    %135 = arith.addf %132, %134 : vector<32x256xf32>
    %c0_90 = arith.constant 0 : index
    %136 = memref.load %arg9[%c0_90] : memref<1xf32, #tpu.memory_space<smem>>
    %cst_91 = arith.constant 0.000000e+00 : f32
    %137 = vector.broadcast %cst_91 : f32 to vector<32x256xf32>
    %138 = arith.cmpf oge, %135, %137 : vector<32x256xf32>
    %139 = vector.broadcast %136 : f32 to vector<32x256xf32>
    %140 = arith.mulf %139, %135 : vector<32x256xf32>
    %141 = arith.select %138, %135, %140 : vector<32x256xi1>, vector<32x256xf32>
    %c17_i32_92 = arith.constant 17 : i32
    %142 = tpu.dynamic_rotate %141 by %c17_i32_92 dim 1 : vector<32x256xf32>, i32 -> vector<32x256xf32>
    %c0_93 = arith.constant 0 : index
    %c0_94 = arith.constant 0 : index
    %c0_95 = arith.constant 0 : index
    %143 = vector.load %arg1[%c0_93, %c0_94, %c0_95] : memref<9x1x256xf32, #tpu.memory_space<vmem>>, vector<1x1x256xf32>
    %144 = vector.shape_cast %143 : vector<1x1x256xf32> to vector<1x256xf32>
    %145 = vector.broadcast %144 : vector<1x256xf32> to vector<32x256xf32>
    %146 = arith.mulf %142, %145 : vector<32x256xf32>
    %147 = arith.truncf %146 : vector<32x256xf32> to vector<32x256xbf16>
    %c0_96 = arith.constant 0 : index
    %c0_97 = arith.constant 0 : index
    %148 = vector.load %arg13[%c0_96, %c0_97] : memref<288x256xbf16, #tpu.memory_space<vmem>>, vector<32x256xbf16>
    tpu.vector_store %arg13[%c0_96, %c0_97], %147 {strides = array<i32>} : memref<288x256xbf16, #tpu.memory_space<vmem>>, vector<32x256xbf16>,
    %c16_i32_98 = arith.constant 16 : i32
    %149 = tpu.dynamic_rotate %141 by %c16_i32_98 dim 1 : vector<32x256xf32>, i32 -> vector<32x256xf32>
    %c1_99 = arith.constant 1 : index
    %c0_100 = arith.constant 0 : index
    %c0_101 = arith.constant 0 : index
    %150 = vector.load %arg1[%c1_99, %c0_100, %c0_101] : memref<9x1x256xf32, #tpu.memory_space<vmem>>, vector<1x1x256xf32>
    %151 = vector.shape_cast %150 : vector<1x1x256xf32> to vector<1x256xf32>
    %152 = vector.broadcast %151 : vector<1x256xf32> to vector<32x256xf32>
    %153 = arith.mulf %149, %152 : vector<32x256xf32>
    %154 = arith.truncf %153 : vector<32x256xf32> to vector<32x256xbf16>
    %c32_102 = arith.constant 32 : index
    %c0_103 = arith.constant 0 : index
    %155 = vector.load %arg13[%c32_102, %c0_103] : memref<288x256xbf16, #tpu.memory_space<vmem>>, vector<32x256xbf16>
    tpu.vector_store %arg13[%c32_102, %c0_103], %154 {strides = array<i32>} : memref<288x256xbf16, #tpu.memory_space<vmem>>, vector<32x256xbf16>,
    %c15_i32_104 = arith.constant 15 : i32
    %156 = tpu.dynamic_rotate %141 by %c15_i32_104 dim 1 : vector<32x256xf32>, i32 -> vector<32x256xf32>
    %c2_105 = arith.constant 2 : index
    %c0_106 = arith.constant 0 : index
    %c0_107 = arith.constant 0 : index
    %157 = vector.load %arg1[%c2_105, %c0_106, %c0_107] : memref<9x1x256xf32, #tpu.memory_space<vmem>>, vector<1x1x256xf32>
    %158 = vector.shape_cast %157 : vector<1x1x256xf32> to vector<1x256xf32>
    %159 = vector.broadcast %158 : vector<1x256xf32> to vector<32x256xf32>
    %160 = arith.mulf %156, %159 : vector<32x256xf32>
    %161 = arith.truncf %160 : vector<32x256xf32> to vector<32x256xbf16>
    %c64_108 = arith.constant 64 : index
    %c0_109 = arith.constant 0 : index
    %162 = vector.load %arg13[%c64_108, %c0_109] : memref<288x256xbf16, #tpu.memory_space<vmem>>, vector<32x256xbf16>
    tpu.vector_store %arg13[%c64_108, %c0_109], %161 {strides = array<i32>} : memref<288x256xbf16, #tpu.memory_space<vmem>>, vector<32x256xbf16>,
    %c1_i32_110 = arith.constant 1 : i32
    %163 = tpu.dynamic_rotate %141 by %c1_i32_110 dim 1 : vector<32x256xf32>, i32 -> vector<32x256xf32>
    %c3_111 = arith.constant 3 : index
    %c0_112 = arith.constant 0 : index
    %c0_113 = arith.constant 0 : index
    %164 = vector.load %arg1[%c3_111, %c0_112, %c0_113] : memref<9x1x256xf32, #tpu.memory_space<vmem>>, vector<1x1x256xf32>
    %165 = vector.shape_cast %164 : vector<1x1x256xf32> to vector<1x256xf32>
    %166 = vector.broadcast %165 : vector<1x256xf32> to vector<32x256xf32>
    %167 = arith.mulf %163, %166 : vector<32x256xf32>
    %168 = arith.truncf %167 : vector<32x256xf32> to vector<32x256xbf16>
    %c96_114 = arith.constant 96 : index
    %c0_115 = arith.constant 0 : index
    %169 = vector.load %arg13[%c96_114, %c0_115] : memref<288x256xbf16, #tpu.memory_space<vmem>>, vector<32x256xbf16>
    tpu.vector_store %arg13[%c96_114, %c0_115], %168 {strides = array<i32>} : memref<288x256xbf16, #tpu.memory_space<vmem>>, vector<32x256xbf16>,
    %170 = arith.truncf %141 : vector<32x256xf32> to vector<32x256xbf16>
    %c128_116 = arith.constant 128 : index
    %c0_117 = arith.constant 0 : index
    %171 = vector.load %arg13[%c128_116, %c0_117] : memref<288x256xbf16, #tpu.memory_space<vmem>>, vector<32x256xbf16>
    tpu.vector_store %arg13[%c128_116, %c0_117], %170 {strides = array<i32>} : memref<288x256xbf16, #tpu.memory_space<vmem>>, vector<32x256xbf16>,
    %c255_i32_118 = arith.constant 255 : i32
    %172 = tpu.dynamic_rotate %141 by %c255_i32_118 dim 1 : vector<32x256xf32>, i32 -> vector<32x256xf32>
    %c5_119 = arith.constant 5 : index
    %c0_120 = arith.constant 0 : index
    %c0_121 = arith.constant 0 : index
    %173 = vector.load %arg1[%c5_119, %c0_120, %c0_121] : memref<9x1x256xf32, #tpu.memory_space<vmem>>, vector<1x1x256xf32>
    %174 = vector.shape_cast %173 : vector<1x1x256xf32> to vector<1x256xf32>
    %175 = vector.broadcast %174 : vector<1x256xf32> to vector<32x256xf32>
    %176 = arith.mulf %172, %175 : vector<32x256xf32>
    %177 = arith.truncf %176 : vector<32x256xf32> to vector<32x256xbf16>
    %c160_122 = arith.constant 160 : index
    %c0_123 = arith.constant 0 : index
    %178 = vector.load %arg13[%c160_122, %c0_123] : memref<288x256xbf16, #tpu.memory_space<vmem>>, vector<32x256xbf16>
    tpu.vector_store %arg13[%c160_122, %c0_123], %177 {strides = array<i32>} : memref<288x256xbf16, #tpu.memory_space<vmem>>, vector<32x256xbf16>,
    %c241_i32_124 = arith.constant 241 : i32
    %179 = tpu.dynamic_rotate %141 by %c241_i32_124 dim 1 : vector<32x256xf32>, i32 -> vector<32x256xf32>
    %c6_125 = arith.constant 6 : index
    %c0_126 = arith.constant 0 : index
    %c0_127 = arith.constant 0 : index
    %180 = vector.load %arg1[%c6_125, %c0_126, %c0_127] : memref<9x1x256xf32, #tpu.memory_space<vmem>>, vector<1x1x256xf32>
    %181 = vector.shape_cast %180 : vector<1x1x256xf32> to vector<1x256xf32>
    %182 = vector.broadcast %181 : vector<1x256xf32> to vector<32x256xf32>
    %183 = arith.mulf %179, %182 : vector<32x256xf32>
    %184 = arith.truncf %183 : vector<32x256xf32> to vector<32x256xbf16>
    %c192_128 = arith.constant 192 : index
    %c0_129 = arith.constant 0 : index
    %185 = vector.load %arg13[%c192_128, %c0_129] : memref<288x256xbf16, #tpu.memory_space<vmem>>, vector<32x256xbf16>
    tpu.vector_store %arg13[%c192_128, %c0_129], %184 {strides = array<i32>} : memref<288x256xbf16, #tpu.memory_space<vmem>>, vector<32x256xbf16>,
    %c240_i32_130 = arith.constant 240 : i32
    %186 = tpu.dynamic_rotate %141 by %c240_i32_130 dim 1 : vector<32x256xf32>, i32 -> vector<32x256xf32>
    %c7_131 = arith.constant 7 : index
    %c0_132 = arith.constant 0 : index
    %c0_133 = arith.constant 0 : index
    %187 = vector.load %arg1[%c7_131, %c0_132, %c0_133] : memref<9x1x256xf32, #tpu.memory_space<vmem>>, vector<1x1x256xf32>
    %188 = vector.shape_cast %187 : vector<1x1x256xf32> to vector<1x256xf32>
    %189 = vector.broadcast %188 : vector<1x256xf32> to vector<32x256xf32>
    %190 = arith.mulf %186, %189 : vector<32x256xf32>
    %191 = arith.truncf %190 : vector<32x256xf32> to vector<32x256xbf16>
    %c224_134 = arith.constant 224 : index
    %c0_135 = arith.constant 0 : index
    %192 = vector.load %arg13[%c224_134, %c0_135] : memref<288x256xbf16, #tpu.memory_space<vmem>>, vector<32x256xbf16>
    tpu.vector_store %arg13[%c224_134, %c0_135], %191 {strides = array<i32>} : memref<288x256xbf16, #tpu.memory_space<vmem>>, vector<32x256xbf16>,
    %c239_i32_136 = arith.constant 239 : i32
    %193 = tpu.dynamic_rotate %141 by %c239_i32_136 dim 1 : vector<32x256xf32>, i32 -> vector<32x256xf32>
    %c8_137 = arith.constant 8 : index
    %c0_138 = arith.constant 0 : index
    %c0_139 = arith.constant 0 : index
    %194 = vector.load %arg1[%c8_137, %c0_138, %c0_139] : memref<9x1x256xf32, #tpu.memory_space<vmem>>, vector<1x1x256xf32>
    %195 = vector.shape_cast %194 : vector<1x1x256xf32> to vector<1x256xf32>
    %196 = vector.broadcast %195 : vector<1x256xf32> to vector<32x256xf32>
    %197 = arith.mulf %193, %196 : vector<32x256xf32>
    %198 = arith.truncf %197 : vector<32x256xf32> to vector<32x256xbf16>
    %c256_140 = arith.constant 256 : index
    %c0_141 = arith.constant 0 : index
    %199 = vector.load %arg13[%c256_140, %c0_141] : memref<288x256xbf16, #tpu.memory_space<vmem>>, vector<32x256xbf16>
    tpu.vector_store %arg13[%c256_140, %c0_141], %198 {strides = array<i32>} : memref<288x256xbf16, #tpu.memory_space<vmem>>, vector<32x256xbf16>,
    %c0_142 = arith.constant 0 : index
    %c0_143 = arith.constant 0 : index
    %200 = vector.load %arg13[%c0_142, %c0_143] : memref<288x256xbf16, #tpu.memory_space<vmem>>, vector<288x256xbf16>
    %c0_144 = arith.constant 0 : index
    %c0_145 = arith.constant 0 : index
    %201 = vector.load %arg10[%c0_144, %c0_145] : memref<8x288xbf16, #tpu.memory_space<vmem>>, vector<8x288xbf16>
    %cst_146 = arith.constant dense<0.000000e+00> : vector<8x256xf32>
    %202 = tpu.matmul %201, %200, %cst_146 {dimension_numbers = #tpu.dot_dimension_numbers<[1], [0], [0], [1], [0, 0, 1, 1], [], []>} : vector<8x288xbf16>, vector<288x256xbf16>, vector<8x256xf32> -> vector<8x256xf32>
    %c0_147 = arith.constant 0 : index
    %c0_148 = arith.constant 0 : index
    %203 = vector.load %arg11[%c0_147, %c0_148] : memref<8x1xf32, #tpu.memory_space<vmem>>, vector<8x1xf32>
    %204 = vector.broadcast %203 : vector<8x1xf32> to vector<8x256xf32>
    %205 = arith.addf %202, %204 : vector<8x256xf32>
    %c0_149 = arith.constant 0 : index
    %c0_150 = arith.constant 0 : index
    %c0_151 = arith.constant 0 : index
    %206 = vector.load %arg3[%c0_149, %c0_150, %c0_151] : memref<1x8x256xf32, #tpu.memory_space<vmem>>, vector<1x8x256xf32>
    %207 = vector.shape_cast %206 : vector<1x8x256xf32> to vector<8x256xf32>
    %208 = arith.addf %207, %205 : vector<8x256xf32>
    %c0_152 = arith.constant 0 : index
    %c0_153 = arith.constant 0 : index
    %c0_154 = arith.constant 0 : index
    %209 = vector.load %arg12[%c0_152, %c0_153, %c0_154] : memref<1x8x256xf32, #tpu.memory_space<vmem>>, vector<1x8x256xf32>
    %210 = vector.shape_cast %209 : vector<1x8x256xf32> to vector<8x256xf32>
    %211 = vector.shape_cast %208 : vector<8x256xf32> to vector<1x8x256xf32>
    tpu.vector_store %arg12[%c0_152, %c0_153, %c0_154], %211 {strides = array<i32>} : memref<1x8x256xf32, #tpu.memory_space<vmem>>, vector<1x8x256xf32>,
    return
  }
  func.func @transform_0(%arg0: i32) -> (i32, i32, i32) {
    %c0_i32 = arith.constant 0 : i32
    %c0_i32_0 = arith.constant 0 : i32
    %c0_i32_1 = arith.constant 0 : i32
    %c0_i32_2 = arith.constant 0 : i32
    return %c0_i32, %c0_i32_0, %c0_i32_1 : i32, i32, i32
  }
  func.func @transform_1(%arg0: i32) -> (i32, i32, i32) {
    %c0_i32 = arith.constant 0 : i32
    %c0_i32_0 = arith.constant 0 : i32
    %c0_i32_1 = arith.constant 0 : i32
    return %arg0, %c0_i32, %c0_i32_0 : i32, i32, i32
  }
  func.func @transform_2(%arg0: i32) -> (i32, i32, i32) {
    %c0_i32 = arith.constant 0 : i32
    %c0_i32_0 = arith.constant 0 : i32
    %c0_i32_1 = arith.constant 0 : i32
    return %arg0, %c0_i32, %c0_i32_0 : i32, i32, i32
  }
  func.func @transform_3(%arg0: i32) -> (i32, i32) {
    %c0_i32 = arith.constant 0 : i32
    %c0_i32_0 = arith.constant 0 : i32
    %c0_i32_1 = arith.constant 0 : i32
    return %c0_i32, %c0_i32_0 : i32, i32
  }
  func.func @transform_4(%arg0: i32) -> (i32, i32) {
    %c0_i32 = arith.constant 0 : i32
    %c0_i32_0 = arith.constant 0 : i32
    %c0_i32_1 = arith.constant 0 : i32
    return %c0_i32, %c0_i32_0 : i32, i32
  }
  func.func @transform_5(%arg0: i32) -> i32 {
    %c0_i32 = arith.constant 0 : i32
    %c0_i32_0 = arith.constant 0 : i32
    return %c0_i32 : i32
  }
  func.func @transform_6(%arg0: i32) -> (i32, i32) {
    %c0_i32 = arith.constant 0 : i32
    %c0_i32_0 = arith.constant 0 : i32
    %c0_i32_1 = arith.constant 0 : i32
    return %c0_i32, %c0_i32_0 : i32, i32
  }
  func.func @transform_7(%arg0: i32) -> (i32, i32) {
    %c0_i32 = arith.constant 0 : i32
    %c0_i32_0 = arith.constant 0 : i32
    %c0_i32_1 = arith.constant 0 : i32
    return %c0_i32, %c0_i32_0 : i32, i32
  }
  func.func @transform_8(%arg0: i32) -> i32 {
    %c0_i32 = arith.constant 0 : i32
    %c0_i32_0 = arith.constant 0 : i32
    return %c0_i32 : i32
  }
  func.func @transform_9(%arg0: i32) -> (i32, i32) {
    %c0_i32 = arith.constant 0 : i32
    %c0_i32_0 = arith.constant 0 : i32
    %c0_i32_1 = arith.constant 0 : i32
    return %c0_i32, %c0_i32_0 : i32, i32
  }
  func.func @transform_10(%arg0: i32) -> (i32, i32) {
    %c0_i32 = arith.constant 0 : i32
    %c0_i32_0 = arith.constant 0 : i32
    %c0_i32_1 = arith.constant 0 : i32
    return %c0_i32, %c0_i32_0 : i32, i32
  }
  func.func @transform_11(%arg0: i32) -> (i32, i32, i32) {
    %c0_i32 = arith.constant 0 : i32
    %c0_i32_0 = arith.constant 0 : i32
    %c0_i32_1 = arith.constant 0 : i32
    return %arg0, %c0_i32, %c0_i32_0 : i32, i32, i32
  }
}

</mosaic_0001>

<bundles_post_ra>
// kernel: dualnet_forward.1
= control target key start
LH: loop header
LB: loop body
LE: loop exit
PB: predicated region body
PF: predicated region fallthrough
CT: control target
= control target key end

     0   :  { %s3121_s21 = smov 0   ;;  %s4363_s0 = inlined_call_operand.vmem [shape: f32[9,1,256], index: 0, kind: input, shape index: {}]   ;;  %s4364_s1 = inlined_call_operand.vmem [shape: f32[2,16,256], index: 1, kind: input, shape index: {}]   ;;  %s4365_s2 = inlined_call_operand.vmem [shape: f32[2,8,256], index: 2, kind: input, shape index: {}, may-alias: {2,11}]   ;;  %s4366_s3 = inlined_call_operand.vmem [shape: bf16[32,144], index: 3, kind: input, shape index: {}]   ;;  %s4367_s4 = inlined_call_operand.vmem [shape: f32[32,1], index: 4, kind: input, shape index: {}]   ;;  %s4368_s5 = inlined_call_operand.<no memory space> [shape: f32[1], index: 5, kind: input, shape index: {}]   ;;  %s4369_s6 = inlined_call_operand.vmem [shape: bf16[32,288], index: 6, kind: input, shape index: {}]   ;;  %s4370_s7 = inlined_call_operand.vmem [shape: f32[32,1], index: 7, kind: input, shape index: {}]   ;;  %s4371_s8 = inlined_call_operand.<no memory space> [shape: f32[1], index: 8, kind: input, shape index: {}]   ;;  %s4372_s9 = inlined_call_operand.vmem [shape: bf16[8,288], index: 9, kind: input, shape index: {}]   ;;  %s4373_s10 = inlined_call_operand.vmem [shape: f32[8,1], index: 10, kind: input, shape index: {}]   ;;  %s4374_s11 = inlined_call_operand.vmem [shape: f32[2,8,256], index: 11, kind: output, shape index: {}, may-alias: {2,11}]  }
   0x1   :  { %16 = sst [smem:[#allocation3]] %s4368_s5 }
   0x2   :  { %17 = sst [smem:[#allocation4]] %s4371_s8 }
   0x3 LB: > { %s2471_s22 = sadd.s32 4294967295, %s3044_s21   ;;  %p2475_p0 = scmp.ge.s32.totalorder %s3044_s21, 1  ;;  %s3044_s21 = sphi %s3121_s21, %s23_s21  }
   0x4   : > { %p349_p1 = scmp.lt.s32.totalorder %s3044_s21, 3 }
   0x6   : > { %p350_p2 = pnand %p2475_p0, %p349_p1 }
   0x7   : > { %p394_p3 = scmp.lt.s32.totalorder (!%p350_p2), %s2471_s22, 1  ;;  %s3046_s25 = smov (!%p350_p2), 112  }
   0x8   : > { %353 = sbr.rel (%p350_p2) target bundleno = 1235 (0x4d3), region = 64  ;;  %s3047_s26 = smov (!%p350_p2), 113  }
   0x9   : > { %s3048_s27 = smov (!%p350_p2), 127   ;;  %s3049_s28 = smov (!%p350_p2), 1  }
   0xa   : > { %s3050_s29 = smov (!%p350_p2), 15   ;;  %s3051_s30 = smov (!%p350_p2), 16  }
   0xb   : > { %s3052_s12 = smov (!%p350_p2), 17   ;;  %s3053_s13 = smov (!%p350_p2), 111  }
   0xc   : > { %s1681_s15 = sld [smem:[#allocation4]] (!%p350_p2) }
   0xd   : > { %s4376_s22 = smov (!%p394_p3, %s2471_s22), 1  ;;  %v422_v5 = vlaneseq  ;;  %v2487_v8 = vld [vmem:[%s4363_s0 + $0xe] sm:$0x3]  ;;  %v2486_v27 = vld [vmem:[%s4363_s0 + $0xc] sm:$0x3]  ;;  %vm797_vm8 = vcmask 130048  }
   0xe   : > { %s2915_s5 = sshll.u32 %s4376_s22, 5  ;;  %v603_v9 = vperm.slane %v2487_v8, 0  ;;  %v604_v10 = vperm.slane %v2487_v8, 1  ;;  %v575_v30 = vperm.slane %v2486_v27, 0  ;;  %v576_v31 = vperm.slane %v2486_v27, 1 }
   0xf   : > { %s398_s24 = scalar_lea.vmem %s4364_s1, %s2915_s5  ;;  %v3207_v7 = vand.u32 127, %v422_v5  ;;  %v2485_v42 = vld [vmem:[%s4363_s0 + $0xa] sm:$0x3]  ;;  %s880_s5 = sld [smem:[#allocation3]] }
  0x10   : > { %v3135_v0 = vld [vmem:[%s398_s24 + $0x8] sm:$0xff]  ;;  %v3137_v1 = vld [vmem:[%s398_s24] sm:$0xff]  ;;  %v3145_v2 = vld [vmem:[%s398_s24 + $0x18] sm:$0xff]  ;;  %v547_v50 = vperm.slane %v2485_v42, 0  ;;  %v548_v51 = vperm.slane %v2485_v42, 1 }
  0x11   : > { %591 = vrot.lane.b32.xlu1 %v3135_v0, %s3046_s25  ;;  %587 = vrot.lane.b32.xlu0 %v3137_v1, %s3046_s25  ;;  %v3147_v3 = vld [vmem:[%s398_s24 + $0x10] sm:$0xff]  ;;  %vm595_vm0 = vcmp.lt.s32.totalorder %v3207_v7, 112  ;;  %v527_v23 = vpack.c.bf16 %v3135_v0, %v3137_v1  ;;  %vm567_vm1 = vcmp.lt.s32.totalorder %v3207_v7, 113  ;;  %vm539_vm2 = vcmp.lt.s32.totalorder %v3207_v7, 127 }
  0x12   : > { %559 = vrot.lane.b32.xlu2 %v3137_v1, %s3047_s26  ;;  %v528_v24 = vpack.c.bf16 %v3145_v2, %v3147_v3  ;;  %vm507_vm3 = vcmp.lt.s32.totalorder %v3207_v7, 1  ;;  %vm479_vm4 = vcmp.lt.s32.totalorder %v3207_v7, 15  ;;  %vm451_vm5 = vcmp.lt.s32.totalorder %v3207_v7, 16 }
  0x13   : > { %529 = vst [vmem:[#allocation2 + $0x40] sm:$0xff] %v527_v23  ;;  %vm424_vm6 = vcmp.lt.s32.totalorder %v3207_v7, 17  ;;  %vm623_vm7 = vcmp.lt.s32.totalorder %v3207_v7, 111  ;;  %v2120_v7 = vld [vmem:[%s4372_s9 + $0x8] sm:$0xf] }
  0x14   : > { %530 = vst [vmem:[#allocation2 + $0x48] sm:$0xff] %v528_v24 }
  0x19   : > { %593 = vrot.lane.b32.xlu1 %v3145_v2, %s3046_s25  ;;  %589 = vrot.lane.b32.xlu0 %v3147_v3, %s3046_s25 }
  0x1a   : > { %561 = vrot.lane.b32.xlu2 %v3147_v3, %s3047_s26 }
  0x21   : > { %565 = vrot.lane.b32.xlu1 %v3145_v2, %s3047_s26  ;;  %563 = vrot.lane.b32.xlu0 %v3135_v0, %s3047_s26 }
  0x22   : > { %531 = vrot.lane.b32.xlu2 %v3137_v1, %s3048_s27 }
  0x29   : > { %535 = vrot.lane.b32.xlu1 %v3135_v0, %s3048_s27  ;;  %533 = vrot.lane.b32.xlu0 %v3147_v3, %s3048_s27 }
  0x2a   : > { %537 = vrot.lane.b32.xlu2 %v3145_v2, %s3048_s27 }
  0x31   : > { %501 = vrot.lane.b32.xlu1 %v3147_v3, %s3049_s28  ;;  %499 = vrot.lane.b32.xlu0 %v3137_v1, %s3049_s28 }
  0x32   : > { %503 = vrot.lane.b32.xlu2 %v3135_v0, %s3049_s28 }
  0x39   : > { %471 = vrot.lane.b32.xlu1 %v3137_v1, %s3050_s29  ;;  %505 = vrot.lane.b32.xlu0 %v3145_v2, %s3049_s28 }
  0x3a   : > { %473 = vrot.lane.b32.xlu2 %v3147_v3, %s3050_s29 }
  0x41   : > { %477 = vrot.lane.b32.xlu1 %v3145_v2, %s3050_s29  ;;  %475 = vrot.lane.b32.xlu0 %v3135_v0, %s3050_s29 }
  0x42   : > { %443 = vrot.lane.b32.xlu2 %v3137_v1, %s3051_s30 }
  0x49   : > { %447 = vrot.lane.b32.xlu1 %v3135_v0, %s3051_s30  ;;  %445 = vrot.lane.b32.xlu0 %v3147_v3, %s3051_s30 }
  0x4a   : > { %449 = vrot.lane.b32.xlu2 %v3145_v2, %s3051_s30 }
  0x51   : > { %416 = vrot.lane.b32.xlu1 %v3147_v3, %s3052_s12  ;;  %414 = vrot.lane.b32.xlu0 %v3137_v1, %s3052_s12 }
  0x52   : > { %418 = vrot.lane.b32.xlu2 %v3135_v0, %s3052_s12 }
  0x59   : > { %615 = vrot.lane.b32.xlu1 %v3137_v1, %s3053_s13  ;;  %420 = vrot.lane.b32.xlu0 %v3145_v2, %s3052_s12 }
  0x5a   : > { %617 = vrot.lane.b32.xlu2 %v3147_v3, %s3053_s13 }
  0x61   : > { %621 = vrot.lane.b32.xlu1 %v3145_v2, %s3053_s13  ;;  %619 = vrot.lane.b32.xlu0 %v3135_v0, %s3053_s13  ;;  %v2484_v0 = vld [vmem:[%s4363_s0 + $0x6] sm:$0x3] }
  0x62   : > { %v515_v5 = vperm.slane %v2484_v0, 0 }
  0x6c   : > { %v560_v4 = vpop.permute.xlu2 %559 }
  0x74   : > { %v562_v6 = vpop.permute.xlu2 %561 }
  0x7c   : > { %v532_v15 = vpop.permute.xlu2 %531 }
  0x83   : > { %v592_v11 = vpop.permute.xlu1 %591  ;;  %v588_v12 = vpop.permute.xlu0 %587 }
  0x84   : > { %v596_v13 = vsel %vm595_vm0, %v588_v12, %v592_v11  ;;  %v598_v14 = vsel %vm595_vm0, %v592_v11, %v588_v12  ;;  %v538_v28 = vpop.permute.xlu2 %537 }
  0x85   : > { %v607_v16 = vmul.f32 %v603_v9, %v596_v13  ;;  %v608_v17 = vmul.f32 %v604_v10, %v598_v14 }
  0x87   : > { %v611_v18 = vpack.c.bf16 %v608_v17, %v607_v16 }
  0x89   : > { %613 = vst [vmem:[#allocation2 + $0x70] sm:$0xff] %v611_v18 }
  0x8b   : > { %v594_v19 = vpop.permute.xlu1 %593  ;;  %v590_v20 = vpop.permute.xlu0 %589 }
  0x8c   : > { %v597_v21 = vsel %vm595_vm0, %v590_v20, %v594_v19  ;;  %v599_v22 = vsel %vm595_vm0, %v594_v19, %v590_v20  ;;  %v504_v49 = vpop.permute.xlu2 %503  ;;  %v2539_v20 = vld [vmem:[#allocation2 + $0x40] sm:$0xf] }
  0x8d   : > { %v609_v25 = vmul.f32 %v603_v9, %v597_v21  ;;  %v610_v26 = vmul.f32 %v604_v10, %v599_v22  ;;  %v516_v9 = vperm.slane %v2484_v0, 1  ;;  %v2927_v21 = vld [vmem:[#allocation2 + $0x44] sm:$0xf0]  ;;  %v2926_v22 = vld [vmem:[#allocation2 + $0x44] sm:$0xf] }
  0x8f   : > { %v612_v29 = vpack.c.bf16 %v610_v26, %v609_v25  ;;  %v2541_v25 = vld [vmem:[#allocation2 + $0x48] sm:$0xf0] }
  0x90   : > { %v2563_v45 = vld [vmem:[#allocation2 + $0x70] sm:$0xf]  ;;  %v2932_v47 = vld [vmem:[#allocation2 + $0x74] sm:$0xf] }
  0x91   : > { %614 = vst [vmem:[#allocation2 + $0x78] sm:$0xff] %v612_v29 }
  0x93   : > { %v566_v32 = vpop.permute.xlu1 %565  ;;  %v564_v33 = vpop.permute.xlu0 %563 }
  0x94   : > { %v569_v34 = vsel %vm567_vm1, %v562_v6, %v566_v32  ;;  %v571_v35 = vsel %vm567_vm1, %v566_v32, %v562_v6  ;;  %v568_v36 = vsel %vm567_vm1, %v560_v4, %v564_v33  ;;  %v570_v37 = vsel %vm567_vm1, %v564_v33, %v560_v4  ;;  %v474_v12 = vpop.permute.xlu2 %473 }
  0x95   : > { %v581_v38 = vmul.f32 %v575_v30, %v569_v34  ;;  %v582_v39 = vmul.f32 %v576_v31, %v571_v35  ;;  %v579_v40 = vmul.f32 %v575_v30, %v568_v36  ;;  %v580_v41 = vmul.f32 %v576_v31, %v570_v37 }
  0x96   : > { %v2540_v32 = vor.u32 %v2927_v21, %v2539_v20  ;;  %v2544_v35 = vor.u32 %v2926_v22, %v2541_v25 }
  0x97   : > { %v584_v43 = vpack.c.bf16 %v582_v39, %v581_v38  ;;  %v583_v44 = vpack.c.bf16 %v580_v41, %v579_v40  ;;  %v2483_v39 = vld [vmem:[%s4363_s0 + $0x4] sm:$0x3] }
  0x98   : > { %v2933_v46 = vld [vmem:[#allocation2 + $0x74] sm:$0xf0]  ;;  %v2565_v48 = vld [vmem:[#allocation2 + $0x78] sm:$0xf0]  ;;  %v487_v41 = vperm.slane %v2483_v39, 0  ;;  %v488_v42 = vperm.slane %v2483_v39, 1 }
  0x99   : > { %586 = vst [vmem:[#allocation2 + $0x68] sm:$0xff] %v584_v43  ;;  %v2564_v52 = vor.u32 %v2933_v46, %v2563_v45  ;;  %v2568_v53 = vor.u32 %v2932_v47, %v2565_v48 }
  0x9a   : > { %585 = vst [vmem:[#allocation2 + $0x60] sm:$0xff] %v583_v44 }
  0x9b   : > { %v536_v54 = vpop.permute.xlu1 %535  ;;  %804 = vmatpush.bf16.msra.mxu0 %v2564_v52  ;;  %842 = vmatpush.bf16.msra.mxu2 %v2568_v53  ;;  %v534_v55 = vpop.permute.xlu0 %533  ;;  %v2482_v53 = vld [vmem:[%s4363_s0 + $0x2] sm:$0x3] }
  0x9c   : > { %v540_v56 = vsel %vm539_vm2, %v532_v15, %v536_v54  ;;  %v542_v57 = vsel %vm539_vm2, %v536_v54, %v532_v15  ;;  %v541_v58 = vsel %vm539_vm2, %v534_v55, %v538_v28  ;;  %v543_v59 = vsel %vm539_vm2, %v538_v28, %v534_v55  ;;  %v444_v38 = vpop.permute.xlu2 %443 }
  0x9d   : > { %v551_v60 = vmul.f32 %v547_v50, %v540_v56  ;;  %v552_v61 = vmul.f32 %v548_v51, %v542_v57  ;;  %v553_v62 = vmul.f32 %v547_v50, %v541_v58  ;;  %v554_v63 = vmul.f32 %v548_v51, %v543_v59 }
  0x9f   : > { %v555_v1 = vpack.c.bf16 %v552_v61, %v551_v60  ;;  %v556_v2 = vpack.c.bf16 %v554_v63, %v553_v62  ;;  %v459_v61 = vperm.slane %v2482_v53, 0  ;;  %v460_v62 = vperm.slane %v2482_v53, 1 }
  0xa0   : > { %v2931_v3 = vld [vmem:[#allocation2 + $0x64] sm:$0xf0]  ;;  %v2557_v4 = vld [vmem:[#allocation2 + $0x68] sm:$0xf0] }
  0xa1   : > { %557 = vst [vmem:[#allocation2 + $0x50] sm:$0xff] %v555_v1  ;;  %v2555_v6 = vld [vmem:[#allocation2 + $0x60] sm:$0xf]  ;;  %v2930_v8 = vld [vmem:[#allocation2 + $0x64] sm:$0xf] }
  0xa2   : > { %558 = vst [vmem:[#allocation2 + $0x58] sm:$0xff] %v556_v2  ;;  %v2556_v10 = vor.u32 %v2931_v3, %v2555_v6  ;;  %v2560_v11 = vor.u32 %v2930_v8, %v2557_v4 }
  0xa3   : > { %v502_v13 = vpop.permute.xlu1 %501  ;;  %v500_v14 = vpop.permute.xlu0 %499 }
  0xa4   : > { %805 = vmatpush.bf16.msra.mxu0 %v2556_v10  ;;  %843 = vmatpush.bf16.msra.mxu2 %v2560_v11  ;;  %v508_v15 = vsel %vm507_vm3, %v500_v14, %v504_v49  ;;  %v510_v16 = vsel %vm507_vm3, %v504_v49, %v500_v14  ;;  %v450_v56 = vpop.permute.xlu2 %449 }
  0xa5   : > { %v519_v17 = vmul.f32 %v515_v5, %v510_v16  ;;  %v520_v18 = vmul.f32 %v516_v9, %v508_v15 }
  0xa7   : > { %v523_v19 = vpack.c.bf16 %v520_v18, %v519_v17 }
  0xa8   : > { %v2547_v23 = vld [vmem:[#allocation2 + $0x50] sm:$0xf]  ;;  %v2928_v24 = vld [vmem:[#allocation2 + $0x54] sm:$0xf] }
  0xa9   : > { %525 = vst [vmem:[#allocation2 + $0x30] sm:$0xff] %v523_v19  ;;  %v2929_v26 = vld [vmem:[#allocation2 + $0x54] sm:$0xf0]  ;;  %v2549_v27 = vld [vmem:[#allocation2 + $0x58] sm:$0xf0] }
  0xaa   : > { %v2548_v28 = vor.u32 %v2929_v26, %v2547_v23  ;;  %v2552_v29 = vor.u32 %v2928_v24, %v2549_v27 }
  0xab   : > { %v472_v30 = vpop.permute.xlu1 %471  ;;  %v506_v31 = vpop.permute.xlu0 %505 }
  0xac   : > { %806 = vmatpush.bf16.msra.mxu0 %v2548_v28  ;;  %844 = vmatpush.bf16.msra.mxu2 %v2552_v29  ;;  %v509_v33 = vsel %vm507_vm3, %v502_v13, %v506_v31  ;;  %v511_v34 = vsel %vm507_vm3, %v506_v31, %v502_v13  ;;  %v419_v18 = vpop.permute.xlu2 %418  ;;  %v665_v31 = vld [vmem:[%s4367_s4] sm:$0xff] }
  0xad   : > { %v521_v36 = vmul.f32 %v515_v5, %v511_v34  ;;  %v522_v37 = vmul.f32 %v516_v9, %v509_v33  ;;  %v3054_v34 = vmov 0  }
  0xae   : > { %3037 = vset.pattern.permute.xlu1 %v3054_v34  ;;  %3035 = vset.pattern.permute.xlu2 %v3054_v34 }
  0xaf   : > { %v524_v40 = vpack.c.bf16 %v522_v37, %v521_v36  ;;  %671 = vperm.xlu1 %3037, %v665_v31   ;;  %3036 = vset.pattern.permute.xlu0 %v3054_v34 }
  0xb0   : > { %807 = vmatpush.bf16.msra.mxu0 %v2540_v32  ;;  %845 = vmatpush.bf16.msra.mxu2 %v2544_v35  ;;  %v2531_v57 = vld [vmem:[#allocation2 + $0x30] sm:$0xf]  ;;  %v2924_v59 = vld [vmem:[#allocation2 + $0x34] sm:$0xf] }
  0xb1   : > { %526 = vst [vmem:[#allocation2 + $0x38] sm:$0xff] %v524_v40 }
  0xb3   : > { %v478_v43 = vpop.permute.xlu1 %477  ;;  %v476_v44 = vpop.permute.xlu0 %475 }
  0xb4   : > { %v481_v45 = vsel %vm479_vm4, %v474_v12, %v478_v43  ;;  %v483_v46 = vsel %vm479_vm4, %v478_v43, %v474_v12  ;;  %v480_v47 = vsel %vm479_vm4, %v472_v30, %v476_v44  ;;  %v482_v48 = vsel %vm479_vm4, %v476_v44, %v472_v30  ;;  %v429_v12 = vld [vmem:[%s4363_s0] sm:$0x3] }
  0xb5   : > { %v493_v49 = vmul.f32 %v487_v41, %v483_v46  ;;  %v494_v50 = vmul.f32 %v488_v42, %v481_v45  ;;  %v491_v51 = vmul.f32 %v487_v41, %v482_v48  ;;  %v492_v52 = vmul.f32 %v488_v42, %v480_v47  ;;  %v2488_v45 = vld [vmem:[%s4363_s0 + $0x10] sm:$0x3] }
  0xb6   : > { %v431_v15 = vperm.slane %v429_v12, 0  ;;  %v432_v19 = vperm.slane %v429_v12, 1  ;;  %v631_v47 = vperm.slane %v2488_v45, 0  ;;  %v632_v48 = vperm.slane %v2488_v45, 1 }
  0xb7   : > { %v496_v54 = vpack.c.bf16 %v494_v50, %v493_v49  ;;  %v495_v55 = vpack.c.bf16 %v492_v52, %v491_v51  ;;  %v618_v49 = vpop.permute.xlu2 %617 }
  0xb8   : > { %v2925_v58 = vld [vmem:[#allocation2 + $0x34] sm:$0xf0]  ;;  %v2533_v60 = vld [vmem:[#allocation2 + $0x38] sm:$0xf0] }
  0xb9   : > { %498 = vst [vmem:[#allocation2 + $0x28] sm:$0xff] %v496_v54  ;;  %v2532_v63 = vor.u32 %v2925_v58, %v2531_v57  ;;  %v2536_v0 = vor.u32 %v2924_v59, %v2533_v60  ;;  %v2491_v60 = vld [vmem:[%s4366_s3] sm:$0xf] }
  0xba   : > { %497 = vst [vmem:[#allocation2 + $0x20] sm:$0xff] %v495_v55 }
  0xbb   : > { %v448_v1 = vpop.permute.xlu1 %447  ;;  %v446_v2 = vpop.permute.xlu0 %445  ;;  %808 = vmatpush.bf16.msra.mxu0 %v2532_v63  ;;  %846 = vmatpush.bf16.msra.mxu2 %v2536_v0 }
  0xbc   : > { %v452_v3 = vsel %vm451_vm5, %v444_v38, %v448_v1  ;;  %v454_v4 = vsel %vm451_vm5, %v448_v1, %v444_v38  ;;  %v453_v5 = vsel %vm451_vm5, %v446_v2, %v450_v56  ;;  %v455_v6 = vsel %vm451_vm5, %v450_v56, %v446_v2  ;;  %v667_v1 = vld [vmem:[%s4367_s4 + $0x10] sm:$0xff]  ;;  %v668_v2 = vld [vmem:[%s4367_s4 + $0x18] sm:$0xff] }
  0xbd   : > { %v463_v8 = vmul.f32 %v459_v61, %v454_v4  ;;  %v464_v9 = vmul.f32 %v460_v62, %v452_v3  ;;  %v465_v10 = vmul.f32 %v459_v61, %v455_v6  ;;  %v466_v11 = vmul.f32 %v460_v62, %v453_v5  ;;  %v2937_v61 = vld [vmem:[%s4366_s3 + $0x4] sm:$0xf0]  ;;  %681 = vperm.xlu2 %3035, %v667_v1  }
  0xbe   : > { %686 = vperm.xlu0 %3036, %v668_v2  }
  0xbf   : > { %v467_v13 = vpack.c.bf16 %v464_v9, %v463_v8  ;;  %v468_v14 = vpack.c.bf16 %v466_v11, %v465_v10  ;;  %v2492_v9 = vor.u32 %v2937_v61, %v2491_v60  ;;  %v666_v10 = vld [vmem:[%s4367_s4 + $0x8] sm:$0xff]  ;;  %v2936_v11 = vld [vmem:[%s4366_s3 + $0x4] sm:$0xf] }
  0xc0   : > { %v2923_v16 = vld [vmem:[#allocation2 + $0x24] sm:$0xf0]  ;;  %v2525_v17 = vld [vmem:[#allocation2 + $0x28] sm:$0xf0] }
  0xc1   : > { %469 = vst [vmem:[#allocation2 + $0x10] sm:$0xff] %v467_v13  ;;  %v2523_v20 = vld [vmem:[#allocation2 + $0x20] sm:$0xf]  ;;  %v2922_v21 = vld [vmem:[#allocation2 + $0x24] sm:$0xf] }
  0xc2   : > { %470 = vst [vmem:[#allocation2 + $0x18] sm:$0xff] %v468_v14  ;;  %v2524_v22 = vor.u32 %v2923_v16, %v2523_v20  ;;  %v2528_v23 = vor.u32 %v2922_v21, %v2525_v17  ;;  %v2493_v14 = vld [vmem:[%s4366_s3 + $0x8] sm:$0xf0]  ;;  %v2499_v20 = vld [vmem:[%s4366_s3 + $0x10] sm:$0xf] }
  0xc3   : > { %v417_v24 = vpop.permute.xlu1 %416  ;;  %v415_v25 = vpop.permute.xlu0 %414  ;;  %v2939_v21 = vld [vmem:[%s4366_s3 + $0x14] sm:$0xf0] }
  0xc4   : > { %v425_v26 = vsel %vm424_vm6, %v415_v25, %v419_v18  ;;  %v427_v27 = vsel %vm424_vm6, %v419_v18, %v415_v25  ;;  %809 = vmatpush.bf16.msra.mxu0 %v2524_v22  ;;  %847 = vmatpush.bf16.msra.mxu2 %v2528_v23  ;;  %v2500_v22 = vor.u32 %v2939_v21, %v2499_v20  ;;  %v2938_v23 = vld [vmem:[%s4366_s3 + $0x14] sm:$0xf] }
  0xc5   : > { %v435_v28 = vmul.f32 %v431_v15, %v427_v27  ;;  %v436_v29 = vmul.f32 %v432_v19, %v425_v26  ;;  %676 = vperm.xlu2 %3035, %v666_v10  }
  0xc7   : > { %v439_v30 = vpack.c.bf16 %v436_v29, %v435_v28 }
  0xc8   : > { %v2515_v32 = vld [vmem:[#allocation2 + $0x10] sm:$0xf]  ;;  %v2920_v33 = vld [vmem:[#allocation2 + $0x14] sm:$0xf] }
  0xc9   : > { %441 = vst [vmem:[#allocation2] sm:$0xff] %v439_v30  ;;  %v2921_v35 = vld [vmem:[#allocation2 + $0x14] sm:$0xf0]  ;;  %v2517_v36 = vld [vmem:[#allocation2 + $0x18] sm:$0xf0] }
  0xca   : > { %v2516_v37 = vor.u32 %v2921_v35, %v2515_v32  ;;  %v2520_v38 = vor.u32 %v2920_v33, %v2517_v36  ;;  %v3345_v33 = vstv %s880_s5 }
  0xcb   : > { %v616_v39 = vpop.permute.xlu1 %615  ;;  %v421_v40 = vpop.permute.xlu0 %420 }
  0xcc   : > { %v426_v41 = vsel %vm424_vm6, %v417_v24, %v421_v40  ;;  %v428_v42 = vsel %vm424_vm6, %v421_v40, %v417_v24  ;;  %810 = vmatpush.bf16.msra.mxu0 %v2516_v37  ;;  %848 = vmatpush.bf16.msra.mxu2 %v2520_v38  ;;  %v2501_v24 = vld [vmem:[%s4366_s3 + $0x18] sm:$0xf0] }
  0xcd   : > { %v437_v43 = vmul.f32 %v431_v15, %v428_v42  ;;  %v438_v44 = vmul.f32 %v432_v19, %v426_v41  ;;  %v2496_v19 = vor.u32 %v2936_v11, %v2493_v14  ;;  %v2504_v25 = vor.u32 %v2938_v23, %v2501_v24  ;;  %v2586_v23 = vld [vmem:[%s4363_s0 + $0xe] sm:$0x3] }
  0xce   : > { %v3474_v24 = vperm.slane %v2586_v23, 0 }
  0xcf   : > { %v440_v46 = vpack.c.bf16 %v438_v44, %v437_v43 }
  0xd0   : > { %v2507_v0 = vld [vmem:[#allocation2] sm:$0xf]  ;;  %v2918_v4 = vld [vmem:[#allocation2 + $0x4] sm:$0xf] }
  0xd1   : > { %442 = vst [vmem:[#allocation2 + $0x8] sm:$0xff] %v440_v46 }
  0xd3   : > { %v622_v50 = vpop.permute.xlu1 %621  ;;  %v620_v51 = vpop.permute.xlu0 %619 }
  0xd4   : > { %v625_v52 = vsel %vm623_vm7, %v618_v49, %v622_v50  ;;  %v627_v53 = vsel %vm623_vm7, %v622_v50, %v618_v49  ;;  %v624_v54 = vsel %vm623_vm7, %v616_v39, %v620_v51  ;;  %v626_v55 = vsel %vm623_vm7, %v620_v51, %v616_v39 }
  0xd5   : > { %v637_v56 = vmul.f32 %v631_v47, %v625_v52  ;;  %v638_v57 = vmul.f32 %v632_v48, %v627_v53  ;;  %v635_v58 = vmul.f32 %v631_v47, %v624_v54  ;;  %v636_v59 = vmul.f32 %v632_v48, %v626_v55 }
  0xd7   : > { %v640_v62 = vpack.c.bf16 %v638_v57, %v637_v56  ;;  %v639_v63 = vpack.c.bf16 %v636_v59, %v635_v58 }
  0xd8   : > { %v2919_v3 = vld [vmem:[#allocation2 + $0x4] sm:$0xf0]  ;;  %v2509_v5 = vld [vmem:[#allocation2 + $0x8] sm:$0xf0] }
  0xd9   : > { %642 = vst [vmem:[#allocation2 + $0x88] sm:$0xff] %v640_v62  ;;  %v2508_v6 = vor.u32 %v2919_v3, %v2507_v0  ;;  %v2512_v8 = vor.u32 %v2918_v4, %v2509_v5 }
  0xda   : > { %641 = vst [vmem:[#allocation2 + $0x80] sm:$0xff] %v639_v63 }
  0xdb   : > { %811 = vmatpush.bf16.msra.mxu0 %v2508_v6  ;;  %849 = vmatpush.bf16.msra.mxu2 %v2512_v8 }
  0xde   : > { %812 = vmatmul.bf16.vlgmr.msra.gmra.mxu0 %v2492_v9  ;;  %850 = vmatmul.bf16.vlgmr.msra.gmra.mxu2 %v2492_v9 }
  0xe0   : > { %v2935_v12 = vld [vmem:[#allocation2 + $0x84] sm:$0xf0]  ;;  %v2573_v13 = vld [vmem:[#allocation2 + $0x88] sm:$0xf0] }
  0xe1   : > { %v2571_v15 = vld [vmem:[#allocation2 + $0x80] sm:$0xf]  ;;  %v2934_v16 = vld [vmem:[#allocation2 + $0x84] sm:$0xf] }
  0xe2   : > { %v2572_v17 = vor.u32 %v2935_v12, %v2571_v15  ;;  %v2576_v18 = vor.u32 %v2934_v16, %v2573_v13 }
  0xe4   : > { %830 = vmatpush.bf16.msra.mxu1 %v2572_v17  ;;  %868 = vmatpush.bf16.msra.mxu3 %v2576_v18 }
  0xe7   : > { %2577 = vmatmul.msk.bf16.vlgmr.msra.gmra.mxu1 %vm797_vm8, %v2496_v19  ;;  %2579 = vmatmul.msk.bf16.vlgmr.msra.gmra.mxu3 %vm797_vm8, %v2496_v19 }
  0xee   : > { %855 = vmatmul.bf16.gmra.mxu2 %v2500_v22  ;;  %817 = vmatmul.bf16.gmra.mxu0 %v2500_v22 }
  0xf7   : > { %2580 = vmatmul.msk.bf16.gmra.mxu3 %vm797_vm8, %v2504_v25  ;;  %2578 = vmatmul.msk.bf16.gmra.mxu1 %vm797_vm8, %v2504_v25  ;;  %v3476_v25 = vperm.slane %v2586_v23, 1 }
 0x117   : > { %v682_v28 = vpop.permute.xlu2 %681 }
 0x11f   : > { %v677_v39 = vpop.permute.xlu2 %676 }
 0x121   : > { %v672_v27 = vpop.permute.xlu1 %671 }
 0x130   : > { %v687_v58 = vpop.permute.xlu0 %686 }
 0x15b   : > { %v813_v26 = vpop.f32.mrf.mxu0 }
 0x15c   : > { %v814_v29 = vadd.f32 %v813_v26, %v672_v27 }
 0x161   : > { %v851_v30 = vpop.f32.mrf.mxu2 }
 0x162   : > { %v852_v36 = vadd.f32 %v851_v30, %v672_v27 }
 0x163   : > { %v815_v31 = vpop.f32.mrf.mxu0 }
 0x164   : > { %v832_v32 = vpop.f32.mrf.mxu1  ;;  %v816_v44 = vadd.f32 %v815_v31, %v677_v39 }
 0x165   : > { %v833_v34 = vadd.f32 %v832_v32, %v814_v29 }
 0x167   : > { %vm881_vm9 = vcmp.ge.f32.partialorder %v833_v34, 0.0  ;;  %v890_v35 = vmul.f32 %v3345_v33, %v833_v34 }
 0x169   : > { %v3348_v37 = vsel %vm881_vm9, %v833_v34, %v890_v35  ;;  %v853_v38 = vpop.f32.mrf.mxu2  ;;  %vm1560_vm9 = vcmask 261120  }
 0x16a   : > { %v870_v40 = vpop.f32.mrf.mxu3  ;;  %998 = vrot.lane.b32.xlu2 %v3348_v37, %s3050_s29  ;;  %1044 = vrot.lane.b32.xlu1 %v3348_v37, %s3049_s28  ;;  %v854_v48 = vadd.f32 %v853_v38, %v677_v39 }
 0x16b   : > { %v871_v41 = vadd.f32 %v870_v40, %v852_v36  ;;  %1190 = vrot.lane.b32.xlu0 %v3348_v37, %s3046_s25  ;;  %v818_v43 = vpop.f32.mrf.mxu0 }
 0x16c   : > { %v834_v42 = vpop.f32.mrf.mxu1  ;;  %v819_v50 = vadd.f32 %v818_v43, %v682_v28 }
 0x16d   : > { %vm882_vm10 = vcmp.ge.f32.partialorder %v871_v41, 0.0  ;;  %v891_v45 = vmul.f32 %v3345_v33, %v871_v41  ;;  %v835_v47 = vadd.f32 %v834_v42, %v816_v44 }
 0x16f   : > { %v3357_v46 = vsel %vm882_vm10, %v871_v41, %v891_v45  ;;  %v892_v53 = vmul.f32 %v3345_v33, %v835_v47  ;;  %vm883_vm11 = vcmp.ge.f32.partialorder %v835_v47, 0.0  ;;  %v2582_v45 = vld [vmem:[%s4363_s0 + $0x4] sm:$0x3] }
 0x170   : > { %v1090_v49 = vpack.c.bf16 %v3357_v46, %v3348_v37 }
 0x171   : > { %v856_v52 = vpop.f32.mrf.mxu2  ;;  %v3369_v60 = vsel %vm883_vm11, %v835_v47, %v892_v53  ;;  %v2583_v47 = vld [vmem:[%s4363_s0 + $0x6] sm:$0x3] }
 0x172   : > { %1094 = vst [vmem:[#allocation2 + $0x80] sm:$0xff] %v1090_v49  ;;  %v872_v51 = vpop.f32.mrf.mxu3  ;;  %1098 = vrot.lane.b32.xlu2 %v3348_v37, %s3048_s27  ;;  %1144 = vrot.lane.b32.xlu1 %v3348_v37, %s3047_s26  ;;  %v857_v62 = vadd.f32 %v856_v52, %v682_v28  ;;  %v3515_v49 = vperm.slane %v2582_v45, 0  ;;  %v3523_v52 = vperm.slane %v2583_v47, 1 }
 0x173   : > { %v873_v54 = vadd.f32 %v872_v51, %v854_v48  ;;  %952 = vrot.lane.b32.xlu0 %v3348_v37, %s3051_s30  ;;  %v820_v59 = vpop.f32.mrf.mxu0  ;;  %v3521_v51 = vperm.slane %v2583_v47, 0 }
 0x174   : > { %v837_v55 = vpop.f32.mrf.mxu1  ;;  %v821_v1 = vadd.f32 %v820_v59, %v687_v58 }
 0x175   : > { %vm884_vm12 = vcmp.ge.f32.partialorder %v873_v54, 0.0  ;;  %v893_v56 = vmul.f32 %v3345_v33, %v873_v54  ;;  %v838_v57 = vadd.f32 %v837_v55, %v819_v50  ;;  %v3517_v50 = vperm.slane %v2582_v45, 1 }
 0x177   : > { %v3371_v61 = vsel %vm884_vm12, %v873_v54, %v893_v56  ;;  %v894_v0 = vmul.f32 %v3345_v33, %v838_v57  ;;  %vm885_vm13 = vcmp.ge.f32.partialorder %v838_v57, 0.0 }
 0x178   : > { %v1091_v63 = vpack.c.bf16 %v3371_v61, %v3369_v60 }
 0x179   : > { %v858_v4 = vpop.f32.mrf.mxu2  ;;  %v3382_v6 = vsel %vm885_vm13, %v838_v57, %v894_v0 }
 0x17a   : > { %1095 = vst [vmem:[#allocation2 + $0x88] sm:$0xff] %v1091_v63  ;;  %v875_v2 = vpop.f32.mrf.mxu3  ;;  %1006 = vrot.lane.b32.xlu1 %v3357_v46, %s3050_s29  ;;  %1198 = vrot.lane.b32.xlu2 %v3357_v46, %s3046_s25  ;;  %v859_v11 = vadd.f32 %v858_v4, %v687_v58  ;;  %v2585_v4 = vld [vmem:[%s4363_s0 + $0xc] sm:$0x3] }
 0x17b   : > { %v876_v3 = vadd.f32 %v875_v2, %v857_v62  ;;  %1052 = vrot.lane.b32.xlu0 %v3357_v46, %s3049_s28  ;;  %v2584_v2 = vld [vmem:[%s4363_s0 + $0xa] sm:$0x3] }
 0x17c   : > { %v839_v5 = vpop.f32.mrf.mxu1 }
 0x17d   : > { %vm886_vm14 = vcmp.ge.f32.partialorder %v876_v3, 0.0  ;;  %v895_v8 = vmul.f32 %v3345_v33, %v876_v3  ;;  %v840_v9 = vadd.f32 %v839_v5, %v821_v1 }
 0x17f   : > { %v3385_v10 = vsel %vm886_vm14, %v876_v3, %v895_v8  ;;  %v896_v13 = vmul.f32 %v3345_v33, %v840_v9  ;;  %vm887_vm15 = vcmp.ge.f32.partialorder %v840_v9, 0.0  ;;  %v3549_v8 = vperm.slane %v2584_v2, 0 }
 0x180   : > { %v1092_v12 = vpack.c.bf16 %v3385_v10, %v3382_v6 }
 0x181   : > { %v3396_v16 = vsel %vm887_vm15, %v840_v9, %v896_v13  ;;  %v3551_v9 = vperm.slane %v2584_v2, 1 }
 0x182   : > { %1096 = vst [vmem:[#allocation2 + $0x90] sm:$0xff] %v1092_v12  ;;  %v877_v14 = vpop.f32.mrf.mxu3  ;;  %1106 = vrot.lane.b32.xlu1 %v3357_v46, %s3048_s27  ;;  %960 = vrot.lane.b32.xlu2 %v3357_v46, %s3051_s30  ;;  %v3557_v12 = vperm.slane %v2585_v4, 1 }
 0x183   : > { %v878_v15 = vadd.f32 %v877_v14, %v859_v11  ;;  %1152 = vrot.lane.b32.xlu0 %v3357_v46, %s3047_s26  ;;  %v3555_v11 = vperm.slane %v2585_v4, 0 }
 0x185   : > { %vm888_vm8 = vcmp.ge.f32.partialorder %v878_v15, 0.0  ;;  %v897_v17 = vmul.f32 %v3345_v33, %v878_v15  ;;  %v2581_v33 = vld [vmem:[%s4363_s0 + $0x2] sm:$0x3] }
 0x186   : > { %v3493_v35 = vperm.slane %v2581_v33, 0  ;;  %v3495_v36 = vperm.slane %v2581_v33, 1 }
 0x187   : > { %v3399_v18 = vsel %vm888_vm8, %v878_v15, %v897_v17 }
 0x188   : > { %v1093_v19 = vpack.c.bf16 %v3399_v18, %v3396_v16 }
 0x18a   : > { %1097 = vst [vmem:[#allocation2 + $0x98] sm:$0xff] %v1093_v19  ;;  %1192 = vrot.lane.b32.xlu1 %v3369_v60, %s3046_s25  ;;  %1046 = vrot.lane.b32.xlu2 %v3369_v60, %s3049_s28 }
 0x18b   : > { %1000 = vrot.lane.b32.xlu0 %v3369_v60, %s3050_s29 }
 0x192   : > { %954 = vrot.lane.b32.xlu1 %v3369_v60, %s3051_s30  ;;  %1146 = vrot.lane.b32.xlu2 %v3369_v60, %s3047_s26 }
 0x193   : > { %1100 = vrot.lane.b32.xlu0 %v3369_v60, %s3048_s27 }
 0x19a   : > { %1054 = vrot.lane.b32.xlu1 %v3371_v61, %s3049_s28  ;;  %1008 = vrot.lane.b32.xlu2 %v3371_v61, %s3050_s29 }
 0x19b   : > { %1200 = vrot.lane.b32.xlu0 %v3371_v61, %s3046_s25 }
 0x1a2   : > { %1154 = vrot.lane.b32.xlu1 %v3371_v61, %s3047_s26  ;;  %1108 = vrot.lane.b32.xlu2 %v3371_v61, %s3048_s27 }
 0x1a3   : > { %962 = vrot.lane.b32.xlu0 %v3371_v61, %s3051_s30 }
 0x1aa   : > { %1194 = vrot.lane.b32.xlu1 %v3382_v6, %s3046_s25  ;;  %1048 = vrot.lane.b32.xlu2 %v3382_v6, %s3049_s28 }
 0x1ab   : > { %1002 = vrot.lane.b32.xlu0 %v3382_v6, %s3050_s29 }
 0x1b2   : > { %956 = vrot.lane.b32.xlu1 %v3382_v6, %s3051_s30  ;;  %1148 = vrot.lane.b32.xlu2 %v3382_v6, %s3047_s26 }
 0x1b3   : > { %1102 = vrot.lane.b32.xlu0 %v3382_v6, %s3048_s27 }
 0x1ba   : > { %1056 = vrot.lane.b32.xlu1 %v3385_v10, %s3049_s28  ;;  %1010 = vrot.lane.b32.xlu2 %v3385_v10, %s3050_s29 }
 0x1bb   : > { %1202 = vrot.lane.b32.xlu0 %v3385_v10, %s3046_s25 }
 0x1c2   : > { %1156 = vrot.lane.b32.xlu1 %v3385_v10, %s3047_s26  ;;  %1110 = vrot.lane.b32.xlu2 %v3385_v10, %s3048_s27 }
 0x1c3   : > { %964 = vrot.lane.b32.xlu0 %v3385_v10, %s3051_s30 }
 0x1c4   : > { %v999_v20 = vpop.permute.xlu2 %998 }
 0x1ca   : > { %1004 = vrot.lane.b32.xlu1 %v3396_v16, %s3050_s29  ;;  %1196 = vrot.lane.b32.xlu2 %v3396_v16, %s3046_s25 }
 0x1cb   : > { %1050 = vrot.lane.b32.xlu0 %v3396_v16, %s3049_s28 }
 0x1cc   : > { %v3457_v21 = vpop.permute.xlu2 %1098 }
 0x1d2   : > { %1104 = vrot.lane.b32.xlu1 %v3396_v16, %s3048_s27  ;;  %958 = vrot.lane.b32.xlu2 %v3396_v16, %s3051_s30 }
 0x1d3   : > { %1150 = vrot.lane.b32.xlu0 %v3396_v16, %s3047_s26 }
 0x1d4   : > { %v1199_v22 = vpop.permute.xlu2 %1198 }
 0x1da   : > { %1204 = vrot.lane.b32.xlu1 %v3399_v18, %s3046_s25  ;;  %1058 = vrot.lane.b32.xlu2 %v3399_v18, %s3049_s28 }
 0x1db   : > { %1012 = vrot.lane.b32.xlu0 %v3399_v18, %s3050_s29 }
 0x1dc   : > { %v1045_v26 = vpop.permute.xlu1 %1044  ;;  %v961_v27 = vpop.permute.xlu2 %960 }
 0x1dd   : > { %v1191_v28 = vpop.permute.xlu0 %1190 }
 0x1de   : > { %v1206_v29 = vsel %vm595_vm0, %v1191_v28, %v1199_v22  ;;  %v1210_v30 = vsel %vm595_vm0, %v1199_v22, %v1191_v28 }
 0x1df   : > { %v1220_v31 = vmul.f32 %v3474_v24, %v1206_v29  ;;  %v1221_v32 = vmul.f32 %v3476_v25, %v1210_v30 }
 0x1e1   : > { %v1228_v34 = vpack.c.bf16 %v1221_v32, %v1220_v31 }
 0x1e2   : > { %910 = vrot.lane.b32.xlu1 %v3382_v6, %s3052_s12  ;;  %1158 = vrot.lane.b32.xlu2 %v3399_v18, %s3047_s26 }
 0x1e3   : > { %1232 = vst [vmem:[#allocation2 + $0xe0] sm:$0xff] %v1228_v34  ;;  %1112 = vrot.lane.b32.xlu0 %v3399_v18, %s3048_s27 }
 0x1e4   : > { %v1145_v38 = vpop.permute.xlu1 %1144  ;;  %v3497_v39 = vpop.permute.xlu2 %1046 }
 0x1e5   : > { %v953_v40 = vpop.permute.xlu0 %952 }
 0x1e6   : > { %v968_v41 = vsel %vm451_vm5, %v953_v40, %v961_v27  ;;  %v972_v42 = vsel %vm451_vm5, %v961_v27, %v953_v40 }
 0x1e7   : > { %v982_v43 = vmul.f32 %v3493_v35, %v972_v42  ;;  %v983_v44 = vmul.f32 %v3495_v36, %v968_v41 }
 0x1e9   : > { %v990_v48 = vpack.c.bf16 %v983_v44, %v982_v43 }
 0x1ea   : > { %966 = vrot.lane.b32.xlu1 %v3399_v18, %s3051_s30  ;;  %912 = vrot.lane.b32.xlu2 %v3396_v16, %s3052_s12 }
 0x1eb   : > { %994 = vst [vmem:[#allocation2 + $0x20] sm:$0xff] %v990_v48  ;;  %918 = vrot.lane.b32.xlu0 %v3385_v10, %s3052_s12 }
 0x1ec   : > { %v1007_v53 = vpop.permute.xlu1 %1006  ;;  %v3525_v54 = vpop.permute.xlu2 %1146 }
 0x1ed   : > { %v1014_v55 = vsel %vm479_vm4, %v999_v20, %v1007_v53  ;;  %v1018_v56 = vsel %vm479_vm4, %v1007_v53, %v999_v20  ;;  %v1053_v57 = vpop.permute.xlu0 %1052 }
 0x1ee   : > { %v1028_v58 = vmul.f32 %v3515_v49, %v1018_v56  ;;  %v1029_v59 = vmul.f32 %v3517_v50, %v1014_v55  ;;  %v1060_v62 = vsel %vm507_vm3, %v1045_v26, %v1053_v57  ;;  %v1064_v63 = vsel %vm507_vm3, %v1053_v57, %v1045_v26 }
 0x1ef   : > { %v1074_v0 = vmul.f32 %v3521_v51, %v1064_v63  ;;  %v1075_v1 = vmul.f32 %v3523_v52, %v1060_v62  ;;  %v1328_v62 = vld [vmem:[%s4370_s7 + $0x10] sm:$0xff]  ;;  %v1329_v63 = vld [vmem:[%s4370_s7 + $0x18] sm:$0xff] }
 0x1f0   : > { %v1036_v3 = vpack.c.bf16 %v1029_v59, %v1028_v58 }
 0x1f1   : > { %v1082_v5 = vpack.c.bf16 %v1075_v1, %v1074_v0 }
 0x1f2   : > { %1040 = vst [vmem:[#allocation2 + $0x40] sm:$0xff] %v1036_v3  ;;  %920 = vrot.lane.b32.xlu1 %v3399_v18, %s3052_s12  ;;  %906 = vrot.lane.b32.xlu2 %v3348_v37, %s3052_s12 }
 0x1f3   : > { %1086 = vst [vmem:[#allocation2 + $0x60] sm:$0xff] %v1082_v5  ;;  %908 = vrot.lane.b32.xlu0 %v3369_v60, %s3052_s12 }
 0x1f4   : > { %v1107_v13 = vpop.permute.xlu1 %1106  ;;  %v1009_v14 = vpop.permute.xlu2 %1008 }
 0x1f5   : > { %v1114_v15 = vsel %vm539_vm2, %v3457_v21, %v1107_v13  ;;  %v1118_v17 = vsel %vm539_vm2, %v1107_v13, %v3457_v21  ;;  %v1153_v19 = vpop.permute.xlu0 %1152 }
 0x1f6   : > { %v1128_v20 = vmul.f32 %v3549_v8, %v1114_v15  ;;  %v1129_v22 = vmul.f32 %v3551_v9, %v1118_v17  ;;  %v1160_v23 = vsel %vm567_vm1, %v1145_v38, %v1153_v19  ;;  %v1164_v26 = vsel %vm567_vm1, %v1153_v19, %v1145_v38 }
 0x1f7   : > { %v1174_v27 = vmul.f32 %v3555_v11, %v1160_v23  ;;  %v1175_v28 = vmul.f32 %v3557_v12, %v1164_v26 }
 0x1f8   : > { %v1136_v29 = vpack.c.bf16 %v1129_v22, %v1128_v20  ;;  %v1326_v20 = vld [vmem:[%s4370_s7] sm:$0xff] }
 0x1f9   : > { %v1182_v30 = vpack.c.bf16 %v1175_v28, %v1174_v27 }
 0x1fa   : > { %1140 = vst [vmem:[#allocation2 + $0xa0] sm:$0xff] %v1136_v29  ;;  %914 = vrot.lane.b32.xlu1 %v3357_v46, %s3052_s12  ;;  %916 = vrot.lane.b32.xlu2 %v3371_v61, %s3052_s12 }
 0x1fb   : > { %1186 = vst [vmem:[#allocation2 + $0xc0] sm:$0xff] %v1182_v30  ;;  %1240 = vrot.lane.b32.xlu0 %v3382_v6, %s3053_s13 }
 0x1fc   : > { %v1193_v21 = vpop.permute.xlu1 %1192  ;;  %v1109_v31 = vpop.permute.xlu2 %1108 }
 0x1fd   : > { %v1001_v32 = vpop.permute.xlu0 %1000 }
 0x1fe   : > { %v1015_v33 = vsel %vm479_vm4, %v1001_v32, %v1009_v14  ;;  %v1019_v34 = vsel %vm479_vm4, %v1009_v14, %v1001_v32 }
 0x1ff   : > { %v1030_v38 = vmul.f32 %v3515_v49, %v1019_v34  ;;  %v1031_v40 = vmul.f32 %v3517_v50, %v1015_v33 }
 0x201   : > { %v1037_v41 = vpack.c.bf16 %v1031_v40, %v1030_v38 }
 0x202   : > { %1242 = vrot.lane.b32.xlu1 %v3396_v16, %s3053_s13  ;;  %1248 = vrot.lane.b32.xlu2 %v3385_v10, %s3053_s13 }
 0x203   : > { %1041 = vst [vmem:[#allocation2 + $0x48] sm:$0xff] %v1037_v41  ;;  %1250 = vrot.lane.b32.xlu0 %v3399_v18, %s3053_s13 }
 0x204   : > { %v955_v6 = vpop.permute.xlu1 %954  ;;  %v3591_v42 = vpop.permute.xlu2 %1048 }
 0x205   : > { %v1101_v43 = vpop.permute.xlu0 %1100 }
 0x206   : > { %v1115_v44 = vsel %vm539_vm2, %v1101_v43, %v1109_v31  ;;  %v1119_v45 = vsel %vm539_vm2, %v1109_v31, %v1101_v43 }
 0x207   : > { %v1130_v47 = vmul.f32 %v3549_v8, %v1115_v44  ;;  %v1131_v16 = vmul.f32 %v3551_v9, %v1119_v45 }
 0x209   : > { %v1137_v48 = vpack.c.bf16 %v1131_v16, %v1130_v47 }
 0x20a   : > { %1236 = vrot.lane.b32.xlu1 %v3348_v37, %s3053_s13  ;;  %1238 = vrot.lane.b32.xlu2 %v3369_v60, %s3053_s13 }
 0x20b   : > { %1141 = vst [vmem:[#allocation2 + $0xa8] sm:$0xff] %v1137_v48  ;;  %1244 = vrot.lane.b32.xlu0 %v3357_v46, %s3053_s13 }
 0x20c   : > { %v1055_v10 = vpop.permute.xlu1 %1054  ;;  %v3605_v18 = vpop.permute.xlu2 %1148 }
 0x20d   : > { %v1061_v53 = vsel %vm507_vm3, %v3497_v39, %v1055_v10  ;;  %v1065_v55 = vsel %vm507_vm3, %v1055_v10, %v3497_v39  ;;  %v1201_v56 = vpop.permute.xlu0 %1200 }
 0x20e   : > { %v1076_v37 = vmul.f32 %v3521_v51, %v1065_v55  ;;  %v1077_v60 = vmul.f32 %v3523_v52, %v1061_v53  ;;  %v1207_v57 = vsel %vm595_vm0, %v1193_v21, %v1201_v56  ;;  %v1211_v46 = vsel %vm595_vm0, %v1201_v56, %v1193_v21 }
 0x20f   : > { %v1222_v58 = vmul.f32 %v3474_v24, %v1207_v57  ;;  %v1223_v59 = vmul.f32 %v3476_v25, %v1211_v46 }
 0x210   : > { %v1083_v39 = vpack.c.bf16 %v1077_v60, %v1076_v37 }
 0x211   : > { %v1229_v0 = vpack.c.bf16 %v1223_v59, %v1222_v58 }
 0x212   : > { %1087 = vst [vmem:[#allocation2 + $0x68] sm:$0xff] %v1083_v39  ;;  %1246 = vrot.lane.b32.xlu1 %v3371_v61, %s3053_s13  ;;  %1342 = vperm.xlu2 %3035, %v1328_v62  }
 0x213   : > { %1233 = vst [vmem:[#allocation2 + $0xe8] sm:$0xff] %v1229_v0  ;;  %1347 = vperm.xlu0 %3036, %v1329_v63  }
 0x214   : > { %v1155_v1 = vpop.permute.xlu1 %1154  ;;  %v1011_v2 = vpop.permute.xlu2 %1010 }
 0x215   : > { %v1161_v3 = vsel %vm567_vm1, %v3525_v54, %v1155_v1  ;;  %v1165_v4 = vsel %vm567_vm1, %v1155_v1, %v3525_v54  ;;  %v963_v5 = vpop.permute.xlu0 %962  ;;  %v1327_v54 = vld [vmem:[%s4370_s7 + $0x8] sm:$0xff] }
 0x216   : > { %v1176_v13 = vmul.f32 %v3555_v11, %v1161_v3  ;;  %v1177_v14 = vmul.f32 %v3557_v12, %v1165_v4  ;;  %v969_v61 = vsel %vm451_vm5, %v955_v6, %v963_v5  ;;  %v973_v15 = vsel %vm451_vm5, %v963_v5, %v955_v6 }
 0x217   : > { %v984_v17 = vmul.f32 %v3493_v35, %v973_v15  ;;  %v985_v19 = vmul.f32 %v3495_v36, %v969_v61 }
 0x218   : > { %v1183_v22 = vpack.c.bf16 %v1177_v14, %v1176_v13 }
 0x219   : > { %v991_v23 = vpack.c.bf16 %v985_v19, %v984_v17 }
 0x21a   : > { %1187 = vst [vmem:[#allocation2 + $0xc8] sm:$0xff] %v1183_v22  ;;  %1332 = vperm.xlu1 %3037, %v1326_v20   ;;  %1337 = vperm.xlu2 %3035, %v1327_v54  }
 0x21b   : > { %995 = vst [vmem:[#allocation2 + $0x28] sm:$0xff] %v991_v23 }
 0x21c   : > { %v1195_v26 = vpop.permute.xlu1 %1194  ;;  %v1111_v28 = vpop.permute.xlu2 %1110 }
 0x21d   : > { %v1003_v27 = vpop.permute.xlu0 %1002 }
 0x21e   : > { %v1016_v29 = vsel %vm479_vm4, %v1003_v27, %v1011_v2  ;;  %v1020_v30 = vsel %vm479_vm4, %v1011_v2, %v1003_v27 }
 0x21f   : > { %v1032_v21 = vmul.f32 %v3515_v49, %v1020_v30  ;;  %v1033_v31 = vmul.f32 %v3517_v50, %v1016_v29 }
 0x221   : > { %v1038_v32 = vpack.c.bf16 %v1033_v31, %v1032_v21 }
 0x223   : > { %1042 = vst [vmem:[#allocation2 + $0x50] sm:$0xff] %v1038_v32 }
 0x224   : > { %v957_v33 = vpop.permute.xlu1 %956  ;;  %v1197_v43 = vpop.permute.xlu2 %1196 }
 0x225   : > { %v1103_v34 = vpop.permute.xlu0 %1102 }
 0x226   : > { %v1116_v38 = vsel %vm539_vm2, %v1103_v34, %v1111_v28  ;;  %v1120_v40 = vsel %vm539_vm2, %v1111_v28, %v1103_v34 }
 0x227   : > { %v1132_v41 = vmul.f32 %v3549_v8, %v1116_v38  ;;  %v1133_v6 = vmul.f32 %v3551_v9, %v1120_v40  ;;  %v2953_v40 = vld [vmem:[#allocation2 + $0x64] sm:$0xf0] }
 0x229   : > { %v1138_v44 = vpack.c.bf16 %v1133_v6, %v1132_v41  ;;  %v2664_v41 = vld [vmem:[#allocation2 + $0x68] sm:$0xf0] }
 0x22b   : > { %1142 = vst [vmem:[#allocation2 + $0xb0] sm:$0xff] %v1138_v44 }
 0x22c   : > { %v1057_v45 = vpop.permute.xlu1 %1056  ;;  %v3675_v58 = vpop.permute.xlu2 %958 }
 0x22d   : > { %v1062_v47 = vsel %vm507_vm3, %v3591_v42, %v1057_v45  ;;  %v1066_v16 = vsel %vm507_vm3, %v1057_v45, %v3591_v42  ;;  %v1203_v48 = vpop.permute.xlu0 %1202 }
 0x22e   : > { %v1078_v10 = vmul.f32 %v3521_v51, %v1066_v16  ;;  %v1079_v53 = vmul.f32 %v3523_v52, %v1062_v47  ;;  %v1208_v55 = vsel %vm595_vm0, %v1195_v26, %v1203_v48  ;;  %v1212_v56 = vsel %vm595_vm0, %v1203_v48, %v1195_v26  ;;  %v2662_v48 = vld [vmem:[#allocation2 + $0x60] sm:$0xf] }
 0x22f   : > { %v1224_v37 = vmul.f32 %v3474_v24, %v1208_v55  ;;  %v1225_v60 = vmul.f32 %v3476_v25, %v1212_v56  ;;  %v2663_v56 = vor.u32 %v2953_v40, %v2662_v48 }
 0x230   : > { %v1084_v57 = vpack.c.bf16 %v1079_v53, %v1078_v10  ;;  %v2952_v10 = vld [vmem:[#allocation2 + $0x64] sm:$0xf] }
 0x231   : > { %v1230_v46 = vpack.c.bf16 %v1225_v60, %v1224_v37  ;;  %v2667_v37 = vor.u32 %v2952_v10, %v2664_v41 }
 0x232   : > { %1088 = vst [vmem:[#allocation2 + $0x70] sm:$0xff] %v1084_v57 }
 0x233   : > { %1234 = vst [vmem:[#allocation2 + $0xf0] sm:$0xff] %v1230_v46 }
 0x234   : > { %v1157_v42 = vpop.permute.xlu1 %1156 }
 0x235   : > { %v1162_v59 = vsel %vm567_vm1, %v3605_v18, %v1157_v42  ;;  %v1166_v62 = vsel %vm567_vm1, %v1157_v42, %v3605_v18  ;;  %v965_v39 = vpop.permute.xlu0 %964  ;;  %v1059_v18 = vpop.permute.xlu2 %1058 }
 0x236   : > { %v1178_v63 = vmul.f32 %v3555_v11, %v1162_v59  ;;  %v1179_v0 = vmul.f32 %v3557_v12, %v1166_v62  ;;  %v970_v1 = vsel %vm451_vm5, %v957_v33, %v965_v39  ;;  %v974_v2 = vsel %vm451_vm5, %v965_v39, %v957_v33  ;;  %v930_v59 = vld [vmem:[%s4363_s0] sm:$0x3]  ;;  %v2969_v62 = vld [vmem:[#allocation2 + $0xe4] sm:$0xf0] }
 0x237   : > { %v986_v3 = vmul.f32 %v3493_v35, %v974_v2  ;;  %v987_v4 = vmul.f32 %v3495_v36, %v970_v1 }
 0x238   : > { %v1184_v5 = vpack.c.bf16 %v1179_v0, %v1178_v63  ;;  %v2654_v0 = vld [vmem:[#allocation2 + $0x50] sm:$0xf] }
 0x239   : > { %v992_v13 = vpack.c.bf16 %v987_v4, %v986_v3  ;;  %v2670_v31 = vld [vmem:[#allocation2 + $0x70] sm:$0xf]  ;;  %v2954_v32 = vld [vmem:[#allocation2 + $0x74] sm:$0xf] }
 0x23a   : > { %1188 = vst [vmem:[#allocation2 + $0xd0] sm:$0xff] %v1184_v5  ;;  %v2734_v1 = vld [vmem:[#allocation2 + $0xf0] sm:$0xf]  ;;  %v2950_v5 = vld [vmem:[#allocation2 + $0x54] sm:$0xf] }
 0x23b   : > { %996 = vst [vmem:[#allocation2 + $0x30] sm:$0xff] %v992_v13 }
 0x23c   : > { %v1005_v14 = vpop.permute.xlu1 %1004 }
 0x23d   : > { %v1051_v61 = vpop.permute.xlu0 %1050  ;;  %v1159_v23 = vpop.permute.xlu2 %1158 }
 0x23e   : > { %v1063_v15 = vsel %vm507_vm3, %v1051_v61, %v1059_v18  ;;  %v1067_v17 = vsel %vm507_vm3, %v1059_v18, %v1051_v61  ;;  %v3728_v18 = vperm.slane %v930_v59, 0 }
 0x23f   : > { %v1080_v19 = vmul.f32 %v3521_v51, %v1067_v17  ;;  %v1081_v20 = vmul.f32 %v3523_v52, %v1063_v15  ;;  %v2949_v15 = vld [vmem:[#allocation2 + $0x44] sm:$0xf0]  ;;  %v2726_v17 = vld [vmem:[#allocation2 + $0xe0] sm:$0xf] }
 0x241   : > { %v1085_v54 = vpack.c.bf16 %v1081_v20, %v1080_v19  ;;  %v2648_v19 = vld [vmem:[#allocation2 + $0x48] sm:$0xf0] }
 0x243   : > { %1089 = vst [vmem:[#allocation2 + $0x78] sm:$0xff] %v1085_v54 }
 0x244   : > { %v1105_v22 = vpop.permute.xlu1 %1104 }
 0x245   : > { %v1151_v26 = vpop.permute.xlu0 %1150  ;;  %v3713_v53 = vpop.permute.xlu2 %912 }
 0x246   : > { %v1163_v27 = vsel %vm567_vm1, %v1151_v26, %v1159_v23  ;;  %v1167_v28 = vsel %vm567_vm1, %v1159_v23, %v1151_v26  ;;  %v2727_v23 = vor.u32 %v2969_v62, %v2726_v17  ;;  %v2945_v62 = vld [vmem:[#allocation2 + $0x24] sm:$0xf0] }
 0x247   : > { %v1180_v29 = vmul.f32 %v3555_v11, %v1163_v27  ;;  %v1181_v30 = vmul.f32 %v3557_v12, %v1167_v28 }
 0x249   : > { %v1185_v21 = vpack.c.bf16 %v1181_v30, %v1180_v29  ;;  %v2646_v30 = vld [vmem:[#allocation2 + $0x40] sm:$0xf] }
 0x24a   : > { %v2955_v51 = vld [vmem:[#allocation2 + $0x74] sm:$0xf0]  ;;  %v2672_v52 = vld [vmem:[#allocation2 + $0x78] sm:$0xf0] }
 0x24b   : > { %1189 = vst [vmem:[#allocation2 + $0xd8] sm:$0xff] %v1185_v21  ;;  %v2671_v33 = vor.u32 %v2955_v51, %v2670_v31  ;;  %v2675_v34 = vor.u32 %v2954_v32, %v2672_v52  ;;  %v2948_v21 = vld [vmem:[#allocation2 + $0x44] sm:$0xf]  ;;  %v2647_v51 = vor.u32 %v2949_v15, %v2646_v30 }
 0x24c   : > { %v1205_v38 = vpop.permute.xlu1 %1204  ;;  %v2651_v32 = vor.u32 %v2948_v21, %v2648_v19 }
 0x24d   : > { %v1209_v6 = vsel %vm595_vm0, %v1197_v43, %v1205_v38  ;;  %v1213_v44 = vsel %vm595_vm0, %v1205_v38, %v1197_v43  ;;  %v1013_v11 = vpop.permute.xlu0 %1012  ;;  %1567 = vmatpush.bf16.msrb.mxu1 %v2671_v33  ;;  %1624 = vmatpush.bf16.msrb.mxu2 %v2675_v34  ;;  %v3726_v39 = vpop.permute.xlu2 %906  ;;  %v2965_v38 = vld [vmem:[#allocation2 + $0xc4] sm:$0xf0] }
 0x24e   : > { %v1226_v12 = vmul.f32 %v3474_v24, %v1209_v6  ;;  %v1227_v45 = vmul.f32 %v3476_v25, %v1213_v44  ;;  %v1017_v47 = vsel %vm479_vm4, %v1005_v14, %v1013_v11  ;;  %v1021_v16 = vsel %vm479_vm4, %v1013_v11, %v1005_v14  ;;  %v2710_v6 = vld [vmem:[#allocation2 + $0xc0] sm:$0xf] }
 0x24f   : > { %v1034_v55 = vmul.f32 %v3515_v49, %v1021_v16  ;;  %v1035_v43 = vmul.f32 %v3517_v50, %v1017_v47 }
 0x250   : > { %v1231_v60 = vpack.c.bf16 %v1227_v45, %v1226_v12  ;;  %v2711_v45 = vor.u32 %v2965_v38, %v2710_v6 }
 0x251   : > { %v1039_v24 = vpack.c.bf16 %v1035_v43, %v1034_v55  ;;  %1568 = vmatpush.bf16.msrb.mxu1 %v2663_v56  ;;  %1625 = vmatpush.bf16.msrb.mxu2 %v2667_v37 }
 0x252   : > { %1235 = vst [vmem:[#allocation2 + $0xf8] sm:$0xff] %v1231_v60  ;;  %v2967_v52 = vld [vmem:[#allocation2 + $0xd4] sm:$0xf0]  ;;  %v2638_v60 = vld [vmem:[#allocation2 + $0x30] sm:$0xf] }
 0x253   : > { %1043 = vst [vmem:[#allocation2 + $0x58] sm:$0xff] %v1039_v24  ;;  %v2702_v24 = vld [vmem:[#allocation2 + $0xb0] sm:$0xf] }
 0x254   : > { %v911_v25 = vpop.permute.xlu1 %910 }
 0x255   : > { %v1113_v57 = vpop.permute.xlu0 %1112  ;;  %v917_v40 = vpop.permute.xlu2 %916 }
 0x256   : > { %v1117_v46 = vsel %vm539_vm2, %v1105_v22, %v1113_v57  ;;  %v1121_v42 = vsel %vm539_vm2, %v1113_v57, %v1105_v22 }
 0x257   : > { %v1134_v49 = vmul.f32 %v3549_v8, %v1117_v46  ;;  %v1135_v50 = vmul.f32 %v3551_v9, %v1121_v42  ;;  %v3730_v8 = vperm.slane %v930_v59, 1  ;;  %v2946_v46 = vld [vmem:[#allocation2 + $0x34] sm:$0xf] }
 0x259   : > { %v1139_v63 = vpack.c.bf16 %v1135_v50, %v1134_v49  ;;  %v2971_v2 = vld [vmem:[#allocation2 + $0xf4] sm:$0xf0] }
 0x25a   : > { %v2951_v3 = vld [vmem:[#allocation2 + $0x54] sm:$0xf0]  ;;  %v2735_v4 = vor.u32 %v2971_v2, %v2734_v1  ;;  %v2656_v13 = vld [vmem:[#allocation2 + $0x58] sm:$0xf0] }
 0x25b   : > { %1143 = vst [vmem:[#allocation2 + $0xb8] sm:$0xff] %v1139_v63  ;;  %v2655_v9 = vor.u32 %v2951_v3, %v2654_v0  ;;  %v2659_v14 = vor.u32 %v2950_v5, %v2656_v13  ;;  %v2961_v63 = vld [vmem:[#allocation2 + $0xa4] sm:$0xf0]  ;;  %v2630_v3 = vld [vmem:[#allocation2 + $0x20] sm:$0xf] }
 0x25c   : > { %v967_v61 = vpop.permute.xlu1 %966  ;;  %1586 = vmatpush.bf16.msrb.mxu3 %v2735_v4  ;;  %v2694_v4 = vld [vmem:[#allocation2 + $0xa0] sm:$0xf]  ;;  %v2632_v5 = vld [vmem:[#allocation2 + $0x28] sm:$0xf0]  ;;  %v2631_v15 = vor.u32 %v2945_v62, %v2630_v3  ;;  %v2968_v62 = vld [vmem:[#allocation2 + $0xe4] sm:$0xf] }
 0x25d   : > { %v971_v20 = vsel %vm451_vm5, %v3675_v58, %v967_v61  ;;  %v975_v54 = vsel %vm451_vm5, %v967_v61, %v3675_v58  ;;  %v919_v22 = vpop.permute.xlu0 %918  ;;  %1569 = vmatpush.bf16.msrb.mxu1 %v2655_v9  ;;  %1626 = vmatpush.bf16.msrb.mxu2 %v2659_v14  ;;  %v1249_v13 = vpop.permute.xlu2 %1248  ;;  %v2695_v17 = vor.u32 %v2961_v63, %v2694_v4 }
 0x25e   : > { %v988_v26 = vmul.f32 %v3493_v35, %v975_v54  ;;  %v989_v27 = vmul.f32 %v3495_v36, %v971_v20  ;;  %v924_v28 = vsel %vm424_vm6, %v911_v25, %v919_v22  ;;  %v928_v29 = vsel %vm424_vm6, %v919_v22, %v911_v25  ;;  %v2718_v36 = vld [vmem:[#allocation2 + $0xd0] sm:$0xf] }
 0x25f   : > { %v940_v31 = vmul.f32 %v3728_v18, %v928_v29  ;;  %v941_v58 = vmul.f32 %v3730_v8, %v924_v28  ;;  %v2719_v34 = vor.u32 %v2967_v52, %v2718_v36  ;;  %v2959_v28 = vld [vmem:[#allocation2 + $0x94] sm:$0xf0]  ;;  %v2976_v36 = vld [vmem:[%s4369_s6 + $0x4] sm:$0xf] }
 0x260   : > { %v993_v33 = vpack.c.bf16 %v989_v27, %v988_v26  ;;  %1587 = vmatpush.bf16.msrb.mxu3 %v2727_v23  ;;  %v2944_v23 = vld [vmem:[#allocation2 + $0x24] sm:$0xf] }
 0x261   : > { %v946_v35 = vpack.c.bf16 %v941_v58, %v940_v31  ;;  %1570 = vmatpush.bf16.msrb.mxu1 %v2647_v51  ;;  %1627 = vmatpush.bf16.msrb.mxu2 %v2651_v32 }
 0x262   : > { %997 = vst [vmem:[#allocation2 + $0x38] sm:$0xff] %v993_v33  ;;  %v2963_v56 = vld [vmem:[#allocation2 + $0xb4] sm:$0xf0]  ;;  %v2957_v33 = vld [vmem:[#allocation2 + $0x84] sm:$0xf0] }
 0x263   : > { %950 = vst [vmem:[#allocation2 + $0x10] sm:$0xff] %v946_v35  ;;  %v2703_v50 = vor.u32 %v2963_v56, %v2702_v24  ;;  %v2970_v24 = vld [vmem:[#allocation2 + $0xf4] sm:$0xf] }
 0x264   : > { %v921_v41 = vpop.permute.xlu1 %920  ;;  %1588 = vmatpush.bf16.msrb.mxu3 %v2719_v34  ;;  %v2592_v34 = vld [vmem:[%s4369_s6 + $0xc] sm:$0xf0] }
 0x265   : > { %v925_v44 = vsel %vm424_vm6, %v3713_v53, %v921_v41  ;;  %v929_v11 = vsel %vm424_vm6, %v921_v41, %v3713_v53  ;;  %v909_v12 = vpop.permute.xlu0 %908  ;;  %v2587_v53 = vld [vmem:[%s4363_s0 + $0x10] sm:$0x3] }
 0x266   : > { %v942_v47 = vmul.f32 %v3728_v18, %v929_v11  ;;  %v943_v16 = vmul.f32 %v3730_v8, %v925_v44  ;;  %v923_v48 = vsel %vm424_vm6, %v909_v12, %v917_v40  ;;  %v927_v10 = vsel %vm424_vm6, %v917_v40, %v909_v12  ;;  %v2678_v40 = vld [vmem:[#allocation2 + $0x80] sm:$0xf] }
 0x267   : > { %v938_v55 = vmul.f32 %v3728_v18, %v927_v10  ;;  %v939_v43 = vmul.f32 %v3730_v8, %v923_v48  ;;  %v3763_v0 = vperm.slane %v2587_v53, 0  ;;  %v3765_v1 = vperm.slane %v2587_v53, 1  ;;  %v2590_v48 = vld [vmem:[%s4369_s6] sm:$0xf]  ;;  %v2977_v10 = vld [vmem:[%s4369_s6 + $0x8] sm:$0xf0] }
 0x268   : > { %v947_v37 = vpack.c.bf16 %v943_v16, %v942_v47  ;;  %1589 = vmatpush.bf16.msrb.mxu3 %v2711_v45  ;;  %v2679_v44 = vor.u32 %v2957_v33, %v2678_v40  ;;  %v3793_v45 = vor.u32 %v2976_v36, %v2592_v34  ;;  %v2736_v47 = vld [vmem:[#allocation2 + $0xf8] sm:$0xf0]  ;;  %v2696_v33 = vld [vmem:[#allocation2 + $0xa8] sm:$0xf0]  ;;  %v2598_v40 = vld [vmem:[%s4369_s6 + $0x8] sm:$0xf] }
 0x269   : > { %v945_v25 = vpack.c.bf16 %v939_v43, %v938_v55  ;;  %v2947_v57 = vld [vmem:[#allocation2 + $0x34] sm:$0xf0]  ;;  %v2640_v42 = vld [vmem:[#allocation2 + $0x38] sm:$0xf0] }
 0x26a   : > { %951 = vst [vmem:[#allocation2 + $0x18] sm:$0xff] %v947_v37  ;;  %v2639_v49 = vor.u32 %v2947_v57, %v2638_v60  ;;  %v2643_v59 = vor.u32 %v2946_v46, %v2640_v42  ;;  %v2622_v30 = vld [vmem:[#allocation2 + $0x10] sm:$0xf]  ;;  %v2942_v31 = vld [vmem:[#allocation2 + $0x14] sm:$0xf]  ;;  %v2591_v57 = vor.u32 %v2977_v10, %v2590_v48 }
 0x26b   : > { %949 = vst [vmem:[#allocation2 + $0x8] sm:$0xff] %v945_v25  ;;  %v2739_v25 = vor.u32 %v2970_v24, %v2736_v47  ;;  %v2728_v42 = vld [vmem:[#allocation2 + $0xe8] sm:$0xf0]  ;;  %v2688_v36 = vld [vmem:[#allocation2 + $0x98] sm:$0xf0] }
 0x26c   : > { %v915_v2 = vpop.permute.xlu1 %914  ;;  %1571 = vmatpush.bf16.msrb.mxu1 %v2639_v49  ;;  %1590 = vmatpush.bf16.msrb.mxu3 %v2703_v50  ;;  %v2731_v3 = vor.u32 %v2968_v62, %v2728_v42 }
 0x26d   : > { %v922_v9 = vsel %vm424_vm6, %v3726_v39, %v915_v2  ;;  %v926_v14 = vsel %vm424_vm6, %v915_v2, %v3726_v39  ;;  %v1241_v61 = vpop.permute.xlu0 %1240  ;;  %1628 = vmatpush.bf16.msrb.mxu2 %v2643_v59  ;;  %v2635_v39 = vor.u32 %v2944_v23, %v2632_v5  ;;  %v2979_v23 = vld [vmem:[%s4369_s6 + $0x1c] sm:$0xf] }
 0x26e   : > { %v936_v19 = vmul.f32 %v3728_v18, %v926_v14  ;;  %v937_v20 = vmul.f32 %v3730_v8, %v922_v9  ;;  %v1254_v54 = vsel %vm623_vm7, %v1241_v61, %v1249_v13  ;;  %v1258_v22 = vsel %vm623_vm7, %v1249_v13, %v1241_v61  ;;  %v2686_v18 = vld [vmem:[#allocation2 + $0x90] sm:$0xf]  ;;  %v2720_v13 = vld [vmem:[#allocation2 + $0xd8] sm:$0xf0] }
 0x26f   : > { %v1270_v26 = vmul.f32 %v3763_v0, %v1254_v54  ;;  %v1271_v27 = vmul.f32 %v3765_v1, %v1258_v22  ;;  %v2687_v32 = vor.u32 %v2959_v28, %v2686_v18  ;;  %v2712_v28 = vld [vmem:[#allocation2 + $0xc8] sm:$0xf0]  ;;  %v2964_v18 = vld [vmem:[#allocation2 + $0xc4] sm:$0xf] }
 0x270   : > { %v944_v29 = vpack.c.bf16 %v937_v20, %v936_v19  ;;  %1572 = vmatpush.bf16.msrb.mxu1 %v2631_v15  ;;  %1591 = vmatpush.bf16.msrb.mxu3 %v2695_v17  ;;  %v2966_v19 = vld [vmem:[#allocation2 + $0xd4] sm:$0xf]  ;;  %v1239_v20 = vpop.permute.xlu2 %1238 }
 0x271   : > { %v1276_v21 = vpack.c.bf16 %v1271_v27, %v1270_v26  ;;  %1629 = vmatpush.bf16.msrb.mxu2 %v2635_v39  ;;  %v2943_v8 = vld [vmem:[#allocation2 + $0x14] sm:$0xf0]  ;;  %v2624_v58 = vld [vmem:[#allocation2 + $0x18] sm:$0xf0]  ;;  %v2723_v22 = vor.u32 %v2966_v19, %v2720_v13  ;;  %v2604_v26 = vld [vmem:[%s4369_s6 + $0x24] sm:$0xf0] }
 0x272   : > { %948 = vst [vmem:[#allocation2] sm:$0xff] %v944_v29  ;;  %v2623_v51 = vor.u32 %v2943_v8, %v2622_v30  ;;  %v2627_v52 = vor.u32 %v2942_v31, %v2624_v58  ;;  %v2941_v16 = vld [vmem:[#allocation2 + $0x4] sm:$0xf0]  ;;  %v2616_v37 = vld [vmem:[#allocation2 + $0x8] sm:$0xf0]  ;;  %v2715_v31 = vor.u32 %v2964_v18, %v2712_v28 }
 0x273   : > { %1280 = vst [vmem:[#allocation2 + $0x110] sm:$0xff] %v1276_v21  ;;  %v2607_v21 = vor.u32 %v2979_v23, %v2604_v26  ;;  %v2602_v58 = vld [vmem:[%s4369_s6 + $0x18] sm:$0xf] }
 0x274   : > { %v1243_v35 = vpop.permute.xlu1 %1242  ;;  %1573 = vmatpush.bf16.msrb.mxu1 %v2623_v51  ;;  %1592 = vmatpush.bf16.msrb.mxu3 %v2687_v32  ;;  %v2980_v51 = vld [vmem:[%s4369_s6 + $0x20] sm:$0xf0]  ;;  %v2704_v32 = vld [vmem:[#allocation2 + $0xb8] sm:$0xf0] }
 0x275   : > { %v1251_v38 = vpop.permute.xlu0 %1250  ;;  %1630 = vmatpush.bf16.msrb.mxu2 %v2627_v52  ;;  %v2603_v52 = vor.u32 %v2980_v51, %v2602_v58 }
 0x276   : > { %v1255_v41 = vsel %vm623_vm7, %v1243_v35, %v1251_v38  ;;  %v1259_v6 = vsel %vm623_vm7, %v1251_v38, %v1243_v35  ;;  %v2960_v35 = vld [vmem:[#allocation2 + $0xa4] sm:$0xf] }
 0x277   : > { %v1272_v11 = vmul.f32 %v3763_v0, %v1255_v41  ;;  %v1273_v12 = vmul.f32 %v3765_v1, %v1259_v6  ;;  %v2699_v34 = vor.u32 %v2960_v35, %v2696_v33  ;;  %v2978_v41 = vld [vmem:[%s4369_s6 + $0x10] sm:$0xf0] }
 0x278   : > { %1593 = vmatpush.bf16.msrb.mxu3 %v2679_v44  ;;  %v2599_v48 = vor.u32 %v2978_v41, %v2598_v40  ;;  %v1343_v42 = vpop.permute.xlu2 %1342 }
 0x279   : > { %v1277_v55 = vpack.c.bf16 %v1273_v12, %v1272_v11  ;;  %v2614_v43 = vld [vmem:[#allocation2] sm:$0xf]  ;;  %v2940_v56 = vld [vmem:[#allocation2 + $0x4] sm:$0xf] }
 0x27a   : > { %v2615_v53 = vor.u32 %v2941_v16, %v2614_v43  ;;  %v2619_v60 = vor.u32 %v2940_v56, %v2616_v37  ;;  %v2750_v5 = vld [vmem:[#allocation2 + $0x110] sm:$0xf]  ;;  %v2974_v14 = vld [vmem:[#allocation2 + $0x114] sm:$0xf]  ;;  %v2956_v43 = vld [vmem:[#allocation2 + $0x84] sm:$0xf] }
 0x27b   : > { %1281 = vst [vmem:[#allocation2 + $0x118] sm:$0xff] %v1277_v55  ;;  %1594 = vmatmul.bf16.vlgmr.msrb.gmra.mxu3 %v3793_v45  ;;  %v2958_v16 = vld [vmem:[#allocation2 + $0x94] sm:$0xf]  ;;  %v2680_v55 = vld [vmem:[#allocation2 + $0x88] sm:$0xf0] }
 0x27c   : > { %v1237_v46 = vpop.permute.xlu1 %1236  ;;  %1574 = vmatpush.bf16.msrb.mxu1 %v2615_v53  ;;  %1631 = vmatpush.bf16.msrb.mxu2 %v2619_v60  ;;  %v2691_v10 = vor.u32 %v2958_v16, %v2688_v36  ;;  %v2683_v56 = vor.u32 %v2956_v43, %v2680_v55  ;;  %v2610_v37 = vld [vmem:[%s4369_s6 + $0x20] sm:$0xf]  ;;  %v2981_v53 = vld [vmem:[%s4369_s6 + $0x28] sm:$0xf0] }
 0x27d   : > { %v1245_v49 = vpop.permute.xlu0 %1244  ;;  %v2611_v60 = vor.u32 %v2981_v53, %v2610_v37 }
 0x27e   : > { %v1252_v50 = vsel %vm623_vm7, %v1237_v46, %v1245_v49  ;;  %v1256_v59 = vsel %vm623_vm7, %v1245_v49, %v1237_v46 }
 0x27f   : > { %v1266_v63 = vmul.f32 %v3763_v0, %v1252_v50  ;;  %v1267_v2 = vmul.f32 %v3765_v1, %v1256_v59  ;;  %1575 = vmatmul.bf16.vlgmr.msrb.gmra.mxu1 %v2591_v57  ;;  %1632 = vmatmul.bf16.vlgmr.msrb.gmra.mxu2 %v2591_v57 }
 0x280   : > { %1643 = vmatpush.bf16.msra.mxu1 %v2739_v25  ;;  %v1338_v13 = vpop.permute.xlu2 %1337 }
 0x281   : > { %v1274_v4 = vpack.c.bf16 %v1267_v2, %v1266_v63 }
 0x282   : > { %v2975_v9 = vld [vmem:[#allocation2 + $0x114] sm:$0xf0]  ;;  %v2752_v61 = vld [vmem:[#allocation2 + $0x118] sm:$0xf0] }
 0x283   : > { %1278 = vst [vmem:[#allocation2 + $0x100] sm:$0xff] %v1274_v4  ;;  %v2751_v15 = vor.u32 %v2975_v9, %v2750_v5  ;;  %v2755_v17 = vor.u32 %v2974_v14, %v2752_v61  ;;  %v3843_v4 = vstv %s1681_s15 }
 0x284   : > { %1644 = vmatpush.bf16.msra.mxu1 %v2731_v3  ;;  %v1247_v54 = vpop.permute.xlu1 %1246 }
 0x285   : > { %v1253_v27 = vsel %vm623_vm7, %v1239_v20, %v1247_v54  ;;  %v1257_v39 = vsel %vm623_vm7, %v1247_v54, %v1239_v20  ;;  %1611 = vmatpush.bf16.msrb.mxu0 %v2751_v15  ;;  %1668 = vmatpush.bf16.msra.mxu3 %v2755_v17  ;;  %v1348_v40 = vpop.permute.xlu0 %1347 }
 0x286   : > { %v1268_v29 = vmul.f32 %v3763_v0, %v1253_v27  ;;  %v1269_v30 = vmul.f32 %v3765_v1, %v1257_v39  ;;  %v2962_v0 = vld [vmem:[#allocation2 + $0xb4] sm:$0xf] }
 0x287   : > { %v2707_v1 = vor.u32 %v2962_v0, %v2704_v32 }
 0x288   : > { %1645 = vmatpush.bf16.msra.mxu1 %v2723_v22  ;;  %v1275_v8 = vpack.c.bf16 %v1269_v30, %v1268_v29 }
 0x28a   : > { %1279 = vst [vmem:[#allocation2 + $0x108] sm:$0xff] %v1275_v8  ;;  %v2742_v38 = vld [vmem:[#allocation2 + $0x100] sm:$0xf]  ;;  %v2972_v44 = vld [vmem:[#allocation2 + $0x104] sm:$0xf] }
 0x28b   : > { %1599 = vmatmul.bf16.gmra.mxu3 %v2607_v21 }
 0x28c   : > { %1646 = vmatpush.bf16.msra.mxu1 %v2715_v31  ;;  %v1333_v49 = vpop.permute.xlu1 %1332 }
 0x28f   : > { %1580 = vmatmul.bf16.gmra.mxu1 %v2603_v52  ;;  %1637 = vmatmul.bf16.gmra.mxu2 %v2603_v52 }
 0x290   : > { %1647 = vmatpush.bf16.msra.mxu1 %v2707_v1 }
 0x291   : > { %v2973_v6 = vld [vmem:[#allocation2 + $0x104] sm:$0xf0]  ;;  %v2744_v11 = vld [vmem:[#allocation2 + $0x108] sm:$0xf0] }
 0x292   : > { %v2743_v12 = vor.u32 %v2973_v6, %v2742_v38  ;;  %v2747_v47 = vor.u32 %v2972_v44, %v2744_v11 }
 0x294   : > { %1648 = vmatpush.bf16.msra.mxu1 %v2699_v34  ;;  %1612 = vmatpush.bf16.msrb.mxu0 %v2743_v12 }
 0x295   : > { %1669 = vmatpush.bf16.msra.mxu3 %v2747_v47 }
 0x297   : > { %2756 = vmatmul.msk.bf16.vlgmr.msrb.gmra.mxu0 %vm1560_vm9, %v2599_v48 }
 0x298   : > { %1649 = vmatpush.bf16.msra.mxu1 %v2691_v10 }
 0x29b   : > { %2758 = vmatmul.msk.bf16.vlgmr.msra.gmra.mxu3 %vm1560_vm9, %v2599_v48 }
 0x29c   : > { %1650 = vmatpush.bf16.msra.mxu1 %v2683_v56 }
 0x29f   : > { %1651 = vmatmul.bf16.vlgmr.msra.gmra.mxu1 %v3793_v45 }
 0x2a7   : > { %2757 = vmatmul.msk.bf16.gmra.mxu0 %vm1560_vm9, %v2611_v60 }
 0x2ab   : > { %2759 = vmatmul.msk.bf16.gmra.mxu3 %vm1560_vm9, %v2611_v60 }
 0x2af   : > { %1656 = vmatmul.bf16.gmra.mxu1 %v2607_v21 }
 0x2fc   : > { %v1576_v24 = vpop.f32.mrf.mxu1 }
 0x2fd   : > { %v1577_v59 = vadd.f32 %v1576_v24, %v1333_v49 }
 0x2fe   : > { %v1595_v25 = vpop.f32.mrf.mxu3 }
 0x2ff   : > { %v1596_v63 = vadd.f32 %v1595_v25, %v1577_v59 }
 0x302   : > { %v1633_v62 = vpop.f32.mrf.mxu2 }
 0x303   : > { %v1634_v17 = vadd.f32 %v1633_v62, %v1333_v49 }
 0x304   : > { %v1578_v57 = vpop.f32.mrf.mxu1 }
 0x305   : > { %v1579_v14 = vadd.f32 %v1578_v57, %v1338_v13 }
 0x306   : > { %v1597_v46 = vpop.f32.mrf.mxu3 }
 0x307   : > { %v1598_v19 = vadd.f32 %v1597_v46, %v1579_v14 }
 0x30a   : > { %v1635_v20 = vpop.f32.mrf.mxu2 }
 0x30b   : > { %v1636_v18 = vadd.f32 %v1635_v20, %v1338_v13 }
 0x30c   : > { %v1581_v45 = vpop.f32.mrf.mxu1 }
 0x30d   : > { %v1582_v8 = vadd.f32 %v1581_v45, %v1343_v42 }
 0x30e   : > { %v1600_v50 = vpop.f32.mrf.mxu3 }
 0x30f   : > { %v1601_v33 = vadd.f32 %v1600_v50, %v1582_v8 }
 0x312   : > { %v1638_v51 = vpop.f32.mrf.mxu2 }
 0x313   : > { %v1639_v34 = vadd.f32 %v1638_v51, %v1343_v42 }
 0x314   : > { %v1583_v2 = vpop.f32.mrf.mxu1  ;;  %v1614_v3 = vpop.f32.mrf.mxu0 }
 0x315   : > { %v1615_v5 = vadd.f32 %v1614_v3, %v1596_v63  ;;  %v1584_v44 = vadd.f32 %v1583_v2, %v1348_v40 }
 0x316   : > { %v1602_v9 = vpop.f32.mrf.mxu3 }
 0x317   : > { %vm1682_vm10 = vcmp.ge.f32.partialorder %v1615_v5, 0.0  ;;  %v1691_v61 = vmul.f32 %v3843_v4, %v1615_v5  ;;  %v1603_v55 = vadd.f32 %v1602_v9, %v1584_v44 }
 0x319   : > { %v3846_v15 = vsel %vm1682_vm10, %v1615_v5, %v1691_v61 }
 0x31a   : > { %1899 = vrot.lane.b32.xlu0 %v3846_v15, %s3048_s27  ;;  %1945 = vrot.lane.b32.xlu2 %v3846_v15, %s3047_s26  ;;  %v1640_v48 = vpop.f32.mrf.mxu2 }
 0x31b   : > { %1991 = vrot.lane.b32.xlu1 %v3846_v15, %s3046_s25  ;;  %v1641_v37 = vadd.f32 %v1640_v48, %v1348_v40 }
 0x31c   : > { %v1616_v54 = vpop.f32.mrf.mxu0  ;;  %v1652_v22 = vpop.f32.mrf.mxu1 }
 0x31d   : > { %v1617_v23 = vadd.f32 %v1616_v54, %v1598_v19  ;;  %v1653_v26 = vadd.f32 %v1652_v22, %v1634_v17 }
 0x31e   : > { %v1671_v27 = vpop.f32.mrf.mxu3 }
 0x31f   : > { %vm1684_vm11 = vcmp.ge.f32.partialorder %v1617_v23, 0.0  ;;  %v1693_v39 = vmul.f32 %v3843_v4, %v1617_v23  ;;  %v1672_v28 = vadd.f32 %v1671_v27, %v1653_v26 }
 0x321   : > { %v3855_v29 = vsel %vm1684_vm11, %v1617_v23, %v1693_v39  ;;  %vm1683_vm12 = vcmp.ge.f32.partialorder %v1672_v28, 0.0  ;;  %v1692_v30 = vmul.f32 %v3843_v4, %v1672_v28 }
 0x322   : > { %1947 = vrot.lane.b32.xlu0 %v3855_v29, %s3047_s26  ;;  %1799 = vrot.lane.b32.xlu2 %v3846_v15, %s3050_s29 }
 0x323   : > { %v3862_v21 = vsel %vm1683_vm12, %v1672_v28, %v1692_v30  ;;  %1845 = vrot.lane.b32.xlu1 %v3846_v15, %s3049_s28  ;;  %v2763_v28 = vld [vmem:[%s4363_s0 + $0xa] sm:$0x3] }
 0x324   : > { %v1891_v31 = vpack.c.bf16 %v3862_v21, %v3846_v15  ;;  %v1654_v58 = vpop.f32.mrf.mxu1  ;;  %v1619_v0 = vpop.f32.mrf.mxu0  ;;  %v4015_v30 = vperm.slane %v2763_v28, 0 }
 0x325   : > { %v1655_v32 = vadd.f32 %v1654_v58, %v1636_v18  ;;  %v1620_v36 = vadd.f32 %v1619_v0, %v1601_v33  ;;  %v4017_v18 = vperm.slane %v2763_v28, 1 }
 0x326   : > { %1895 = vst [vmem:[#allocation2 + $0x80] sm:$0xff] %v1891_v31  ;;  %v1673_v52 = vpop.f32.mrf.mxu3 }
 0x327   : > { %v1674_v1 = vadd.f32 %v1673_v52, %v1655_v32  ;;  %v1695_v12 = vmul.f32 %v3843_v4, %v1620_v36  ;;  %vm1686_vm14 = vcmp.ge.f32.partialorder %v1620_v36, 0.0 }
 0x329   : > { %vm1685_vm13 = vcmp.ge.f32.partialorder %v1674_v1, 0.0  ;;  %v1694_v35 = vmul.f32 %v3843_v4, %v1674_v1  ;;  %v3881_v56 = vsel %vm1686_vm14, %v1620_v36, %v1695_v12  ;;  %v2121_v12 = vld [vmem:[%s4373_s10] sm:$0xff] }
 0x32a   : > { %1801 = vrot.lane.b32.xlu0 %v3855_v29, %s3050_s29  ;;  %1753 = vrot.lane.b32.xlu2 %v3846_v15, %s3051_s30 }
 0x32b   : > { %v3873_v38 = vsel %vm1685_vm13, %v1674_v1, %v1694_v35  ;;  %1901 = vrot.lane.b32.xlu1 %v3855_v29, %s3048_s27  ;;  %v2764_v1 = vld [vmem:[%s4363_s0 + $0xc] sm:$0x3] }
 0x32c   : > { %v1892_v41 = vpack.c.bf16 %v3873_v38, %v3855_v29  ;;  %v1657_v6 = vpop.f32.mrf.mxu1  ;;  %v1621_v10 = vpop.f32.mrf.mxu0  ;;  %v4038_v35 = vperm.slane %v2764_v1, 0  ;;  %v4040_v36 = vperm.slane %v2764_v1, 1 }
 0x32d   : > { %v1658_v11 = vadd.f32 %v1657_v6, %v1639_v34  ;;  %v1622_v53 = vadd.f32 %v1621_v10, %v1603_v55 }
 0x32e   : > { %1896 = vst [vmem:[#allocation2 + $0x88] sm:$0xff] %v1892_v41  ;;  %v1676_v47 = vpop.f32.mrf.mxu3 }
 0x32f   : > { %v1677_v16 = vadd.f32 %v1676_v47, %v1658_v11  ;;  %v1697_v42 = vmul.f32 %v3843_v4, %v1622_v53  ;;  %vm1688_vm8 = vcmp.ge.f32.partialorder %v1622_v53, 0.0  ;;  %v2761_v11 = vld [vmem:[%s4363_s0 + $0x4] sm:$0x3] }
 0x330   : > { %v4062_v47 = vperm.slane %v2761_v11, 0 }
 0x331   : > { %vm1687_vm15 = vcmp.ge.f32.partialorder %v1677_v16, 0.0  ;;  %v1696_v43 = vmul.f32 %v3843_v4, %v1677_v16  ;;  %v1705_v50 = vsel %vm1688_vm8, %v1622_v53, %v1697_v42  ;;  %v2760_v53 = vld [vmem:[%s4363_s0 + $0x2] sm:$0x3] }
 0x332   : > { %1755 = vrot.lane.b32.xlu0 %v3855_v29, %s3051_s30  ;;  %1993 = vrot.lane.b32.xlu2 %v3855_v29, %s3046_s25 }
 0x333   : > { %v3887_v60 = vsel %vm1687_vm15, %v1677_v16, %v1696_v43  ;;  %1903 = vrot.lane.b32.xlu1 %v3881_v56, %s3048_s27  ;;  %v4064_v16 = vperm.slane %v2761_v11, 1  ;;  %v2762_v11 = vld [vmem:[%s4363_s0 + $0x6] sm:$0x3] }
 0x334   : > { %v1893_v24 = vpack.c.bf16 %v3887_v60, %v3881_v56  ;;  %v1659_v25 = vpop.f32.mrf.mxu1 }
 0x335   : > { %v1660_v57 = vadd.f32 %v1659_v25, %v1641_v37  ;;  %v4081_v25 = vperm.slane %v2760_v53, 1 }
 0x336   : > { %1897 = vst [vmem:[#allocation2 + $0x90] sm:$0xff] %v1893_v24  ;;  %v1678_v46 = vpop.f32.mrf.mxu3  ;;  %v4079_v24 = vperm.slane %v2760_v53, 0 }
 0x337   : > { %v1679_v45 = vadd.f32 %v1678_v46, %v1660_v57 }
 0x339   : > { %vm1689_vm10 = vcmp.ge.f32.partialorder %v1679_v45, 0.0  ;;  %v1698_v49 = vmul.f32 %v3843_v4, %v1679_v45 }
 0x33a   : > { %1995 = vrot.lane.b32.xlu0 %v3881_v56, %s3046_s25  ;;  %1847 = vrot.lane.b32.xlu2 %v3855_v29, %s3049_s28 }
 0x33b   : > { %v3899_v59 = vsel %vm1689_vm10, %v1679_v45, %v1698_v49  ;;  %1757 = vrot.lane.b32.xlu1 %v3881_v56, %s3051_s30 }
 0x33c   : > { %v1894_v62 = vpack.c.bf16 %v3899_v59, %v1705_v50 }
 0x33e   : > { %1898 = vst [vmem:[#allocation2 + $0x98] sm:$0xff] %v1894_v62  ;;  %v2765_v62 = vld [vmem:[%s4363_s0 + $0xe] sm:$0x3] }
 0x342   : > { %1949 = vrot.lane.b32.xlu0 %v3881_v56, %s3047_s26  ;;  %1849 = vrot.lane.b32.xlu2 %v3881_v56, %s3049_s28 }
 0x343   : > { %1997 = vrot.lane.b32.xlu1 %v1705_v50, %s3046_s25 }
 0x34a   : > { %1803 = vrot.lane.b32.xlu0 %v3881_v56, %s3050_s29  ;;  %1905 = vrot.lane.b32.xlu2 %v1705_v50, %s3048_s27 }
 0x34b   : > { %1951 = vrot.lane.b32.xlu1 %v1705_v50, %s3047_s26 }
 0x352   : > { %1711 = vrot.lane.b32.xlu0 %v3881_v56, %s3052_s12  ;;  %1759 = vrot.lane.b32.xlu2 %v1705_v50, %s3051_s30 }
 0x353   : > { %1805 = vrot.lane.b32.xlu1 %v1705_v50, %s3050_s29 }
 0x35a   : > { %1851 = vrot.lane.b32.xlu0 %v1705_v50, %s3049_s28  ;;  %1907 = vrot.lane.b32.xlu2 %v3862_v21, %s3048_s27 }
 0x35b   : > { %1713 = vrot.lane.b32.xlu1 %v1705_v50, %s3052_s12 }
 0x362   : > { %1955 = vrot.lane.b32.xlu2 %v3873_v38, %s3047_s26  ;;  %1999 = vrot.lane.b32.xlu0 %v3862_v21, %s3046_s25 }
 0x363   : > { %1953 = vrot.lane.b32.xlu1 %v3862_v21, %s3047_s26 }
 0x36a   : > { %1809 = vrot.lane.b32.xlu2 %v3873_v38, %s3050_s29  ;;  %1853 = vrot.lane.b32.xlu0 %v3862_v21, %s3049_s28 }
 0x36b   : > { %1807 = vrot.lane.b32.xlu1 %v3862_v21, %s3050_s29 }
 0x372   : > { %1763 = vrot.lane.b32.xlu2 %v3873_v38, %s3051_s30  ;;  %1909 = vrot.lane.b32.xlu0 %v3873_v38, %s3048_s27 }
 0x373   : > { %1761 = vrot.lane.b32.xlu1 %v3862_v21, %s3051_s30 }
 0x374   : > { %v3939_v63 = vpop.permute.xlu2 %1945 }
 0x37a   : > { %2003 = vrot.lane.b32.xlu2 %v3887_v60, %s3046_s25  ;;  %1911 = vrot.lane.b32.xlu0 %v3887_v60, %s3048_s27 }
 0x37b   : > { %2001 = vrot.lane.b32.xlu1 %v3873_v38, %s3046_s25 }
 0x37c   : > { %v3947_v2 = vpop.permute.xlu2 %1799 }
 0x382   : > { %1957 = vrot.lane.b32.xlu2 %v3887_v60, %s3047_s26  ;;  %1765 = vrot.lane.b32.xlu0 %v3887_v60, %s3051_s30 }
 0x383   : > { %1855 = vrot.lane.b32.xlu1 %v3873_v38, %s3049_s28 }
 0x384   : > { %v3955_v3 = vpop.permute.xlu2 %1753 }
 0x38a   : > { %1811 = vrot.lane.b32.xlu2 %v3887_v60, %s3050_s29  ;;  %2005 = vrot.lane.b32.xlu0 %v3899_v59, %s3046_s25 }
 0x38b   : > { %1857 = vrot.lane.b32.xlu1 %v3887_v60, %s3049_s28 }
 0x38c   : > { %v1900_v4 = vpop.permute.xlu0 %1899  ;;  %v3963_v5 = vpop.permute.xlu2 %1993 }
 0x38d   : > { %v3965_v13 = vpop.permute.xlu1 %1991 }
 0x392   : > { %1859 = vrot.lane.b32.xlu2 %v3899_v59, %s3049_s28  ;;  %1715 = vrot.lane.b32.xlu0 %v3862_v21, %s3052_s12  ;;  %s2916_s28 = sshll.u32 %s4376_s22, 4 }
 0x393   : > { %1707 = vrot.lane.b32.xlu1 %v3846_v15, %s3052_s12  ;;  %s408_s17 = scalar_lea.vmem %s4374_s11, %s2916_s28 }
 0x394   : > { %v1948_v9 = vpop.permute.xlu0 %1947  ;;  %v3973_v14 = vpop.permute.xlu2 %1847 }
 0x395   : > { %v3975_v61 = vpop.permute.xlu1 %1845 }
 0x39a   : > { %1719 = vrot.lane.b32.xlu2 %v3887_v60, %s3052_s12  ;;  %1959 = vrot.lane.b32.xlu0 %v3899_v59, %s3047_s26 }
 0x39b   : > { %1913 = vrot.lane.b32.xlu1 %v3899_v59, %s3048_s27 }
 0x39c   : > { %v1802_v17 = vpop.permute.xlu0 %1801  ;;  %v3983_v19 = vpop.permute.xlu2 %1849 }
 0x39d   : > { %v3985_v20 = vpop.permute.xlu1 %1901 }
 0x3a2   : > { %1709 = vrot.lane.b32.xlu2 %v3855_v29, %s3052_s12  ;;  %1813 = vrot.lane.b32.xlu0 %v3899_v59, %s3050_s29 }
 0x3a3   : > { %1767 = vrot.lane.b32.xlu1 %v3899_v59, %s3051_s30 }
 0x3a4   : > { %v1756_v54 = vpop.permute.xlu0 %1755  ;;  %v3993_v22 = vpop.permute.xlu2 %1905 }
 0x3a5   : > { %v3995_v23 = vpop.permute.xlu1 %1903 }
 0x3aa   : > { %2041 = vrot.lane.b32.xlu2 %v3881_v56, %s3053_s13  ;;  %2043 = vrot.lane.b32.xlu0 %v1705_v50, %s3053_s13 }
 0x3ab   : > { %1717 = vrot.lane.b32.xlu1 %v3873_v38, %s3052_s12 }
 0x3ac   : > { %v4002_v26 = vpop.permute.xlu0 %1995  ;;  %v4004_v27 = vpop.permute.xlu2 %1759 }
 0x3ad   : > { %v4006_v39 = vpop.permute.xlu1 %1757 }
 0x3b2   : > { %2051 = vrot.lane.b32.xlu2 %v3899_v59, %s3053_s13  ;;  %1721 = vrot.lane.b32.xlu0 %v3899_v59, %s3052_s12  ;;  %s403_s12 = scalar_lea.vmem %s4365_s2, %s2916_s28 }
 0x3b3   : > { %2049 = vrot.lane.b32.xlu1 %v3887_v60, %s3053_s13 }
 0x3b4   : > { %v4021_v8 = vpop.permute.xlu0 %1949  ;;  %v1908_v31 = vpop.permute.xlu2 %1907 }
 0x3b5   : > { %v4023_v58 = vpop.permute.xlu1 %1997  ;;  %v1915_v51 = vsel %vm539_vm2, %v1900_v4, %v1908_v31  ;;  %v1919_v32 = vsel %vm539_vm2, %v1908_v31, %v1900_v4 }
 0x3b6   : > { %v1929_v0 = vmul.f32 %v4015_v30, %v1915_v51  ;;  %v1930_v52 = vmul.f32 %v4017_v18, %v1919_v32 }
 0x3b8   : > { %v1937_v33 = vpack.c.bf16 %v1930_v52, %v1929_v0 }
 0x3ba   : > { %1941 = vst [vmem:[#allocation2 + $0xa0] sm:$0xff] %v1937_v33  ;;  %2045 = vrot.lane.b32.xlu2 %v3862_v21, %s3053_s13  ;;  %2037 = vrot.lane.b32.xlu0 %v3846_v15, %s3053_s13 }
 0x3bb   : > { %2039 = vrot.lane.b32.xlu1 %v3855_v29, %s3053_s13 }
 0x3bc   : > { %v4044_v34 = vpop.permute.xlu0 %1803  ;;  %v1956_v40 = vpop.permute.xlu2 %1955 }
 0x3bd   : > { %v4046_v41 = vpop.permute.xlu1 %1951  ;;  %v1962_v6 = vsel %vm567_vm1, %v1948_v9, %v1956_v40  ;;  %v1966_v21 = vsel %vm567_vm1, %v1956_v40, %v1948_v9  ;;  %v4096_v9 = vperm.slane %v2765_v62, 0 }
 0x3be   : > { %v1977_v15 = vmul.f32 %v4038_v35, %v1962_v6  ;;  %v1978_v44 = vmul.f32 %v4040_v36, %v1966_v21 }
 0x3c0   : > { %v1984_v29 = vpack.c.bf16 %v1978_v44, %v1977_v15 }
 0x3c2   : > { %1988 = vst [vmem:[#allocation2 + $0xc8] sm:$0xff] %v1984_v29  ;;  %2047 = vrot.lane.b32.xlu0 %v3873_v38, %s3053_s13 }
 0x3c3   : > { %2124 = vperm.xlu1 %3037, %v2121_v12  }
 0x3c4   : > { %v4066_v48 = vpop.permute.xlu0 %1711  ;;  %v1810_v10 = vpop.permute.xlu2 %1809 }
 0x3c5   : > { %v4068_v55 = vpop.permute.xlu1 %1805  ;;  %v1816_v43 = vsel %vm479_vm4, %v1802_v17, %v1810_v10  ;;  %v1820_v56 = vsel %vm479_vm4, %v1810_v10, %v1802_v17  ;;  %v4098_v17 = vperm.slane %v2765_v62, 1  ;;  %v4127_v10 = vperm.slane %v2762_v11, 0 }
 0x3c6   : > { %v1831_v37 = vmul.f32 %v4062_v47, %v1820_v56  ;;  %v1832_v38 = vmul.f32 %v4064_v16, %v1816_v43 }
 0x3c8   : > { %v1838_v60 = vpack.c.bf16 %v1832_v38, %v1831_v37 }
 0x3ca   : > { %1842 = vst [vmem:[#allocation2 + $0x48] sm:$0xff] %v1838_v60 }
 0x3cc   : > { %v4083_v57 = vpop.permute.xlu0 %1851  ;;  %v1764_v46 = vpop.permute.xlu2 %1763 }
 0x3cd   : > { %v4085_v42 = vpop.permute.xlu1 %1713  ;;  %v1770_v45 = vsel %vm451_vm5, %v1756_v54, %v1764_v46  ;;  %v1774_v49 = vsel %vm451_vm5, %v1764_v46, %v1756_v54 }
 0x3ce   : > { %v1785_v50 = vmul.f32 %v4079_v24, %v1774_v49  ;;  %v1786_v59 = vmul.f32 %v4081_v25, %v1770_v45 }
 0x3d0   : > { %v1792_v4 = vpack.c.bf16 %v1786_v59, %v1785_v50 }
 0x3d2   : > { %1796 = vst [vmem:[#allocation2 + $0x28] sm:$0xff] %v1792_v4 }
 0x3d4   : > { %v2004_v28 = vpop.permute.xlu2 %2003  ;;  %v2000_v31 = vpop.permute.xlu0 %1999 }
 0x3d5   : > { %v2009_v54 = vsel %vm595_vm0, %v4002_v26, %v2004_v28  ;;  %v2013_v51 = vsel %vm595_vm0, %v2004_v28, %v4002_v26  ;;  %v1954_v32 = vpop.permute.xlu1 %1953  ;;  %v2007_v0 = vsel %vm595_vm0, %v3965_v13, %v2000_v31  ;;  %v2011_v52 = vsel %vm595_vm0, %v2000_v31, %v3965_v13 }
 0x3d6   : > { %v2025_v1 = vmul.f32 %v4096_v9, %v2009_v54  ;;  %v2026_v33 = vmul.f32 %v4098_v17, %v2013_v51  ;;  %v1961_v40 = vsel %vm567_vm1, %v3939_v63, %v1954_v32  ;;  %v1965_v26 = vsel %vm567_vm1, %v1954_v32, %v3939_v63 }
 0x3d7   : > { %v1975_v6 = vmul.f32 %v4038_v35, %v1961_v40  ;;  %v1976_v21 = vmul.f32 %v4040_v36, %v1965_v26  ;;  %v2021_v15 = vmul.f32 %v4096_v9, %v2007_v0  ;;  %v2022_v13 = vmul.f32 %v4098_v17, %v2011_v52 }
 0x3d8   : > { %v2031_v44 = vpack.c.bf16 %v2026_v33, %v2025_v1  ;;  %v4129_v63 = vperm.slane %v2762_v11, 1 }
 0x3d9   : > { %v1983_v29 = vpack.c.bf16 %v1976_v21, %v1975_v6  ;;  %v2029_v12 = vpack.c.bf16 %v2022_v13, %v2021_v15 }
 0x3da   : > { %2035 = vst [vmem:[#allocation2 + $0xf0] sm:$0xff] %v2031_v44 }
 0x3db   : > { %1987 = vst [vmem:[#allocation2 + $0xc0] sm:$0xff] %v1983_v29 }
 0x3dc   : > { %2033 = vst [vmem:[#allocation2 + $0xe0] sm:$0xff] %v2029_v12  ;;  %v1958_v43 = vpop.permute.xlu2 %1957  ;;  %v1854_v56 = vpop.permute.xlu0 %1853 }
 0x3dd   : > { %v1963_v37 = vsel %vm567_vm1, %v4021_v8, %v1958_v43  ;;  %v1967_v38 = vsel %vm567_vm1, %v1958_v43, %v4021_v8  ;;  %v1808_v53 = vpop.permute.xlu1 %1807  ;;  %v1861_v60 = vsel %vm507_vm3, %v3975_v61, %v1854_v56  ;;  %v1865_v46 = vsel %vm507_vm3, %v1854_v56, %v3975_v61 }
 0x3de   : > { %v1979_v45 = vmul.f32 %v4038_v35, %v1963_v37  ;;  %v1980_v49 = vmul.f32 %v4040_v36, %v1967_v38  ;;  %v1815_v50 = vsel %vm479_vm4, %v3947_v2, %v1808_v53  ;;  %v1819_v8 = vsel %vm479_vm4, %v1808_v53, %v3947_v2 }
 0x3df   : > { %v1829_v59 = vmul.f32 %v4062_v47, %v1819_v8  ;;  %v1830_v62 = vmul.f32 %v4064_v16, %v1815_v50  ;;  %v1875_v4 = vmul.f32 %v4127_v10, %v1865_v46  ;;  %v1876_v61 = vmul.f32 %v4129_v63, %v1861_v60 }
 0x3e0   : > { %v1985_v28 = vpack.c.bf16 %v1980_v49, %v1979_v45 }
 0x3e1   : > { %v1837_v31 = vpack.c.bf16 %v1830_v62, %v1829_v59  ;;  %v1883_v54 = vpack.c.bf16 %v1876_v61, %v1875_v4  ;;  %v1731_v59 = vld [vmem:[%s4363_s0] sm:$0x3] }
 0x3e2   : > { %1989 = vst [vmem:[#allocation2 + $0xd0] sm:$0xff] %v1985_v28  ;;  %v4206_v28 = vperm.slane %v1731_v59, 0 }
 0x3e3   : > { %1841 = vst [vmem:[#allocation2 + $0x40] sm:$0xff] %v1837_v31  ;;  %v4208_v31 = vperm.slane %v1731_v59, 1 }
 0x3e4   : > { %1887 = vst [vmem:[#allocation2 + $0x60] sm:$0xff] %v1883_v54  ;;  %v1812_v51 = vpop.permute.xlu2 %1811  ;;  %v1910_v32 = vpop.permute.xlu0 %1909 }
 0x3e5   : > { %v1817_v2 = vsel %vm479_vm4, %v4044_v34, %v1812_v51  ;;  %v1821_v0 = vsel %vm479_vm4, %v1812_v51, %v4044_v34  ;;  %v1762_v52 = vpop.permute.xlu1 %1761  ;;  %v1916_v1 = vsel %vm539_vm2, %v3985_v20, %v1910_v32  ;;  %v1920_v33 = vsel %vm539_vm2, %v1910_v32, %v3985_v20 }
 0x3e6   : > { %v1833_v40 = vmul.f32 %v4062_v47, %v1821_v0  ;;  %v1834_v26 = vmul.f32 %v4064_v16, %v1817_v2  ;;  %v1769_v6 = vsel %vm451_vm5, %v3955_v3, %v1762_v52  ;;  %v1773_v34 = vsel %vm451_vm5, %v1762_v52, %v3955_v3 }
 0x3e7   : > { %v1783_v21 = vmul.f32 %v4079_v24, %v1773_v34  ;;  %v1784_v15 = vmul.f32 %v4081_v25, %v1769_v6  ;;  %v1931_v13 = vmul.f32 %v4015_v30, %v1916_v1  ;;  %v1932_v20 = vmul.f32 %v4017_v18, %v1920_v33 }
 0x3e8   : > { %v1839_v44 = vpack.c.bf16 %v1834_v26, %v1833_v40 }
 0x3e9   : > { %v1791_v11 = vpack.c.bf16 %v1784_v15, %v1783_v21  ;;  %v1938_v29 = vpack.c.bf16 %v1932_v20, %v1931_v13 }
 0x3ea   : > { %1843 = vst [vmem:[#allocation2 + $0x50] sm:$0xff] %v1839_v44 }
 0x3eb   : > { %1795 = vst [vmem:[#allocation2 + $0x20] sm:$0xff] %v1791_v11 }
 0x3ec   : > { %1942 = vst [vmem:[#allocation2 + $0xa8] sm:$0xff] %v1938_v29  ;;  %v1860_v12 = vpop.permute.xlu2 %1859  ;;  %v1912_v43 = vpop.permute.xlu0 %1911 }
 0x3ed   : > { %v1864_v3 = vsel %vm507_vm3, %v4083_v57, %v1860_v12  ;;  %v1868_v56 = vsel %vm507_vm3, %v1860_v12, %v4083_v57  ;;  %v2002_v37 = vpop.permute.xlu1 %2001  ;;  %v1917_v38 = vsel %vm539_vm2, %v3995_v23, %v1912_v43  ;;  %v1921_v53 = vsel %vm539_vm2, %v1912_v43, %v3995_v23 }
 0x3ee   : > { %v1881_v60 = vmul.f32 %v4127_v10, %v1868_v56  ;;  %v1882_v46 = vmul.f32 %v4129_v63, %v1864_v3  ;;  %v2008_v45 = vsel %vm595_vm0, %v3963_v5, %v2002_v37  ;;  %v2012_v57 = vsel %vm595_vm0, %v2002_v37, %v3963_v5 }
 0x3ef   : > { %v2023_v49 = vmul.f32 %v4096_v9, %v2008_v45  ;;  %v2024_v50 = vmul.f32 %v4098_v17, %v2012_v57  ;;  %v1933_v8 = vmul.f32 %v4015_v30, %v1917_v38  ;;  %v1934_v23 = vmul.f32 %v4017_v18, %v1921_v53  ;;  %v2889_v45 = vld [vmem:[#allocation2 + $0xf0] sm:$0xf] }
 0x3f0   : > { %v1886_v62 = vpack.c.bf16 %v1882_v46, %v1881_v60 }
 0x3f1   : > { %v2030_v4 = vpack.c.bf16 %v2024_v50, %v2023_v49  ;;  %v1939_v61 = vpack.c.bf16 %v1934_v23, %v1933_v8  ;;  %v3012_v49 = vld [vmem:[#allocation2 + $0xf4] sm:$0xf] }
 0x3f2   : > { %1890 = vst [vmem:[#allocation2 + $0x78] sm:$0xff] %v1886_v62 }
 0x3f3   : > { %2034 = vst [vmem:[#allocation2 + $0xe8] sm:$0xff] %v2030_v4 }
 0x3f4   : > { %1943 = vst [vmem:[#allocation2 + $0xb0] sm:$0xff] %v1939_v61  ;;  %v1720_v5 = vpop.permute.xlu2 %1719  ;;  %v1766_v54 = vpop.permute.xlu0 %1765 }
 0x3f5   : > { %v1725_v51 = vsel %vm424_vm6, %v4066_v48, %v1720_v5  ;;  %v1729_v32 = vsel %vm424_vm6, %v1720_v5, %v4066_v48  ;;  %v1856_v2 = vpop.permute.xlu1 %1855  ;;  %v1771_v0 = vsel %vm451_vm5, %v4006_v39, %v1766_v54  ;;  %v1775_v52 = vsel %vm451_vm5, %v1766_v54, %v4006_v39 }
 0x3f6   : > { %v1741_v1 = vmul.f32 %v4206_v28, %v1729_v32  ;;  %v1742_v33 = vmul.f32 %v4208_v31, %v1725_v51  ;;  %v1862_v40 = vsel %vm507_vm3, %v3973_v14, %v1856_v2  ;;  %v1866_v48 = vsel %vm507_vm3, %v1856_v2, %v3973_v14  ;;  %v2881_v2 = vld [vmem:[#allocation2 + $0xe0] sm:$0xf] }
 0x3f7   : > { %v1877_v26 = vmul.f32 %v4127_v10, %v1866_v48  ;;  %v1878_v6 = vmul.f32 %v4129_v63, %v1862_v40  ;;  %v1787_v34 = vmul.f32 %v4079_v24, %v1775_v52  ;;  %v1788_v39 = vmul.f32 %v4081_v25, %v1771_v0  ;;  %v3010_v40 = vld [vmem:[#allocation2 + $0xe4] sm:$0xf] }
 0x3f8   : > { %v1747_v21 = vpack.c.bf16 %v1742_v33, %v1741_v1 }
 0x3f9   : > { %v1884_v15 = vpack.c.bf16 %v1878_v6, %v1877_v26  ;;  %v1793_v13 = vpack.c.bf16 %v1788_v39, %v1787_v34  ;;  %v2827_v57 = vld [vmem:[#allocation2 + $0x78] sm:$0xf0] }
 0x3fa   : > { %1751 = vst [vmem:[#allocation2 + $0x10] sm:$0xff] %v1747_v21  ;;  %v3011_v59 = vld [vmem:[#allocation2 + $0xe4] sm:$0xf0]  ;;  %v2883_v54 = vld [vmem:[#allocation2 + $0xe8] sm:$0xf0] }
 0x3fb   : > { %1888 = vst [vmem:[#allocation2 + $0x68] sm:$0xff] %v1884_v15  ;;  %v2882_v1 = vor.u32 %v3011_v59, %v2881_v2  ;;  %v2886_v34 = vor.u32 %v3010_v40, %v2883_v54  ;;  %v2809_v40 = vld [vmem:[#allocation2 + $0x50] sm:$0xf] }
 0x3fc   : > { %1797 = vst [vmem:[#allocation2 + $0x30] sm:$0xff] %v1793_v13  ;;  %v2006_v20 = vpop.permute.xlu0 %2005 }
 0x3fd   : > { %v1858_v44 = vpop.permute.xlu1 %1857  ;;  %v2010_v14 = vsel %vm595_vm0, %v4023_v58, %v2006_v20  ;;  %v2014_v11 = vsel %vm595_vm0, %v2006_v20, %v4023_v58  ;;  %v2817_v20 = vld [vmem:[#allocation2 + $0x60] sm:$0xf] }
 0x3fe   : > { %v1863_v29 = vsel %vm507_vm3, %v3983_v19, %v1858_v44  ;;  %v1867_v12 = vsel %vm507_vm3, %v1858_v44, %v3983_v19  ;;  %v2027_v43 = vmul.f32 %v4096_v9, %v2010_v14  ;;  %v2028_v3 = vmul.f32 %v4098_v17, %v2014_v11  ;;  %v2994_v44 = vld [vmem:[#allocation2 + $0x64] sm:$0xf] }
 0x3ff   : > { %v1879_v56 = vmul.f32 %v4127_v10, %v1867_v12  ;;  %v1880_v37 = vmul.f32 %v4129_v63, %v1863_v29  ;;  %v4256_v10 = vpop.permute.xlu2 %1709  ;;  %v2997_v63 = vld [vmem:[#allocation2 + $0x74] sm:$0xf0] }
 0x400   : > { %v2032_v38 = vpack.c.bf16 %v2028_v3, %v2027_v43 }
 0x401   : > { %v1885_v53 = vpack.c.bf16 %v1880_v37, %v1879_v56 }
 0x402   : > { %2036 = vst [vmem:[#allocation2 + $0xf8] sm:$0xff] %v2032_v38  ;;  %v2995_v52 = vld [vmem:[#allocation2 + $0x64] sm:$0xf0]  ;;  %v2819_v33 = vld [vmem:[#allocation2 + $0x68] sm:$0xf0] }
 0x403   : > { %1889 = vst [vmem:[#allocation2 + $0x70] sm:$0xff] %v1885_v53  ;;  %v2822_v29 = vor.u32 %v2994_v44, %v2819_v33  ;;  %v3003_v44 = vld [vmem:[#allocation2 + $0xa4] sm:$0xf0] }
 0x404   : > { %v1716_v58 = vpop.permute.xlu0 %1715 }
 0x405   : > { %v1708_v60 = vpop.permute.xlu1 %1707 }
 0x406   : > { %v1723_v46 = vsel %vm424_vm6, %v1708_v60, %v1716_v58  ;;  %v1727_v19 = vsel %vm424_vm6, %v1716_v58, %v1708_v60 }
 0x407   : > { %v1737_v9 = vmul.f32 %v4206_v28, %v1727_v19  ;;  %v1738_v17 = vmul.f32 %v4208_v31, %v1723_v46  ;;  %v4274_v3 = vpop.permute.xlu2 %2041  ;;  %v2873_v46 = vld [vmem:[#allocation2 + $0xd0] sm:$0xf]  ;;  %v2865_v19 = vld [vmem:[#allocation2 + $0xc0] sm:$0xf] }
 0x409   : > { %v1745_v50 = vpack.c.bf16 %v1738_v17, %v1737_v9  ;;  %v3013_v8 = vld [vmem:[#allocation2 + $0xf4] sm:$0xf0]  ;;  %v2891_v23 = vld [vmem:[#allocation2 + $0xf8] sm:$0xf0] }
 0x40a   : > { %v2825_v62 = vld [vmem:[#allocation2 + $0x70] sm:$0xf]  ;;  %v2996_v4 = vld [vmem:[#allocation2 + $0x74] sm:$0xf]  ;;  %v2890_v61 = vor.u32 %v3013_v8, %v2889_v45  ;;  %v2894_v5 = vor.u32 %v3012_v49, %v2891_v23  ;;  %v2867_v8 = vld [vmem:[#allocation2 + $0xc8] sm:$0xf0] }
 0x40b   : > { %1749 = vst [vmem:[#allocation2] sm:$0xff] %v1745_v50  ;;  %v2826_v51 = vor.u32 %v2997_v63, %v2825_v62  ;;  %v2830_v32 = vor.u32 %v2996_v4, %v2827_v57  ;;  %v3008_v45 = vld [vmem:[#allocation2 + $0xd4] sm:$0xf]  ;;  %v3007_v50 = vld [vmem:[#allocation2 + $0xc4] sm:$0xf0] }
 0x40c   : > { %2333 = vmatpush.bf16.msra.mxu2 %v2890_v61  ;;  %2372 = vmatpush.bf16.msra.mxu0 %v2894_v5  ;;  %v1960_v0 = vpop.permute.xlu0 %1959  ;;  %v2866_v4 = vor.u32 %v3007_v50, %v2865_v19  ;;  %v3000_v50 = vld [vmem:[#allocation2 + $0x94] sm:$0xf] }
 0x40d   : > { %2320 = vmatpush.bf16.msrb.mxu1 %v2826_v51  ;;  %2359 = vmatpush.bf16.msrb.mxu3 %v2830_v32  ;;  %v1914_v48 = vpop.permute.xlu1 %1913  ;;  %v1964_v26 = vsel %vm567_vm1, %v4046_v41, %v1960_v0  ;;  %v1968_v6 = vsel %vm567_vm1, %v1960_v0, %v4046_v41  ;;  %v2818_v41 = vor.u32 %v2995_v52, %v2817_v20  ;;  %v3004_v20 = vld [vmem:[#allocation2 + $0xb4] sm:$0xf] }
 0x40e   : > { %v1918_v39 = vsel %vm539_vm2, %v3993_v22, %v1914_v48  ;;  %v1922_v21 = vsel %vm539_vm2, %v1914_v48, %v3993_v22  ;;  %v1981_v15 = vmul.f32 %v4038_v35, %v1964_v26  ;;  %v1982_v13 = vmul.f32 %v4040_v36, %v1968_v6  ;;  %v2992_v48 = vld [vmem:[#allocation2 + $0x54] sm:$0xf] }
 0x40f   : > { %v1935_v14 = vmul.f32 %v4015_v30, %v1918_v39  ;;  %v1936_v11 = vmul.f32 %v4017_v18, %v1922_v21  ;;  %v2857_v39 = vld [vmem:[#allocation2 + $0xb0] sm:$0xf] }
 0x410   : > { %v1986_v12 = vpack.c.bf16 %v1982_v13, %v1981_v15  ;;  %2334 = vmatpush.bf16.msra.mxu2 %v2882_v1  ;;  %2373 = vmatpush.bf16.msra.mxu0 %v2886_v34  ;;  %v2801_v1 = vld [vmem:[#allocation2 + $0x40] sm:$0xf] }
 0x411   : > { %v1940_v43 = vpack.c.bf16 %v1936_v11, %v1935_v14  ;;  %2321 = vmatpush.bf16.msrb.mxu1 %v2818_v41  ;;  %2360 = vmatpush.bf16.msrb.mxu3 %v2822_v29  ;;  %v2991_v11 = vld [vmem:[#allocation2 + $0x44] sm:$0xf0] }
 0x412   : > { %1990 = vst [vmem:[#allocation2 + $0xd8] sm:$0xff] %v1986_v12  ;;  %v2802_v29 = vor.u32 %v2991_v11, %v2801_v1  ;;  %v2849_v12 = vld [vmem:[#allocation2 + $0xa0] sm:$0xf] }
 0x413   : > { %1944 = vst [vmem:[#allocation2 + $0xb8] sm:$0xff] %v1940_v43  ;;  %v2990_v43 = vld [vmem:[#allocation2 + $0x44] sm:$0xf] }
 0x414   : > { %v1814_v22 = vpop.permute.xlu0 %1813 }
 0x415   : > { %v1768_v35 = vpop.permute.xlu1 %1767  ;;  %v1818_v30 = vsel %vm479_vm4, %v4068_v55, %v1814_v22  ;;  %v1822_v18 = vsel %vm479_vm4, %v1814_v22, %v4068_v55  ;;  %v2766_v55 = vld [vmem:[%s4363_s0 + $0x10] sm:$0x3]  ;;  %v2851_v22 = vld [vmem:[#allocation2 + $0xa8] sm:$0xf0] }
 0x416   : > { %v1772_v36 = vsel %vm451_vm5, %v4004_v27, %v1768_v35  ;;  %v1776_v56 = vsel %vm451_vm5, %v1768_v35, %v4004_v27  ;;  %v1835_v37 = vmul.f32 %v4062_v47, %v1822_v18  ;;  %v1836_v38 = vmul.f32 %v4064_v16, %v1818_v30 }
 0x417   : > { %v1789_v53 = vmul.f32 %v4079_v24, %v1776_v56  ;;  %v1790_v58 = vmul.f32 %v4081_v25, %v1772_v36  ;;  %v4295_v57 = vperm.slane %v2766_v55, 0  ;;  %v4297_v16 = vperm.slane %v2766_v55, 1  ;;  %v3006_v24 = vld [vmem:[#allocation2 + $0xc4] sm:$0xf]  ;;  %v2052_v25 = vpop.permute.xlu2 %2051 }
 0x418   : > { %v1840_v60 = vpack.c.bf16 %v1836_v38, %v1835_v37  ;;  %v2870_v61 = vor.u32 %v3006_v24, %v2867_v8  ;;  %v2850_v36 = vor.u32 %v3003_v44, %v2849_v12  ;;  %v3002_v55 = vld [vmem:[#allocation2 + $0xa4] sm:$0xf] }
 0x419   : > { %v1794_v9 = vpack.c.bf16 %v1790_v58, %v1789_v53  ;;  %v3009_v17 = vld [vmem:[#allocation2 + $0xd4] sm:$0xf0]  ;;  %v2875_v63 = vld [vmem:[#allocation2 + $0xd8] sm:$0xf0]  ;;  %v2803_v58 = vld [vmem:[#allocation2 + $0x48] sm:$0xf0]  ;;  %v2854_v19 = vor.u32 %v3002_v55, %v2851_v22 }
 0x41a   : > { %1844 = vst [vmem:[#allocation2 + $0x58] sm:$0xff] %v1840_v60  ;;  %v2874_v27 = vor.u32 %v3009_v17, %v2873_v46  ;;  %v2878_v47 = vor.u32 %v3008_v45, %v2875_v63  ;;  %v3005_v52 = vld [vmem:[#allocation2 + $0xb4] sm:$0xf0]  ;;  %v2859_v26 = vld [vmem:[#allocation2 + $0xb8] sm:$0xf0] }
 0x41b   : > { %1798 = vst [vmem:[#allocation2 + $0x38] sm:$0xff] %v1794_v9  ;;  %v2858_v15 = vor.u32 %v3005_v52, %v2857_v39  ;;  %v2862_v14 = vor.u32 %v3004_v20, %v2859_v26  ;;  %v3001_v17 = vld [vmem:[#allocation2 + $0x94] sm:$0xf0]  ;;  %v2833_v52 = vld [vmem:[#allocation2 + $0x80] sm:$0xf] }
 0x41c   : > { %2335 = vmatpush.bf16.msra.mxu2 %v2874_v27  ;;  %2374 = vmatpush.bf16.msra.mxu0 %v2878_v47  ;;  %v2044_v49 = vpop.permute.xlu0 %2043  ;;  %v2843_v27 = vld [vmem:[#allocation2 + $0x98] sm:$0xf0]  ;;  %v2841_v47 = vld [vmem:[#allocation2 + $0x90] sm:$0xf]  ;;  %v2787_v26 = vld [vmem:[#allocation2 + $0x28] sm:$0xf0] }
 0x41d   : > { %v1718_v23 = vpop.permute.xlu1 %1717  ;;  %v2056_v59 = vsel %vm623_vm7, %v2044_v49, %v2052_v25  ;;  %v2060_v62 = vsel %vm623_vm7, %v2052_v25, %v2044_v49  ;;  %v2842_v25 = vor.u32 %v3001_v17, %v2841_v47  ;;  %v2988_v49 = vld [vmem:[#allocation2 + $0x34] sm:$0xf] }
 0x41e   : > { %v1724_v5 = vsel %vm424_vm6, %v4256_v10, %v1718_v23  ;;  %v1728_v54 = vsel %vm424_vm6, %v1718_v23, %v4256_v10  ;;  %v2073_v51 = vmul.f32 %v4295_v57, %v2056_v59  ;;  %v2074_v32 = vmul.f32 %v4297_v16, %v2060_v62  ;;  %v2785_v59 = vld [vmem:[#allocation2 + $0x20] sm:$0xf]  ;;  %v2999_v62 = vld [vmem:[#allocation2 + $0x84] sm:$0xf0]  ;;  %v2984_v20 = vld [vmem:[#allocation2 + $0x14] sm:$0xf] }
 0x41f   : > { %v1739_v2 = vmul.f32 %v4206_v28, %v1728_v54  ;;  %v1740_v0 = vmul.f32 %v4208_v31, %v1724_v5  ;;  %v2846_v23 = vor.u32 %v3000_v50, %v2843_v27  ;;  %v2986_v54 = vld [vmem:[#allocation2 + $0x24] sm:$0xf] }
 0x420   : > { %v2078_v33 = vpack.c.bf16 %v2074_v32, %v2073_v51  ;;  %2336 = vmatpush.bf16.msra.mxu2 %v2866_v4  ;;  %2375 = vmatpush.bf16.msra.mxu0 %v2870_v61  ;;  %v2046_v61 = vpop.permute.xlu2 %2045  ;;  %v2835_v51 = vld [vmem:[#allocation2 + $0x88] sm:$0xf0] }
 0x421   : > { %v1746_v6 = vpack.c.bf16 %v1740_v0, %v1739_v2  ;;  %v2993_v34 = vld [vmem:[#allocation2 + $0x54] sm:$0xf0]  ;;  %v2811_v10 = vld [vmem:[#allocation2 + $0x58] sm:$0xf0]  ;;  %v2987_v0 = vld [vmem:[#allocation2 + $0x24] sm:$0xf0] }
 0x422   : > { %2082 = vst [vmem:[#allocation2 + $0x118] sm:$0xff] %v2078_v33  ;;  %v2810_v21 = vor.u32 %v2993_v34, %v2809_v40  ;;  %v2814_v13 = vor.u32 %v2992_v48, %v2811_v10  ;;  %v2989_v9 = vld [vmem:[#allocation2 + $0x34] sm:$0xf0]  ;;  %v2795_v63 = vld [vmem:[#allocation2 + $0x38] sm:$0xf0]  ;;  %v2786_v40 = vor.u32 %v2987_v0, %v2785_v59  ;;  %v2834_v48 = vor.u32 %v2999_v62, %v2833_v52  ;;  %v2399_v52 = vld [vmem:[%s403_s12 + $0x8] sm:$0xff] }
 0x423   : > { %1750 = vst [vmem:[#allocation2 + $0x8] sm:$0xff] %v1746_v6  ;;  %v2798_v8 = vor.u32 %v2988_v49, %v2795_v63  ;;  %v2998_v6 = vld [vmem:[#allocation2 + $0x84] sm:$0xf]  ;;  %v2790_v34 = vor.u32 %v2986_v54, %v2787_v26 }
 0x424   : > { %2322 = vmatpush.bf16.msrb.mxu1 %v2810_v21  ;;  %2337 = vmatpush.bf16.msra.mxu2 %v2858_v15  ;;  %v1722_v41 = vpop.permute.xlu0 %1721  ;;  %v2838_v39 = vor.u32 %v2998_v6, %v2835_v51  ;;  %v2777_v15 = vld [vmem:[#allocation2 + $0x10] sm:$0xf]  ;;  %v2398_v51 = vld [vmem:[%s403_s12] sm:$0xff] }
 0x425   : > { %v2050_v35 = vpop.permute.xlu1 %2049  ;;  %2361 = vmatpush.bf16.msrb.mxu3 %v2814_v13  ;;  %2376 = vmatpush.bf16.msra.mxu0 %v2862_v14  ;;  %v1726_v30 = vsel %vm424_vm6, %v4085_v42, %v1722_v41  ;;  %v1730_v18 = vsel %vm424_vm6, %v1722_v41, %v4085_v42  ;;  %v2806_v42 = vor.u32 %v2990_v43, %v2803_v58 }
 0x426   : > { %v2055_v56 = vsel %vm623_vm7, %v4274_v3, %v2050_v35  ;;  %v2059_v37 = vsel %vm623_vm7, %v2050_v35, %v4274_v3  ;;  %v1743_v38 = vmul.f32 %v4206_v28, %v1730_v18  ;;  %v1744_v53 = vmul.f32 %v4208_v31, %v1726_v30  ;;  %v4332_v28 = vld [vmem:[%s4372_s9] sm:$0xff]  ;;  %v2793_v3 = vld [vmem:[#allocation2 + $0x30] sm:$0xf] }
 0x427   : > { %v2071_v60 = vmul.f32 %v4295_v57, %v2055_v56  ;;  %v2072_v46 = vmul.f32 %v4297_v16, %v2059_v37  ;;  %v2794_v24 = vor.u32 %v2989_v9, %v2793_v3  ;;  %v2130_v4 = vunpack.c.h.b16 %v4332_v28 }
 0x428   : > { %v1748_v45 = vpack.c.bf16 %v1744_v53, %v1743_v38  ;;  %2323 = vmatpush.bf16.msrb.mxu1 %v2802_v29  ;;  %2338 = vmatpush.bf16.msra.mxu2 %v2850_v36  ;;  %v2129_v22 = vunpack.c.l.b16 %v4332_v28  ;;  %v2769_v38 = vld [vmem:[#allocation2] sm:$0xf] }
 0x429   : > { %v2077_v31 = vpack.c.bf16 %v2072_v46, %v2071_v60  ;;  %2362 = vmatpush.bf16.msrb.mxu3 %v2806_v42  ;;  %2377 = vmatpush.bf16.msra.mxu0 %v2854_v19  ;;  %v2133_v10 = vpack.c.b16 %v2130_v4, %v2130_v4  ;;  %v2907_v29 = vld [vmem:[#allocation2 + $0x118] sm:$0xf0]  ;;  %v2982_v60 = vld [vmem:[#allocation2 + $0x4] sm:$0xf]  ;;  %v3017_v46 = vld [vmem:[#allocation2 + $0x114] sm:$0xf0] }
 0x42a   : > { %1752 = vst [vmem:[#allocation2 + $0x18] sm:$0xff] %v1748_v45  ;;  %v2983_v43 = vld [vmem:[#allocation2 + $0x4] sm:$0xf0]  ;;  %v2771_v18 = vld [vmem:[#allocation2 + $0x8] sm:$0xf0]  ;;  %v2132_v9 = vpack.c.b16 %v2129_v22, %v2129_v22 }
 0x42b   : > { %2081 = vst [vmem:[#allocation2 + $0x110] sm:$0xff] %v2077_v31  ;;  %v2770_v55 = vor.u32 %v2983_v43, %v2769_v38  ;;  %v2774_v42 = vor.u32 %v2982_v60, %v2771_v18 }
 0x42c   : > { %2324 = vmatpush.bf16.msrb.mxu1 %v2794_v24  ;;  %2339 = vmatpush.bf16.msra.mxu2 %v2842_v25  ;;  %v2038_v5 = vpop.permute.xlu0 %2037 }
 0x42d   : > { %2363 = vmatpush.bf16.msrb.mxu3 %v2798_v8  ;;  %2378 = vmatpush.bf16.msra.mxu0 %v2846_v23  ;;  %v2053_v32 = vsel %vm623_vm7, %v2038_v5, %v2046_v61  ;;  %v2057_v2 = vsel %vm623_vm7, %v2046_v61, %v2038_v5  ;;  %v2040_v35 = vpop.permute.xlu1 %2039 }
 0x42e   : > { %v2067_v1 = vmul.f32 %v4295_v57, %v2053_v32  ;;  %v2068_v33 = vmul.f32 %v4297_v16, %v2057_v2 }
 0x430   : > { %v2075_v21 = vpack.c.bf16 %v2068_v33, %v2067_v1  ;;  %2325 = vmatpush.bf16.msrb.mxu1 %v2786_v40  ;;  %2340 = vmatpush.bf16.msra.mxu2 %v2834_v48 }
 0x431   : > { %2364 = vmatpush.bf16.msrb.mxu3 %v2790_v34  ;;  %2379 = vmatpush.bf16.msra.mxu0 %v2838_v39  ;;  %v2985_v13 = vld [vmem:[#allocation2 + $0x14] sm:$0xf0]  ;;  %v2779_v44 = vld [vmem:[#allocation2 + $0x18] sm:$0xf0] }
 0x432   : > { %2079 = vst [vmem:[#allocation2 + $0x100] sm:$0xff] %v2075_v21  ;;  %v2778_v14 = vor.u32 %v2985_v13, %v2777_v15  ;;  %v2782_v11 = vor.u32 %v2984_v20, %v2779_v44  ;;  %v3016_v41 = vld [vmem:[#allocation2 + $0x114] sm:$0xf]  ;;  %v2905_v36 = vld [vmem:[#allocation2 + $0x110] sm:$0xf] }
 0x433   : > { %v2910_v12 = vor.u32 %v3016_v41, %v2907_v29  ;;  %2341 = vmatmul.bf16.vlgmr.msra.gmra.mxu2 %v2133_v10  ;;  %v2906_v19 = vor.u32 %v3017_v46, %v2905_v36 }
 0x434   : > { %2326 = vmatpush.bf16.msrb.mxu1 %v2778_v14  ;;  %v2048_v30 = vpop.permute.xlu0 %2047  ;;  %2380 = vmatmul.bf16.vlgmr.msra.gmra.mxu0 %v2133_v10 }
 0x435   : > { %2365 = vmatpush.bf16.msrb.mxu3 %v2782_v11  ;;  %v2054_v56 = vsel %vm623_vm7, %v2040_v35, %v2048_v30  ;;  %v2058_v37 = vsel %vm623_vm7, %v2048_v30, %v2040_v35  ;;  %2391 = vmatpush.bf16.msrb.mxu2 %v2910_v12  ;;  %v2125_v59 = vpop.permute.xlu1 %2124 }
 0x436   : > { %v2069_v53 = vmul.f32 %v4295_v57, %v2054_v56  ;;  %v2070_v58 = vmul.f32 %v4297_v16, %v2058_v37  ;;  %v2131_v57 = vunpack.c.l.b16 %v2120_v7 }
 0x438   : > { %v2076_v17 = vpack.c.bf16 %v2070_v58, %v2069_v53  ;;  %2327 = vmatpush.bf16.msrb.mxu1 %v2770_v55  ;;  %v2134_v3 = vpack.c.b16 %v2131_v57, %v2131_v57 }
 0x439   : > { %2366 = vmatpush.bf16.msrb.mxu3 %v2774_v42  ;;  %v2897_v45 = vld [vmem:[#allocation2 + $0x100] sm:$0xf]  ;;  %v3014_v63 = vld [vmem:[#allocation2 + $0x104] sm:$0xf] }
 0x43a   : > { %2080 = vst [vmem:[#allocation2 + $0x108] sm:$0xff] %v2076_v17 }
 0x43b   : > { %2328 = vmatmul.bf16.vlgmr.msrb.gmra.mxu1 %v2132_v9 }
 0x43c   : > { %2352 = vmatpush.bf16.msra.mxu1 %v2906_v19  ;;  %2367 = vmatmul.bf16.vlgmr.msrb.gmra.mxu3 %v2132_v9 }
 0x441   : > { %v3015_v16 = vld [vmem:[#allocation2 + $0x104] sm:$0xf0]  ;;  %v2899_v27 = vld [vmem:[#allocation2 + $0x108] sm:$0xf0] }
 0x442   : > { %v2898_v28 = vor.u32 %v3015_v16, %v2897_v45  ;;  %v2902_v31 = vor.u32 %v3014_v63, %v2899_v27 }
 0x444   : > { %2353 = vmatpush.bf16.msra.mxu1 %v2898_v28  ;;  %2392 = vmatpush.bf16.msrb.mxu2 %v2902_v31 }
 0x447   : > { %2912 = vmatmul.msk.bf16.vlgmr.msrb.gmra.mxu2 %vm1560_vm9, %v2134_v3 }
 0x44b   : > { %2911 = vmatmul.msk.bf16.vlgmr.msra.gmra.mxu1 %vm1560_vm9, %v2134_v3 }
 0x4b1   : > { %v2381_v47 = vpop.f32.mrf.mxu0 }
 0x4b6   : > { %v2342_v24 = vpop.f32.mrf.mxu2 }
 0x4b8   : > { %v2329_v25 = vpop.f32.mrf.mxu1 }
 0x4b9   : > { %v2383_v49 = vpop.f32.mrf.mxu0  ;;  %v2330_v62 = vadd.f32 %v2329_v25, %v2125_v59 }
 0x4bb   : > { %v2343_v61 = vadd.f32 %v2342_v24, %v2330_v62 }
 0x4be   : > { %v2344_v50 = vpop.f32.mrf.mxu2 }
 0x4bf   : > { %v2368_v8 = vpop.f32.mrf.mxu3 }
 0x4c0   : > { %v2331_v23 = vpop.f32.mrf.mxu1  ;;  %v2369_v4 = vadd.f32 %v2368_v8, %v2125_v59 }
 0x4c2   : > { %v2382_v32 = vadd.f32 %v2381_v47, %v2369_v4 }
 0x4c7   : > { %v2370_v5 = vpop.f32.mrf.mxu3 }
 0x4c8   : > { %v2355_v54 = vpop.f32.mrf.mxu1 }
 0x4c9   : > { %v2356_v2 = vadd.f32 %v2355_v54, %v2343_v61 }
 0x4ca   : > { %v2394_v0 = vpop.f32.mrf.mxu2 }
 0x4cb   : > { %v2400_v1 = vadd.f32 %v2398_v51, %v2356_v2  ;;  %v2395_v33 = vadd.f32 %v2394_v0, %v2382_v32 }
 0x4cd   : > { %v2401_v40 = vadd.f32 %v2399_v52, %v2395_v33  ;;  %2402 = vst [vmem:[%s408_s17] sm:$0xff] %v2400_v1 }
 0x4cf   : > { %2403 = vst [vmem:[%s408_s17 + $0x8] sm:$0xff] %v2401_v40 }
 0x4d0   : > { %v2357_v48 = vpop.f32.mrf.mxu1 }
 0x4d2   : > { %v2396_v26 = vpop.f32.mrf.mxu2 }
 0x4d3 PF: > { %s23_s21 = sadd.s32 1, %s3044_s21  }
 0x4d4   : > { %p20_p4 = scmp.ge.s32.totalorder %s23_s21, 4  }
 0x4d6   :  { %22 = sbr.rel (!%p20_p4) target bundleno = 3 (0x3), region = 104 }

</bundles_post_ra>
